<compile_context>
chip_gen: v5e
topology: v5e:2x2
jax: 0.10.0
libtpu: 0.0.40
codegen_flags: <defaults>
</compile_context>

<pallas_src>
import numpy as np
import jax
import jax.numpy as jnp
from jax import lax
from jax.experimental import pallas as pl
from jax.experimental.pallas import tpu as pltpu

LEAKY_SLOPE = 0.01   # nn.LeakyReLU default
LN_EPS = 1e-5        # nn.LayerNorm default


def _layernorm(x):
    mean = jnp.mean(x, axis=-1, keepdims=True)
    var = jnp.mean((x - mean) ** 2, axis=-1, keepdims=True)
    return (x - mean) * lax.rsqrt(var + LN_EPS)       # rsqrt -> EUP slot, not VALU


def _leaky(x):
    return jnp.where(x >= 0, x, LEAKY_SLOPE * x)


# ----------------------------------------------------------------------------
# Fused kernel: encoders -> shared kvs projection -> exclude-self attention ->
#               per-agent critic. Emits lane-padded all_qs (n_agents, tB, Ap).
# ----------------------------------------------------------------------------
def _fused_attention_critic_kernel(
        states_ref, sa_ref,
        w_s_ref, b_s_ref, w_sa_ref, b_sa_ref,
        w_kvs_ref, b_kvs_ref,
        w_c1s_ref, w_c1a_ref, b_c1_ref, w_c2_ref, b_c2_ref,
        allqs_ref, hsa_scratch):
    n_agents = states_ref.shape[0]
    tB = states_ref.shape[1]
    H = w_s_ref.shape[-1]
    D = w_c1a_ref.shape[1]
    n_heads = w_c1a_ref.shape[0] // n_agents
    bf16 = jnp.bfloat16

    # ---- per-agent encoders: LayerNorm -> Linear -> LeakyReLU (per-agent W) ----
    h_s = []
    for a in range(n_agents):
        s = states_ref[a]                     # (tB, S)   f32
        sa = sa_ref[a]                        # (tB, S+A) f32
        hs = _leaky(jnp.dot(_layernorm(s).astype(bf16), w_s_ref[a],
                            preferred_element_type=jnp.float32) + b_s_ref[a])
        hsa = _leaky(jnp.dot(_layernorm(sa).astype(bf16), w_sa_ref[a],
                             preferred_element_type=jnp.float32) + b_sa_ref[a])
        h_s.append(hs)                        # f32 (tB, H)
        # f32 scratch keeps this row-store 8-sublane aligned for any tB % 8 == 0
        # (a bf16 scratch would need masked RMW stores when tB % 16 != 0).
        hsa_scratch[pl.ds(a * tB, tB), :] = hsa

    # ---- shared key / value / selector: ONE matmul, N = 3*n_heads*D = 3*H ----
    hsa_all = hsa_scratch[...].astype(bf16)                        # (n_agents*tB, H)
    kvs = jnp.dot(hsa_all, w_kvs_ref[...],
                  preferred_element_type=jnp.float32) + b_kvs_ref[...]
    keys_all = kvs[:, 0:H]                                         # no bias (zeros added)
    vals_all = kvs[:, H:2 * H]
    sels_all = _leaky(kvs[:, 2 * H:3 * H])                         # 1/sqrt(D) folded in W/b

    # ---- exclude-self attention + per-agent critic ----
    for i in range(n_agents):
        head_vals = []
        for h in range(n_heads):
            c0 = h * D
            sel_i = sels_all[i * tB:(i + 1) * tB, c0:c0 + D]       # (tB, D)
            others = [j for j in range(n_agents) if j != i]
            logit_cols, v_others = [], []
            for j in others:
                k_j = keys_all[j * tB:(j + 1) * tB, c0:c0 + D]
                logit_cols.append(jnp.sum(sel_i * k_j, axis=-1, keepdims=True))
                v_others.append(vals_all[j * tB:(j + 1) * tB, c0:c0 + D])
            # packed lane-dense softmax over the (n_agents-1) "other" agents
            logits = jnp.concatenate(logit_cols, axis=-1)          # (tB, n_agents-1)
            m = jnp.max(logits, axis=-1, keepdims=True)
            p = jnp.exp(logits - m)
            inv_denom = pl.reciprocal(jnp.sum(p, axis=-1, keepdims=True), approx=True)
            w_att = p * inv_denom
            acc = w_att[:, 0:1] * v_others[0]
            for jj in range(1, len(others)):
                acc = acc + w_att[:, jj:jj + 1] * v_others[jj]
            head_vals.append(acc)                                  # (tB, D) f32

        # critic: LayerNorm over the virtual concat [senc, head_vals...] (width 2H),
        # computed analytically so no lane concat is materialized; fc1 is split.
        # TODO(synk): for deployments where D < 128 it may pay to materialize the
        #             concat in VMEM and run fc1 as one K=2H matmul; measure both.
        senc = h_s[i]
        ssum = jnp.sum(senc, axis=-1, keepdims=True)
        for hv in head_vals:
            ssum = ssum + jnp.sum(hv, axis=-1, keepdims=True)
        mean = ssum * (1.0 / float(2 * H))
        senc_c = senc - mean
        heads_c = [hv - mean for hv in head_vals]
        vsum = jnp.sum(senc_c * senc_c, axis=-1, keepdims=True)
        for hc in heads_c:
            vsum = vsum + jnp.sum(hc * hc, axis=-1, keepdims=True)
        inv_std = lax.rsqrt(vsum * (1.0 / float(2 * H)) + LN_EPS)

        acc1 = jnp.dot((senc_c * inv_std).astype(bf16), w_c1s_ref[i],
                       preferred_element_type=jnp.float32)
        for h, hc in enumerate(heads_c):
            acc1 = acc1 + jnp.dot((hc * inv_std).astype(bf16),
                                  w_c1a_ref[i * n_heads + h],
                                  preferred_element_type=jnp.float32)
        h1 = _leaky(acc1 + b_c1_ref[i])
        # lane-dense unmasked store: last dim padded to a multiple of 128 in wrapper
        allqs_ref[i] = jnp.dot(h1.astype(bf16), w_c2_ref[i],
                               preferred_element_type=jnp.float32) + b_c2_ref[i]


# ----------------------------------------------------------------------------
# Wrapper helpers
# ----------------------------------------------------------------------------
def _tpu_vmem_bytes():
    try:
        return int(pltpu.get_tpu_info().vmem_capacity_bytes)
    except Exception:
        return 64 * 1024 * 1024      # conservative default (v7x per-TensorCore)


def _auto_batch_tile(B, n_agents, S, A, H, Ap, vmem_limit_bytes, hard_cap):
    # rough VMEM working-set estimate (bytes) that scales with the batch tile:
    # inputs + padded output (double-buffered), f32 hsa scratch, and the big live
    # f32 intermediates (kvs 3H, s-encodings H, head values ~H, slack 2H).
    per_row = (4.0 * n_agents * (2 * (S + (S + A)) + 2 * Ap)
               + 4.0 * n_agents * H
               + 4.0 * n_agents * (3 * H + H + H + 2 * H))
    weight_bytes = (2.0 * n_agents * (S * H + (S + A) * H + 2 * H * H + H * Ap)
                    + 2.0 * H * 3 * H)
    budget = max(0.25 * vmem_limit_bytes, 0.6 * vmem_limit_bytes - weight_bytes)
    cap = int(budget // max(per_row, 1.0))
    cap = max(8, min(hard_cap, (cap // 8) * 8))
    # candidates: divisors of B that are multiples of 8 (plus B itself)
    cands = [d for d in range(8, B + 1, 8) if B % d == 0]
    if B not in cands:
        cands.append(B)
    feas = [d for d in cands if d <= cap] or [min(cands)]
    multi = [d for d in feas if B // d >= 2]     # >= 2 grid steps -> both v7x TCs
    return max(multi) if multi else max(feas)


# ----------------------------------------------------------------------------
# Wrapper
# ----------------------------------------------------------------------------
def attention_critic_forward(states, actions, params, *, n_heads=1, batch_tile=None):
    n_agents, B, S = states.shape
    A = actions.shape[-1]
    H = params["w_s"].shape[-1]
    assert H % n_heads == 0
    D = H // n_heads
    if n_agents < 2:
        # exclude-self attention needs at least one "other" agent (matches torch,
        # which would fail on torch.stack([]) for n_agents == 1).
        raise ValueError("AttentionCritic requires n_agents >= 2")

    sa = jnp.concatenate([states, actions], axis=-1)          # torch.cat((s, a), 1)
    Ap = ((A + 127) // 128) * 128                             # lane-dense output width
    scale = 1.0 / float(np.sqrt(D))
    bf16 = jnp.bfloat16

    # --- chip-aware VMEM limit and batch tiling ---
    phys_vmem = _tpu_vmem_bytes()
    if phys_vmem >= 128 * 1024 * 1024:          # v5e / v6e: 128 MiB physical
        vmem_limit = 96 * 1024 * 1024
        hard_cap = 1024
    else:                                       # v7x: 64 MiB per TensorCore
        vmem_limit = 48 * 1024 * 1024
        hard_cap = 512
    if batch_tile is None:
        tB = _auto_batch_tile(B, n_agents, S, A, H, Ap, vmem_limit, hard_cap)
    else:
        tB = batch_tile
        if tB != B and (B % tB != 0 or tB % 8 != 0):
            tB = _auto_batch_tile(B, n_agents, S, A, H, Ap, vmem_limit, hard_cap)
    grid = (B // tB,)

    # --- weight prep ---
    # fused key/value/selector weight: (H, 3*n_heads*D) = (H, 3H), scale folded into
    # the selector columns (LeakyReLU is positively homogeneous); bias is zero for
    # the key/value thirds so a single bias add is harmless.
    w_kvs = jnp.concatenate(
        [params["w_k"], params["w_v"], params["w_sel"] * scale], axis=-1).astype(bf16)
    b_kvs = jnp.concatenate(
        [jnp.zeros((1, 2 * H), jnp.float32), params["b_sel"] * scale], axis=-1)
    # split critic fc1: top half multiplies senc, per-head pieces multiply head values
    w_c1 = params["w_c1"]
    w_c1_s = w_c1[:, :H, :].astype(bf16)                                # (n_agents, H, H)
    w_c1_att = (w_c1[:, H:, :].reshape(n_agents, n_heads, D, H)
                .reshape(n_agents * n_heads, D, H).astype(bf16))
    w_s = params["w_s"].astype(bf16)
    w_sa = params["w_sa"].astype(bf16)
    # pad the critic head to 128 lanes -> unmasked vst on the output path
    w_c2p = jnp.pad(params["w_c2"], ((0, 0), (0, 0), (0, Ap - A))).astype(bf16)
    b_c2p = jnp.pad(params["b_c2"], ((0, 0), (0, 0), (0, Ap - A)))
    # TODO(synk): if the deployed model used narrow H/D (<128), pad H/D to 128 and
    #             lane-mask the analytic LayerNorm; default MAAC hidc=400 so skipped.

    def _run(single_buffer_weights):
        # weights never change block index -> single-buffer them to halve their
        # VMEM footprint (fallback below if pipeline_mode is rejected).
        wkw = {"pipeline_mode": pl.Buffered(1)} if single_buffer_weights else {}
        const = lambda shp: pl.BlockSpec(shp, lambda b, _s=shp: (0,) * len(_s), **wkw)
        batch3 = lambda shp: pl.BlockSpec(shp, lambda b: (0, b, 0))
        return pl.pallas_call(
            _fused_attention_critic_kernel,
            out_shape=jax.ShapeDtypeStruct((n_agents, B, Ap), jnp.float32),
            grid=grid,
            in_specs=[
                batch3((n_agents, tB, S)),             # states
                batch3((n_agents, tB, S + A)),         # state-actions
                const((n_agents, S, H)),               # w_s   (bf16)
                const((n_agents, 1, H)),               # b_s   (f32)
                const((n_agents, S + A, H)),           # w_sa  (bf16)
                const((n_agents, 1, H)),               # b_sa  (f32)
                const((H, 3 * H)),                     # w_kvs (bf16)  [k|v|sel*scale]
                const((1, 3 * H)),                     # b_kvs (f32)   [0|0|b_sel*scale]
                const((n_agents, H, H)),               # w_c1 top half   (bf16)
                const((n_agents * n_heads, D, H)),     # w_c1 attn half  (bf16)
                const((n_agents, 1, H)),               # b_c1  (f32)
                const((n_agents, H, Ap)),              # w_c2 padded (bf16)
                const((n_agents, 1, Ap)),              # b_c2 padded (f32)
            ],
            out_specs=batch3((n_agents, tB, Ap)),
            scratch_shapes=[pltpu.VMEM((n_agents * tB, H), jnp.float32)],
            compiler_params=pltpu.CompilerParams(
                dimension_semantics=("parallel",),     # batch tiles are independent
                vmem_limit_bytes=vmem_limit,
            ),
        )(states, sa, w_s, params["b_s"], w_sa, params["b_sa"],
          w_kvs, b_kvs, w_c1_s, w_c1_att, params["b_c1"], w_c2p, b_c2p)

    try:
        allqs = _run(True)
    except Exception:
        # pipeline_mode on top-level pallas_call BlockSpecs unsupported on this jax
        # version -> default double-buffering (identical numerics).
        allqs = _run(False)

    # q = all_qs.gather(1, actions.argmax(dim=1, keepdim=True)) -- done outside the
    # kernel so the kernel store stays lane-dense; idx < A so padded lanes are never
    # gathered.
    idx = jnp.argmax(actions, axis=-1)                         # (n_agents, B)
    q = jnp.take_along_axis(allqs, idx[..., None], axis=-1)    # (n_agents, B, 1)
    # TODO(synk): regularize / return_att auxiliary outputs (attention logits & probs)
    #             are not returned; only the default return_q path is implemented.
    return q


# ----------------------------------------------------------------------------
# Deterministic parameter init (shapes follow the torch __init__, stored [in,out])
# ----------------------------------------------------------------------------
def init_params(key, n_agents, S, A, H, n_heads):
    D = H // n_heads
    ks = jax.random.split(key, 12)
    g = lambda k, shp: (0.1 * jax.random.normal(k, shp)).astype(jnp.float32)
    return dict(
        w_s=g(ks[0], (n_agents, S, H)),        b_s=g(ks[1], (n_agents, 1, H)),
        w_sa=g(ks[2], (n_agents, S + A, H)),   b_sa=g(ks[3], (n_agents, 1, H)),
        w_k=g(ks[4], (H, n_heads * D)),        w_v=g(ks[5], (H, n_heads * D)),
        w_sel=g(ks[6], (H, n_heads * D)),      b_sel=g(ks[7], (1, n_heads * D)),
        w_c1=g(ks[8], (n_agents, 2 * H, H)),   b_c1=g(ks[9], (n_agents, 1, H)),
        w_c2=g(ks[10], (n_agents, H, A)),      b_c2=g(ks[11], (n_agents, 1, A)),
    )


# ----------------------------------------------------------------------------
# Pure-JAX reference mirroring the torch forward. matmul_dtype selects the
# MXU-operand precision so the kernel can be checked tightly (bf16) and for
# drift against full f32.
# ----------------------------------------------------------------------------
def reference_forward(states, actions, params, *, n_heads=1, matmul_dtype=jnp.float32):
    n_agents = states.shape[0]
    H = params["w_s"].shape[-1]
    D = H // n_heads

    def mm(x, w):
        return jnp.dot(x.astype(matmul_dtype), w.astype(matmul_dtype),
                       preferred_element_type=jnp.float32)

    sa = jnp.concatenate([states, actions], axis=-1)
    s_enc = [_leaky(mm(_layernorm(states[a]), params["w_s"][a]) + params["b_s"][a])
             for a in range(n_agents)]
    sa_enc = [_leaky(mm(_layernorm(sa[a]), params["w_sa"][a]) + params["b_sa"][a])
              for a in range(n_agents)]
    qs = []
    for a in range(n_agents):
        head_vals = []
        for h in range(n_heads):
            wk = params["w_k"][:, h * D:(h + 1) * D]
            wv = params["w_v"][:, h * D:(h + 1) * D]
            wsel = params["w_sel"][:, h * D:(h + 1) * D]
            bsel = params["b_sel"][:, h * D:(h + 1) * D]
            keys = [mm(sa_enc[j], wk) for j in range(n_agents) if j != a]
            vals = [mm(sa_enc[j], wv) for j in range(n_agents) if j != a]
            sel = _leaky(mm(sa_enc[a], wsel) + bsel)
            kT = jnp.stack(keys).transpose(1, 2, 0)                # (B, D, n-1)
            logits = jnp.einsum('bd,bdj->bj', sel, kT) / np.sqrt(D)
            w = jax.nn.softmax(logits, axis=-1)
            vT = jnp.stack(vals).transpose(1, 2, 0)
            head_vals.append(jnp.sum(vT * w[:, None, :], axis=-1))
        z = jnp.concatenate([s_enc[a]] + head_vals, axis=-1)
        h1 = _leaky(mm(_layernorm(z), params["w_c1"][a]) + params["b_c1"][a])
        allqs = mm(h1, params["w_c2"][a]) + params["b_c2"][a]
        idx = jnp.argmax(actions[a], axis=-1)
        qs.append(jnp.take_along_axis(allqs, idx[:, None], axis=-1))
    return jnp.stack(qs)


def _check_config(n_agents, B, S, A, H, n_heads, seed):
    key = jax.random.PRNGKey(seed)
    k1, k2, k3 = jax.random.split(key, 3)
    states = jax.random.normal(k1, (n_agents, B, S), dtype=jnp.float32)
    actions = jax.random.normal(k2, (n_agents, B, A), dtype=jnp.float32)
    params = init_params(k3, n_agents, S, A, H, n_heads)

    q = attention_critic_forward(states, actions, params, n_heads=n_heads)
    q = jax.block_until_ready(q)
    assert q.shape == (n_agents, B, 1)

    # Structural check against a reference using the same bf16 MXU operands
    # (tolerance covers the approx reciprocal + the scale folded into bf16 w_sel).
    q_ref_bf16 = reference_forward(states, actions, params, n_heads=n_heads,
                                   matmul_dtype=jnp.bfloat16)
    np.testing.assert_allclose(np.asarray(q), np.asarray(q_ref_bf16),
                               rtol=1e-2, atol=1e-2)
    # Loose drift check against the full-f32 torch-equivalent forward.
    q_ref_f32 = reference_forward(states, actions, params, n_heads=n_heads,
                                  matmul_dtype=jnp.float32)
    np.testing.assert_allclose(np.asarray(q), np.asarray(q_ref_f32),
                               rtol=5e-2, atol=5e-2)


if __name__ == "__main__":
    # default config (seed 0): 3 agents, batch 8, single attention head
    _check_config(n_agents=3, B=8, S=16, A=8, H=32, n_heads=1, seed=0)
    # second config: multi-head, multi-step batch grid (exercises grid=(2,))
    _check_config(n_agents=4, B=16, S=12, A=6, H=32, n_heads=2, seed=1)
    print("KERNEL_OK")
</pallas_src>

<mosaic_0001>
module attributes {stable_mosaic.version = 11 : i64} {
  func.func @_fused_attention_critic_kernel(%arg0: i32, %arg1: memref<3x8x16xf32, #tpu.memory_space<vmem>>, %arg2: memref<3x8x24xf32, #tpu.memory_space<vmem>>, %arg3: memref<3x16x32xbf16, #tpu.memory_space<vmem>>, %arg4: memref<3x1x32xf32, #tpu.memory_space<vmem>>, %arg5: memref<3x24x32xbf16, #tpu.memory_space<vmem>>, %arg6: memref<3x1x32xf32, #tpu.memory_space<vmem>>, %arg7: memref<32x96xbf16, #tpu.memory_space<vmem>>, %arg8: memref<1x96xf32, #tpu.memory_space<vmem>>, %arg9: memref<3x32x32xbf16, #tpu.memory_space<vmem>>, %arg10: memref<3x32x32xbf16, #tpu.memory_space<vmem>>, %arg11: memref<3x1x32xf32, #tpu.memory_space<vmem>>, %arg12: memref<3x32x128xbf16, #tpu.memory_space<vmem>>, %arg13: memref<3x1x128xf32, #tpu.memory_space<vmem>>, %arg14: memref<3x8x128xf32, #tpu.memory_space<vmem>>, %arg15: memref<24x32xf32, #tpu.memory_space<vmem>>) attributes {dimension_semantics = [#tpu.dimension_semantics<parallel>], iteration_bounds = array<i64: 1>, scalar_prefetch = 0 : i64, scratch_operands = 1 : i64, tpu.core_type = #tpu.core_type<tc>, window_params = [{transform_indices = @transform_0, window_bounds = array<i64: 3, 8, 16>}, {transform_indices = @transform_1, window_bounds = array<i64: 3, 8, 24>}, {pipeline_mode = #tpu.pipeline_mode<synchronous>, transform_indices = @transform_2, window_bounds = array<i64: 3, 16, 32>}, {pipeline_mode = #tpu.pipeline_mode<synchronous>, transform_indices = @transform_3, window_bounds = array<i64: 3, 1, 32>}, {pipeline_mode = #tpu.pipeline_mode<synchronous>, transform_indices = @transform_4, window_bounds = array<i64: 3, 24, 32>}, {pipeline_mode = #tpu.pipeline_mode<synchronous>, transform_indices = @transform_5, window_bounds = array<i64: 3, 1, 32>}, {pipeline_mode = #tpu.pipeline_mode<synchronous>, transform_indices = @transform_6, window_bounds = array<i64: 32, 96>}, {pipeline_mode = #tpu.pipeline_mode<synchronous>, transform_indices = @transform_7, window_bounds = array<i64: 1, 96>}, {pipeline_mode = #tpu.pipeline_mode<synchronous>, transform_indices = @transform_8, window_bounds = array<i64: 3, 32, 32>}, {pipeline_mode = #tpu.pipeline_mode<synchronous>, transform_indices = @transform_9, window_bounds = array<i64: 3, 32, 32>}, {pipeline_mode = #tpu.pipeline_mode<synchronous>, transform_indices = @transform_10, window_bounds = array<i64: 3, 1, 32>}, {pipeline_mode = #tpu.pipeline_mode<synchronous>, transform_indices = @transform_11, window_bounds = array<i64: 3, 32, 128>}, {pipeline_mode = #tpu.pipeline_mode<synchronous>, transform_indices = @transform_12, window_bounds = array<i64: 3, 1, 128>}, {transform_indices = @transform_13, window_bounds = array<i64: 3, 8, 128>}]} {
    %c0 = arith.constant 0 : index
    %c0_0 = arith.constant 0 : index
    %c0_1 = arith.constant 0 : index
    %0 = vector.load %arg1[%c0, %c0_0, %c0_1] : memref<3x8x16xf32, #tpu.memory_space<vmem>>, vector<1x8x16xf32>
    %1 = vector.shape_cast %0 : vector<1x8x16xf32> to vector<8x16xf32>
    %c0_2 = arith.constant 0 : index
    %c0_3 = arith.constant 0 : index
    %c0_4 = arith.constant 0 : index
    %2 = vector.load %arg2[%c0_2, %c0_3, %c0_4] : memref<3x8x24xf32, #tpu.memory_space<vmem>>, vector<1x8x24xf32>
    %3 = vector.shape_cast %2 : vector<1x8x24xf32> to vector<8x24xf32>
    %cst = arith.constant dense<0.000000e+00> : vector<8xf32>
    %4 = vector.multi_reduction <add>, %1, %cst [1] : vector<8x16xf32> to vector<8xf32>
    %5 = vector.shape_cast %4 : vector<8xf32> to vector<8x1xf32>
    %cst_5 = arith.constant 1.600000e+01 : f32
    %6 = vector.broadcast %cst_5 : f32 to vector<8x1xf32>
    %7 = arith.divf %5, %6 : vector<8x1xf32>
    %8 = vector.broadcast %7 : vector<8x1xf32> to vector<8x16xf32>
    %9 = arith.subf %1, %8 : vector<8x16xf32>
    %10 = arith.mulf %9, %9 : vector<8x16xf32>
    %cst_6 = arith.constant dense<0.000000e+00> : vector<8xf32>
    %11 = vector.multi_reduction <add>, %10, %cst_6 [1] : vector<8x16xf32> to vector<8xf32>
    %12 = vector.shape_cast %11 : vector<8xf32> to vector<8x1xf32>
    %cst_7 = arith.constant 1.600000e+01 : f32
    %13 = vector.broadcast %cst_7 : f32 to vector<8x1xf32>
    %14 = arith.divf %12, %13 : vector<8x1xf32>
    %15 = vector.broadcast %7 : vector<8x1xf32> to vector<8x16xf32>
    %16 = arith.subf %1, %15 : vector<8x16xf32>
    %cst_8 = arith.constant 9.99999974E-6 : f32
    %17 = vector.broadcast %cst_8 : f32 to vector<8x1xf32>
    %18 = arith.addf %14, %17 : vector<8x1xf32>
    %19 = math.rsqrt %18 : vector<8x1xf32>
    %20 = vector.broadcast %19 : vector<8x1xf32> to vector<8x16xf32>
    %21 = arith.mulf %16, %20 : vector<8x16xf32>
    %22 = arith.truncf %21 : vector<8x16xf32> to vector<8x16xbf16>
    %c0_9 = arith.constant 0 : index
    %c0_10 = arith.constant 0 : index
    %c0_11 = arith.constant 0 : index
    %23 = vector.load %arg3[%c0_9, %c0_10, %c0_11] : memref<3x16x32xbf16, #tpu.memory_space<vmem>>, vector<1x16x32xbf16>
    %24 = vector.shape_cast %23 : vector<1x16x32xbf16> to vector<16x32xbf16>
    %cst_12 = arith.constant dense<0.000000e+00> : vector<8x32xf32>
    %25 = tpu.matmul %22, %24, %cst_12 {dimension_numbers = #tpu.dot_dimension_numbers<[1], [0], [0], [1], [0, 0, 1, 1], [], []>} : vector<8x16xbf16>, vector<16x32xbf16>, vector<8x32xf32> -> vector<8x32xf32>
    %c0_13 = arith.constant 0 : index
    %c0_14 = arith.constant 0 : index
    %c0_15 = arith.constant 0 : index
    %26 = vector.load %arg4[%c0_13, %c0_14, %c0_15] : memref<3x1x32xf32, #tpu.memory_space<vmem>>, vector<1x1x32xf32>
    %27 = vector.shape_cast %26 : vector<1x1x32xf32> to vector<1x32xf32>
    %28 = vector.broadcast %27 : vector<1x32xf32> to vector<8x32xf32>
    %29 = arith.addf %25, %28 : vector<8x32xf32>
    %cst_16 = arith.constant 0.000000e+00 : f32
    %30 = vector.broadcast %cst_16 : f32 to vector<8x32xf32>
    %31 = arith.cmpf oge, %29, %30 : vector<8x32xf32>
    %cst_17 = arith.constant 0.00999999977 : f32
    %32 = vector.broadcast %cst_17 : f32 to vector<8x32xf32>
    %33 = arith.mulf %32, %29 : vector<8x32xf32>
    %34 = arith.select %31, %29, %33 : vector<8x32xi1>, vector<8x32xf32>
    %cst_18 = arith.constant dense<0.000000e+00> : vector<8xf32>
    %35 = vector.multi_reduction <add>, %3, %cst_18 [1] : vector<8x24xf32> to vector<8xf32>
    %36 = vector.shape_cast %35 : vector<8xf32> to vector<8x1xf32>
    %cst_19 = arith.constant 2.400000e+01 : f32
    %37 = vector.broadcast %cst_19 : f32 to vector<8x1xf32>
    %38 = arith.divf %36, %37 : vector<8x1xf32>
    %39 = vector.broadcast %38 : vector<8x1xf32> to vector<8x24xf32>
    %40 = arith.subf %3, %39 : vector<8x24xf32>
    %41 = arith.mulf %40, %40 : vector<8x24xf32>
    %cst_20 = arith.constant dense<0.000000e+00> : vector<8xf32>
    %42 = vector.multi_reduction <add>, %41, %cst_20 [1] : vector<8x24xf32> to vector<8xf32>
    %43 = vector.shape_cast %42 : vector<8xf32> to vector<8x1xf32>
    %cst_21 = arith.constant 2.400000e+01 : f32
    %44 = vector.broadcast %cst_21 : f32 to vector<8x1xf32>
    %45 = arith.divf %43, %44 : vector<8x1xf32>
    %46 = vector.broadcast %38 : vector<8x1xf32> to vector<8x24xf32>
    %47 = arith.subf %3, %46 : vector<8x24xf32>
    %cst_22 = arith.constant 9.99999974E-6 : f32
    %48 = vector.broadcast %cst_22 : f32 to vector<8x1xf32>
    %49 = arith.addf %45, %48 : vector<8x1xf32>
    %50 = math.rsqrt %49 : vector<8x1xf32>
    %51 = vector.broadcast %50 : vector<8x1xf32> to vector<8x24xf32>
    %52 = arith.mulf %47, %51 : vector<8x24xf32>
    %53 = arith.truncf %52 : vector<8x24xf32> to vector<8x24xbf16>
    %c0_23 = arith.constant 0 : index
    %c0_24 = arith.constant 0 : index
    %c0_25 = arith.constant 0 : index
    %54 = vector.load %arg5[%c0_23, %c0_24, %c0_25] : memref<3x24x32xbf16, #tpu.memory_space<vmem>>, vector<1x24x32xbf16>
    %55 = vector.shape_cast %54 : vector<1x24x32xbf16> to vector<24x32xbf16>
    %cst_26 = arith.constant dense<0.000000e+00> : vector<8x32xf32>
    %56 = tpu.matmul %53, %55, %cst_26 {dimension_numbers = #tpu.dot_dimension_numbers<[1], [0], [0], [1], [0, 0, 1, 1], [], []>} : vector<8x24xbf16>, vector<24x32xbf16>, vector<8x32xf32> -> vector<8x32xf32>
    %c0_27 = arith.constant 0 : index
    %c0_28 = arith.constant 0 : index
    %c0_29 = arith.constant 0 : index
    %57 = vector.load %arg6[%c0_27, %c0_28, %c0_29] : memref<3x1x32xf32, #tpu.memory_space<vmem>>, vector<1x1x32xf32>
    %58 = vector.shape_cast %57 : vector<1x1x32xf32> to vector<1x32xf32>
    %59 = vector.broadcast %58 : vector<1x32xf32> to vector<8x32xf32>
    %60 = arith.addf %56, %59 : vector<8x32xf32>
    %cst_30 = arith.constant 0.000000e+00 : f32
    %61 = vector.broadcast %cst_30 : f32 to vector<8x32xf32>
    %62 = arith.cmpf oge, %60, %61 : vector<8x32xf32>
    %cst_31 = arith.constant 0.00999999977 : f32
    %63 = vector.broadcast %cst_31 : f32 to vector<8x32xf32>
    %64 = arith.mulf %63, %60 : vector<8x32xf32>
    %65 = arith.select %62, %60, %64 : vector<8x32xi1>, vector<8x32xf32>
    %c0_32 = arith.constant 0 : index
    %c0_33 = arith.constant 0 : index
    %66 = vector.load %arg15[%c0_32, %c0_33] : memref<24x32xf32, #tpu.memory_space<vmem>>, vector<8x32xf32>
    tpu.vector_store %arg15[%c0_32, %c0_33], %65 {strides = array<i32>} : memref<24x32xf32, #tpu.memory_space<vmem>>, vector<8x32xf32>,
    %c1 = arith.constant 1 : index
    %c0_34 = arith.constant 0 : index
    %c0_35 = arith.constant 0 : index
    %67 = vector.load %arg1[%c1, %c0_34, %c0_35] : memref<3x8x16xf32, #tpu.memory_space<vmem>>, vector<1x8x16xf32>
    %68 = vector.shape_cast %67 : vector<1x8x16xf32> to vector<8x16xf32>
    %c1_36 = arith.constant 1 : index
    %c0_37 = arith.constant 0 : index
    %c0_38 = arith.constant 0 : index
    %69 = vector.load %arg2[%c1_36, %c0_37, %c0_38] : memref<3x8x24xf32, #tpu.memory_space<vmem>>, vector<1x8x24xf32>
    %70 = vector.shape_cast %69 : vector<1x8x24xf32> to vector<8x24xf32>
    %cst_39 = arith.constant dense<0.000000e+00> : vector<8xf32>
    %71 = vector.multi_reduction <add>, %68, %cst_39 [1] : vector<8x16xf32> to vector<8xf32>
    %72 = vector.shape_cast %71 : vector<8xf32> to vector<8x1xf32>
    %cst_40 = arith.constant 1.600000e+01 : f32
    %73 = vector.broadcast %cst_40 : f32 to vector<8x1xf32>
    %74 = arith.divf %72, %73 : vector<8x1xf32>
    %75 = vector.broadcast %74 : vector<8x1xf32> to vector<8x16xf32>
    %76 = arith.subf %68, %75 : vector<8x16xf32>
    %77 = arith.mulf %76, %76 : vector<8x16xf32>
    %cst_41 = arith.constant dense<0.000000e+00> : vector<8xf32>
    %78 = vector.multi_reduction <add>, %77, %cst_41 [1] : vector<8x16xf32> to vector<8xf32>
    %79 = vector.shape_cast %78 : vector<8xf32> to vector<8x1xf32>
    %cst_42 = arith.constant 1.600000e+01 : f32
    %80 = vector.broadcast %cst_42 : f32 to vector<8x1xf32>
    %81 = arith.divf %79, %80 : vector<8x1xf32>
    %82 = vector.broadcast %74 : vector<8x1xf32> to vector<8x16xf32>
    %83 = arith.subf %68, %82 : vector<8x16xf32>
    %cst_43 = arith.constant 9.99999974E-6 : f32
    %84 = vector.broadcast %cst_43 : f32 to vector<8x1xf32>
    %85 = arith.addf %81, %84 : vector<8x1xf32>
    %86 = math.rsqrt %85 : vector<8x1xf32>
    %87 = vector.broadcast %86 : vector<8x1xf32> to vector<8x16xf32>
    %88 = arith.mulf %83, %87 : vector<8x16xf32>
    %89 = arith.truncf %88 : vector<8x16xf32> to vector<8x16xbf16>
    %c1_44 = arith.constant 1 : index
    %c0_45 = arith.constant 0 : index
    %c0_46 = arith.constant 0 : index
    %90 = vector.load %arg3[%c1_44, %c0_45, %c0_46] : memref<3x16x32xbf16, #tpu.memory_space<vmem>>, vector<1x16x32xbf16>
    %91 = vector.shape_cast %90 : vector<1x16x32xbf16> to vector<16x32xbf16>
    %cst_47 = arith.constant dense<0.000000e+00> : vector<8x32xf32>
    %92 = tpu.matmul %89, %91, %cst_47 {dimension_numbers = #tpu.dot_dimension_numbers<[1], [0], [0], [1], [0, 0, 1, 1], [], []>} : vector<8x16xbf16>, vector<16x32xbf16>, vector<8x32xf32> -> vector<8x32xf32>
    %c1_48 = arith.constant 1 : index
    %c0_49 = arith.constant 0 : index
    %c0_50 = arith.constant 0 : index
    %93 = vector.load %arg4[%c1_48, %c0_49, %c0_50] : memref<3x1x32xf32, #tpu.memory_space<vmem>>, vector<1x1x32xf32>
    %94 = vector.shape_cast %93 : vector<1x1x32xf32> to vector<1x32xf32>
    %95 = vector.broadcast %94 : vector<1x32xf32> to vector<8x32xf32>
    %96 = arith.addf %92, %95 : vector<8x32xf32>
    %cst_51 = arith.constant 0.000000e+00 : f32
    %97 = vector.broadcast %cst_51 : f32 to vector<8x32xf32>
    %98 = arith.cmpf oge, %96, %97 : vector<8x32xf32>
    %cst_52 = arith.constant 0.00999999977 : f32
    %99 = vector.broadcast %cst_52 : f32 to vector<8x32xf32>
    %100 = arith.mulf %99, %96 : vector<8x32xf32>
    %101 = arith.select %98, %96, %100 : vector<8x32xi1>, vector<8x32xf32>
    %cst_53 = arith.constant dense<0.000000e+00> : vector<8xf32>
    %102 = vector.multi_reduction <add>, %70, %cst_53 [1] : vector<8x24xf32> to vector<8xf32>
    %103 = vector.shape_cast %102 : vector<8xf32> to vector<8x1xf32>
    %cst_54 = arith.constant 2.400000e+01 : f32
    %104 = vector.broadcast %cst_54 : f32 to vector<8x1xf32>
    %105 = arith.divf %103, %104 : vector<8x1xf32>
    %106 = vector.broadcast %105 : vector<8x1xf32> to vector<8x24xf32>
    %107 = arith.subf %70, %106 : vector<8x24xf32>
    %108 = arith.mulf %107, %107 : vector<8x24xf32>
    %cst_55 = arith.constant dense<0.000000e+00> : vector<8xf32>
    %109 = vector.multi_reduction <add>, %108, %cst_55 [1] : vector<8x24xf32> to vector<8xf32>
    %110 = vector.shape_cast %109 : vector<8xf32> to vector<8x1xf32>
    %cst_56 = arith.constant 2.400000e+01 : f32
    %111 = vector.broadcast %cst_56 : f32 to vector<8x1xf32>
    %112 = arith.divf %110, %111 : vector<8x1xf32>
    %113 = vector.broadcast %105 : vector<8x1xf32> to vector<8x24xf32>
    %114 = arith.subf %70, %113 : vector<8x24xf32>
    %cst_57 = arith.constant 9.99999974E-6 : f32
    %115 = vector.broadcast %cst_57 : f32 to vector<8x1xf32>
    %116 = arith.addf %112, %115 : vector<8x1xf32>
    %117 = math.rsqrt %116 : vector<8x1xf32>
    %118 = vector.broadcast %117 : vector<8x1xf32> to vector<8x24xf32>
    %119 = arith.mulf %114, %118 : vector<8x24xf32>
    %120 = arith.truncf %119 : vector<8x24xf32> to vector<8x24xbf16>
    %c1_58 = arith.constant 1 : index
    %c0_59 = arith.constant 0 : index
    %c0_60 = arith.constant 0 : index
    %121 = vector.load %arg5[%c1_58, %c0_59, %c0_60] : memref<3x24x32xbf16, #tpu.memory_space<vmem>>, vector<1x24x32xbf16>
    %122 = vector.shape_cast %121 : vector<1x24x32xbf16> to vector<24x32xbf16>
    %cst_61 = arith.constant dense<0.000000e+00> : vector<8x32xf32>
    %123 = tpu.matmul %120, %122, %cst_61 {dimension_numbers = #tpu.dot_dimension_numbers<[1], [0], [0], [1], [0, 0, 1, 1], [], []>} : vector<8x24xbf16>, vector<24x32xbf16>, vector<8x32xf32> -> vector<8x32xf32>
    %c1_62 = arith.constant 1 : index
    %c0_63 = arith.constant 0 : index
    %c0_64 = arith.constant 0 : index
    %124 = vector.load %arg6[%c1_62, %c0_63, %c0_64] : memref<3x1x32xf32, #tpu.memory_space<vmem>>, vector<1x1x32xf32>
    %125 = vector.shape_cast %124 : vector<1x1x32xf32> to vector<1x32xf32>
    %126 = vector.broadcast %125 : vector<1x32xf32> to vector<8x32xf32>
    %127 = arith.addf %123, %126 : vector<8x32xf32>
    %cst_65 = arith.constant 0.000000e+00 : f32
    %128 = vector.broadcast %cst_65 : f32 to vector<8x32xf32>
    %129 = arith.cmpf oge, %127, %128 : vector<8x32xf32>
    %cst_66 = arith.constant 0.00999999977 : f32
    %130 = vector.broadcast %cst_66 : f32 to vector<8x32xf32>
    %131 = arith.mulf %130, %127 : vector<8x32xf32>
    %132 = arith.select %129, %127, %131 : vector<8x32xi1>, vector<8x32xf32>
    %c8 = arith.constant 8 : index
    %c0_67 = arith.constant 0 : index
    %133 = vector.load %arg15[%c8, %c0_67] : memref<24x32xf32, #tpu.memory_space<vmem>>, vector<8x32xf32>
    tpu.vector_store %arg15[%c8, %c0_67], %132 {strides = array<i32>} : memref<24x32xf32, #tpu.memory_space<vmem>>, vector<8x32xf32>,
    %c2 = arith.constant 2 : index
    %c0_68 = arith.constant 0 : index
    %c0_69 = arith.constant 0 : index
    %134 = vector.load %arg1[%c2, %c0_68, %c0_69] : memref<3x8x16xf32, #tpu.memory_space<vmem>>, vector<1x8x16xf32>
    %135 = vector.shape_cast %134 : vector<1x8x16xf32> to vector<8x16xf32>
    %c2_70 = arith.constant 2 : index
    %c0_71 = arith.constant 0 : index
    %c0_72 = arith.constant 0 : index
    %136 = vector.load %arg2[%c2_70, %c0_71, %c0_72] : memref<3x8x24xf32, #tpu.memory_space<vmem>>, vector<1x8x24xf32>
    %137 = vector.shape_cast %136 : vector<1x8x24xf32> to vector<8x24xf32>
    %cst_73 = arith.constant dense<0.000000e+00> : vector<8xf32>
    %138 = vector.multi_reduction <add>, %135, %cst_73 [1] : vector<8x16xf32> to vector<8xf32>
    %139 = vector.shape_cast %138 : vector<8xf32> to vector<8x1xf32>
    %cst_74 = arith.constant 1.600000e+01 : f32
    %140 = vector.broadcast %cst_74 : f32 to vector<8x1xf32>
    %141 = arith.divf %139, %140 : vector<8x1xf32>
    %142 = vector.broadcast %141 : vector<8x1xf32> to vector<8x16xf32>
    %143 = arith.subf %135, %142 : vector<8x16xf32>
    %144 = arith.mulf %143, %143 : vector<8x16xf32>
    %cst_75 = arith.constant dense<0.000000e+00> : vector<8xf32>
    %145 = vector.multi_reduction <add>, %144, %cst_75 [1] : vector<8x16xf32> to vector<8xf32>
    %146 = vector.shape_cast %145 : vector<8xf32> to vector<8x1xf32>
    %cst_76 = arith.constant 1.600000e+01 : f32
    %147 = vector.broadcast %cst_76 : f32 to vector<8x1xf32>
    %148 = arith.divf %146, %147 : vector<8x1xf32>
    %149 = vector.broadcast %141 : vector<8x1xf32> to vector<8x16xf32>
    %150 = arith.subf %135, %149 : vector<8x16xf32>
    %cst_77 = arith.constant 9.99999974E-6 : f32
    %151 = vector.broadcast %cst_77 : f32 to vector<8x1xf32>
    %152 = arith.addf %148, %151 : vector<8x1xf32>
    %153 = math.rsqrt %152 : vector<8x1xf32>
    %154 = vector.broadcast %153 : vector<8x1xf32> to vector<8x16xf32>
    %155 = arith.mulf %150, %154 : vector<8x16xf32>
    %156 = arith.truncf %155 : vector<8x16xf32> to vector<8x16xbf16>
    %c2_78 = arith.constant 2 : index
    %c0_79 = arith.constant 0 : index
    %c0_80 = arith.constant 0 : index
    %157 = vector.load %arg3[%c2_78, %c0_79, %c0_80] : memref<3x16x32xbf16, #tpu.memory_space<vmem>>, vector<1x16x32xbf16>
    %158 = vector.shape_cast %157 : vector<1x16x32xbf16> to vector<16x32xbf16>
    %cst_81 = arith.constant dense<0.000000e+00> : vector<8x32xf32>
    %159 = tpu.matmul %156, %158, %cst_81 {dimension_numbers = #tpu.dot_dimension_numbers<[1], [0], [0], [1], [0, 0, 1, 1], [], []>} : vector<8x16xbf16>, vector<16x32xbf16>, vector<8x32xf32> -> vector<8x32xf32>
    %c2_82 = arith.constant 2 : index
    %c0_83 = arith.constant 0 : index
    %c0_84 = arith.constant 0 : index
    %160 = vector.load %arg4[%c2_82, %c0_83, %c0_84] : memref<3x1x32xf32, #tpu.memory_space<vmem>>, vector<1x1x32xf32>
    %161 = vector.shape_cast %160 : vector<1x1x32xf32> to vector<1x32xf32>
    %162 = vector.broadcast %161 : vector<1x32xf32> to vector<8x32xf32>
    %163 = arith.addf %159, %162 : vector<8x32xf32>
    %cst_85 = arith.constant 0.000000e+00 : f32
    %164 = vector.broadcast %cst_85 : f32 to vector<8x32xf32>
    %165 = arith.cmpf oge, %163, %164 : vector<8x32xf32>
    %cst_86 = arith.constant 0.00999999977 : f32
    %166 = vector.broadcast %cst_86 : f32 to vector<8x32xf32>
    %167 = arith.mulf %166, %163 : vector<8x32xf32>
    %168 = arith.select %165, %163, %167 : vector<8x32xi1>, vector<8x32xf32>
    %cst_87 = arith.constant dense<0.000000e+00> : vector<8xf32>
    %169 = vector.multi_reduction <add>, %137, %cst_87 [1] : vector<8x24xf32> to vector<8xf32>
    %170 = vector.shape_cast %169 : vector<8xf32> to vector<8x1xf32>
    %cst_88 = arith.constant 2.400000e+01 : f32
    %171 = vector.broadcast %cst_88 : f32 to vector<8x1xf32>
    %172 = arith.divf %170, %171 : vector<8x1xf32>
    %173 = vector.broadcast %172 : vector<8x1xf32> to vector<8x24xf32>
    %174 = arith.subf %137, %173 : vector<8x24xf32>
    %175 = arith.mulf %174, %174 : vector<8x24xf32>
    %cst_89 = arith.constant dense<0.000000e+00> : vector<8xf32>
    %176 = vector.multi_reduction <add>, %175, %cst_89 [1] : vector<8x24xf32> to vector<8xf32>
    %177 = vector.shape_cast %176 : vector<8xf32> to vector<8x1xf32>
    %cst_90 = arith.constant 2.400000e+01 : f32
    %178 = vector.broadcast %cst_90 : f32 to vector<8x1xf32>
    %179 = arith.divf %177, %178 : vector<8x1xf32>
    %180 = vector.broadcast %172 : vector<8x1xf32> to vector<8x24xf32>
    %181 = arith.subf %137, %180 : vector<8x24xf32>
    %cst_91 = arith.constant 9.99999974E-6 : f32
    %182 = vector.broadcast %cst_91 : f32 to vector<8x1xf32>
    %183 = arith.addf %179, %182 : vector<8x1xf32>
    %184 = math.rsqrt %183 : vector<8x1xf32>
    %185 = vector.broadcast %184 : vector<8x1xf32> to vector<8x24xf32>
    %186 = arith.mulf %181, %185 : vector<8x24xf32>
    %187 = arith.truncf %186 : vector<8x24xf32> to vector<8x24xbf16>
    %c2_92 = arith.constant 2 : index
    %c0_93 = arith.constant 0 : index
    %c0_94 = arith.constant 0 : index
    %188 = vector.load %arg5[%c2_92, %c0_93, %c0_94] : memref<3x24x32xbf16, #tpu.memory_space<vmem>>, vector<1x24x32xbf16>
    %189 = vector.shape_cast %188 : vector<1x24x32xbf16> to vector<24x32xbf16>
    %cst_95 = arith.constant dense<0.000000e+00> : vector<8x32xf32>
    %190 = tpu.matmul %187, %189, %cst_95 {dimension_numbers = #tpu.dot_dimension_numbers<[1], [0], [0], [1], [0, 0, 1, 1], [], []>} : vector<8x24xbf16>, vector<24x32xbf16>, vector<8x32xf32> -> vector<8x32xf32>
    %c2_96 = arith.constant 2 : index
    %c0_97 = arith.constant 0 : index
    %c0_98 = arith.constant 0 : index
    %191 = vector.load %arg6[%c2_96, %c0_97, %c0_98] : memref<3x1x32xf32, #tpu.memory_space<vmem>>, vector<1x1x32xf32>
    %192 = vector.shape_cast %191 : vector<1x1x32xf32> to vector<1x32xf32>
    %193 = vector.broadcast %192 : vector<1x32xf32> to vector<8x32xf32>
    %194 = arith.addf %190, %193 : vector<8x32xf32>
    %cst_99 = arith.constant 0.000000e+00 : f32
    %195 = vector.broadcast %cst_99 : f32 to vector<8x32xf32>
    %196 = arith.cmpf oge, %194, %195 : vector<8x32xf32>
    %cst_100 = arith.constant 0.00999999977 : f32
    %197 = vector.broadcast %cst_100 : f32 to vector<8x32xf32>
    %198 = arith.mulf %197, %194 : vector<8x32xf32>
    %199 = arith.select %196, %194, %198 : vector<8x32xi1>, vector<8x32xf32>
    %c16 = arith.constant 16 : index
    %c0_101 = arith.constant 0 : index
    %200 = vector.load %arg15[%c16, %c0_101] : memref<24x32xf32, #tpu.memory_space<vmem>>, vector<8x32xf32>
    tpu.vector_store %arg15[%c16, %c0_101], %199 {strides = array<i32>} : memref<24x32xf32, #tpu.memory_space<vmem>>, vector<8x32xf32>,
    %c0_102 = arith.constant 0 : index
    %c0_103 = arith.constant 0 : index
    %201 = vector.load %arg15[%c0_102, %c0_103] : memref<24x32xf32, #tpu.memory_space<vmem>>, vector<24x32xf32>
    %202 = arith.truncf %201 : vector<24x32xf32> to vector<24x32xbf16>
    %c0_104 = arith.constant 0 : index
    %c0_105 = arith.constant 0 : index
    %203 = vector.load %arg7[%c0_104, %c0_105] : memref<32x96xbf16, #tpu.memory_space<vmem>>, vector<32x96xbf16>
    %cst_106 = arith.constant dense<0.000000e+00> : vector<24x96xf32>
    %204 = tpu.matmul %202, %203, %cst_106 {dimension_numbers = #tpu.dot_dimension_numbers<[1], [0], [0], [1], [0, 0, 1, 1], [], []>} : vector<24x32xbf16>, vector<32x96xbf16>, vector<24x96xf32> -> vector<24x96xf32>
    %c0_107 = arith.constant 0 : index
    %c0_108 = arith.constant 0 : index
    %205 = vector.load %arg8[%c0_107, %c0_108] : memref<1x96xf32, #tpu.memory_space<vmem>>, vector<1x96xf32>
    %206 = vector.broadcast %205 : vector<1x96xf32> to vector<24x96xf32>
    %207 = arith.addf %204, %206 : vector<24x96xf32>
    %208 = vector.extract_strided_slice %207 {offsets = [0, 0], sizes = [24, 32], strides = [1, 1]} : vector<24x96xf32> to vector<24x32xf32>
    %209 = vector.extract_strided_slice %207 {offsets = [0, 32], sizes = [24, 32], strides = [1, 1]} : vector<24x96xf32> to vector<24x32xf32>
    %210 = vector.extract_strided_slice %207 {offsets = [0, 64], sizes = [24, 32], strides = [1, 1]} : vector<24x96xf32> to vector<24x32xf32>
    %cst_109 = arith.constant 0.000000e+00 : f32
    %211 = vector.broadcast %cst_109 : f32 to vector<24x32xf32>
    %212 = arith.cmpf oge, %210, %211 : vector<24x32xf32>
    %cst_110 = arith.constant 0.00999999977 : f32
    %213 = vector.broadcast %cst_110 : f32 to vector<24x32xf32>
    %214 = arith.mulf %213, %210 : vector<24x32xf32>
    %215 = arith.select %212, %210, %214 : vector<24x32xi1>, vector<24x32xf32>
    %216 = vector.extract_strided_slice %215 {offsets = [0, 0], sizes = [8, 32], strides = [1, 1]} : vector<24x32xf32> to vector<8x32xf32>
    %217 = vector.extract_strided_slice %208 {offsets = [8, 0], sizes = [8, 32], strides = [1, 1]} : vector<24x32xf32> to vector<8x32xf32>
    %218 = arith.mulf %216, %217 : vector<8x32xf32>
    %cst_111 = arith.constant dense<0.000000e+00> : vector<8xf32>
    %219 = vector.multi_reduction <add>, %218, %cst_111 [1] : vector<8x32xf32> to vector<8xf32>
    %220 = vector.shape_cast %219 : vector<8xf32> to vector<8x1xf32>
    %221 = vector.extract_strided_slice %209 {offsets = [8, 0], sizes = [8, 32], strides = [1, 1]} : vector<24x32xf32> to vector<8x32xf32>
    %222 = vector.extract_strided_slice %208 {offsets = [16, 0], sizes = [8, 32], strides = [1, 1]} : vector<24x32xf32> to vector<8x32xf32>
    %223 = arith.mulf %216, %222 : vector<8x32xf32>
    %cst_112 = arith.constant dense<0.000000e+00> : vector<8xf32>
    %224 = vector.multi_reduction <add>, %223, %cst_112 [1] : vector<8x32xf32> to vector<8xf32>
    %225 = vector.shape_cast %224 : vector<8xf32> to vector<8x1xf32>
    %226 = vector.extract_strided_slice %209 {offsets = [16, 0], sizes = [8, 32], strides = [1, 1]} : vector<24x32xf32> to vector<8x32xf32>
    %227 = tpu.concatenate %220, %225 in 1 : vector<8x1xf32>, vector<8x1xf32> -> vector<8x2xf32>
    %cst_113 = arith.constant dense<0xFF800000> : vector<8xf32>
    %228 = vector.multi_reduction <maximumf>, %227, %cst_113 [1] : vector<8x2xf32> to vector<8xf32>
    %229 = vector.shape_cast %228 : vector<8xf32> to vector<8x1xf32>
    %230 = vector.broadcast %229 : vector<8x1xf32> to vector<8x2xf32>
    %231 = arith.subf %227, %230 : vector<8x2xf32>
    %232 = math.exp %231 : vector<8x2xf32>
    %cst_114 = arith.constant dense<0.000000e+00> : vector<8xf32>
    %233 = vector.multi_reduction <add>, %232, %cst_114 [1] : vector<8x2xf32> to vector<8xf32>
    %234 = vector.shape_cast %233 : vector<8xf32> to vector<8x1xf32>
    %235 = tpu.reciprocal %234 {approx = true} : vector<8x1xf32> -> vector<8x1xf32>
    %236 = vector.broadcast %235 : vector<8x1xf32> to vector<8x2xf32>
    %237 = arith.mulf %232, %236 : vector<8x2xf32>
    %238 = vector.extract_strided_slice %237 {offsets = [0, 0], sizes = [8, 1], strides = [1, 1]} : vector<8x2xf32> to vector<8x1xf32>
    %239 = vector.broadcast %238 : vector<8x1xf32> to vector<8x32xf32>
    %240 = arith.mulf %239, %221 : vector<8x32xf32>
    %241 = vector.extract_strided_slice %237 {offsets = [0, 1], sizes = [8, 1], strides = [1, 1]} : vector<8x2xf32> to vector<8x1xf32>
    %242 = vector.broadcast %241 : vector<8x1xf32> to vector<8x32xf32>
    %243 = arith.mulf %242, %226 : vector<8x32xf32>
    %244 = arith.addf %240, %243 : vector<8x32xf32>
    %cst_115 = arith.constant dense<0.000000e+00> : vector<8xf32>
    %245 = vector.multi_reduction <add>, %34, %cst_115 [1] : vector<8x32xf32> to vector<8xf32>
    %246 = vector.shape_cast %245 : vector<8xf32> to vector<8x1xf32>
    %cst_116 = arith.constant dense<0.000000e+00> : vector<8xf32>
    %247 = vector.multi_reduction <add>, %244, %cst_116 [1] : vector<8x32xf32> to vector<8xf32>
    %248 = vector.shape_cast %247 : vector<8xf32> to vector<8x1xf32>
    %249 = arith.addf %246, %248 : vector<8x1xf32>
    %cst_117 = arith.constant 1.562500e-02 : f32
    %250 = vector.broadcast %cst_117 : f32 to vector<8x1xf32>
    %251 = arith.mulf %249, %250 : vector<8x1xf32>
    %252 = vector.broadcast %251 : vector<8x1xf32> to vector<8x32xf32>
    %253 = arith.subf %34, %252 : vector<8x32xf32>
    %254 = vector.broadcast %251 : vector<8x1xf32> to vector<8x32xf32>
    %255 = arith.subf %244, %254 : vector<8x32xf32>
    %256 = arith.mulf %253, %253 : vector<8x32xf32>
    %cst_118 = arith.constant dense<0.000000e+00> : vector<8xf32>
    %257 = vector.multi_reduction <add>, %256, %cst_118 [1] : vector<8x32xf32> to vector<8xf32>
    %258 = vector.shape_cast %257 : vector<8xf32> to vector<8x1xf32>
    %259 = arith.mulf %255, %255 : vector<8x32xf32>
    %cst_119 = arith.constant dense<0.000000e+00> : vector<8xf32>
    %260 = vector.multi_reduction <add>, %259, %cst_119 [1] : vector<8x32xf32> to vector<8xf32>
    %261 = vector.shape_cast %260 : vector<8xf32> to vector<8x1xf32>
    %262 = arith.addf %258, %261 : vector<8x1xf32>
    %cst_120 = arith.constant 1.562500e-02 : f32
    %263 = vector.broadcast %cst_120 : f32 to vector<8x1xf32>
    %264 = arith.mulf %262, %263 : vector<8x1xf32>
    %cst_121 = arith.constant 9.99999974E-6 : f32
    %265 = vector.broadcast %cst_121 : f32 to vector<8x1xf32>
    %266 = arith.addf %264, %265 : vector<8x1xf32>
    %267 = math.rsqrt %266 : vector<8x1xf32>
    %268 = vector.broadcast %267 : vector<8x1xf32> to vector<8x32xf32>
    %269 = arith.mulf %253, %268 : vector<8x32xf32>
    %270 = arith.truncf %269 : vector<8x32xf32> to vector<8x32xbf16>
    %c0_122 = arith.constant 0 : index
    %c0_123 = arith.constant 0 : index
    %c0_124 = arith.constant 0 : index
    %271 = vector.load %arg9[%c0_122, %c0_123, %c0_124] : memref<3x32x32xbf16, #tpu.memory_space<vmem>>, vector<1x32x32xbf16>
    %272 = vector.shape_cast %271 : vector<1x32x32xbf16> to vector<32x32xbf16>
    %cst_125 = arith.constant dense<0.000000e+00> : vector<8x32xf32>
    %273 = tpu.matmul %270, %272, %cst_125 {dimension_numbers = #tpu.dot_dimension_numbers<[1], [0], [0], [1], [0, 0, 1, 1], [], []>} : vector<8x32xbf16>, vector<32x32xbf16>, vector<8x32xf32> -> vector<8x32xf32>
    %274 = vector.broadcast %267 : vector<8x1xf32> to vector<8x32xf32>
    %275 = arith.mulf %255, %274 : vector<8x32xf32>
    %276 = arith.truncf %275 : vector<8x32xf32> to vector<8x32xbf16>
    %c0_126 = arith.constant 0 : index
    %c0_127 = arith.constant 0 : index
    %c0_128 = arith.constant 0 : index
    %277 = vector.load %arg10[%c0_126, %c0_127, %c0_128] : memref<3x32x32xbf16, #tpu.memory_space<vmem>>, vector<1x32x32xbf16>
    %278 = vector.shape_cast %277 : vector<1x32x32xbf16> to vector<32x32xbf16>
    %cst_129 = arith.constant dense<0.000000e+00> : vector<8x32xf32>
    %279 = tpu.matmul %276, %278, %cst_129 {dimension_numbers = #tpu.dot_dimension_numbers<[1], [0], [0], [1], [0, 0, 1, 1], [], []>} : vector<8x32xbf16>, vector<32x32xbf16>, vector<8x32xf32> -> vector<8x32xf32>
    %280 = arith.addf %273, %279 : vector<8x32xf32>
    %c0_130 = arith.constant 0 : index
    %c0_131 = arith.constant 0 : index
    %c0_132 = arith.constant 0 : index
    %281 = vector.load %arg11[%c0_130, %c0_131, %c0_132] : memref<3x1x32xf32, #tpu.memory_space<vmem>>, vector<1x1x32xf32>
    %282 = vector.shape_cast %281 : vector<1x1x32xf32> to vector<1x32xf32>
    %283 = vector.broadcast %282 : vector<1x32xf32> to vector<8x32xf32>
    %284 = arith.addf %280, %283 : vector<8x32xf32>
    %cst_133 = arith.constant 0.000000e+00 : f32
    %285 = vector.broadcast %cst_133 : f32 to vector<8x32xf32>
    %286 = arith.cmpf oge, %284, %285 : vector<8x32xf32>
    %cst_134 = arith.constant 0.00999999977 : f32
    %287 = vector.broadcast %cst_134 : f32 to vector<8x32xf32>
    %288 = arith.mulf %287, %284 : vector<8x32xf32>
    %289 = arith.select %286, %284, %288 : vector<8x32xi1>, vector<8x32xf32>
    %290 = arith.truncf %289 : vector<8x32xf32> to vector<8x32xbf16>
    %c0_135 = arith.constant 0 : index
    %c0_136 = arith.constant 0 : index
    %c0_137 = arith.constant 0 : index
    %291 = vector.load %arg12[%c0_135, %c0_136, %c0_137] : memref<3x32x128xbf16, #tpu.memory_space<vmem>>, vector<1x32x128xbf16>
    %292 = vector.shape_cast %291 : vector<1x32x128xbf16> to vector<32x128xbf16>
    %cst_138 = arith.constant dense<0.000000e+00> : vector<8x128xf32>
    %293 = tpu.matmul %290, %292, %cst_138 {dimension_numbers = #tpu.dot_dimension_numbers<[1], [0], [0], [1], [0, 0, 1, 1], [], []>} : vector<8x32xbf16>, vector<32x128xbf16>, vector<8x128xf32> -> vector<8x128xf32>
    %c0_139 = arith.constant 0 : index
    %c0_140 = arith.constant 0 : index
    %c0_141 = arith.constant 0 : index
    %294 = vector.load %arg13[%c0_139, %c0_140, %c0_141] : memref<3x1x128xf32, #tpu.memory_space<vmem>>, vector<1x1x128xf32>
    %295 = vector.shape_cast %294 : vector<1x1x128xf32> to vector<1x128xf32>
    %296 = vector.broadcast %295 : vector<1x128xf32> to vector<8x128xf32>
    %297 = arith.addf %293, %296 : vector<8x128xf32>
    %c0_142 = arith.constant 0 : index
    %c0_143 = arith.constant 0 : index
    %c0_144 = arith.constant 0 : index
    %298 = vector.load %arg14[%c0_142, %c0_143, %c0_144] : memref<3x8x128xf32, #tpu.memory_space<vmem>>, vector<1x8x128xf32>
    %299 = vector.shape_cast %298 : vector<1x8x128xf32> to vector<8x128xf32>
    %300 = vector.shape_cast %297 : vector<8x128xf32> to vector<1x8x128xf32>
    tpu.vector_store %arg14[%c0_142, %c0_143, %c0_144], %300 {strides = array<i32>} : memref<3x8x128xf32, #tpu.memory_space<vmem>>, vector<1x8x128xf32>,
    %301 = vector.extract_strided_slice %215 {offsets = [8, 0], sizes = [8, 32], strides = [1, 1]} : vector<24x32xf32> to vector<8x32xf32>
    %302 = vector.extract_strided_slice %208 {offsets = [0, 0], sizes = [8, 32], strides = [1, 1]} : vector<24x32xf32> to vector<8x32xf32>
    %303 = arith.mulf %301, %302 : vector<8x32xf32>
    %cst_145 = arith.constant dense<0.000000e+00> : vector<8xf32>
    %304 = vector.multi_reduction <add>, %303, %cst_145 [1] : vector<8x32xf32> to vector<8xf32>
    %305 = vector.shape_cast %304 : vector<8xf32> to vector<8x1xf32>
    %306 = vector.extract_strided_slice %209 {offsets = [0, 0], sizes = [8, 32], strides = [1, 1]} : vector<24x32xf32> to vector<8x32xf32>
    %307 = vector.extract_strided_slice %208 {offsets = [16, 0], sizes = [8, 32], strides = [1, 1]} : vector<24x32xf32> to vector<8x32xf32>
    %308 = arith.mulf %301, %307 : vector<8x32xf32>
    %cst_146 = arith.constant dense<0.000000e+00> : vector<8xf32>
    %309 = vector.multi_reduction <add>, %308, %cst_146 [1] : vector<8x32xf32> to vector<8xf32>
    %310 = vector.shape_cast %309 : vector<8xf32> to vector<8x1xf32>
    %311 = vector.extract_strided_slice %209 {offsets = [16, 0], sizes = [8, 32], strides = [1, 1]} : vector<24x32xf32> to vector<8x32xf32>
    %312 = tpu.concatenate %305, %310 in 1 : vector<8x1xf32>, vector<8x1xf32> -> vector<8x2xf32>
    %cst_147 = arith.constant dense<0xFF800000> : vector<8xf32>
    %313 = vector.multi_reduction <maximumf>, %312, %cst_147 [1] : vector<8x2xf32> to vector<8xf32>
    %314 = vector.shape_cast %313 : vector<8xf32> to vector<8x1xf32>
    %315 = vector.broadcast %314 : vector<8x1xf32> to vector<8x2xf32>
    %316 = arith.subf %312, %315 : vector<8x2xf32>
    %317 = math.exp %316 : vector<8x2xf32>
    %cst_148 = arith.constant dense<0.000000e+00> : vector<8xf32>
    %318 = vector.multi_reduction <add>, %317, %cst_148 [1] : vector<8x2xf32> to vector<8xf32>
    %319 = vector.shape_cast %318 : vector<8xf32> to vector<8x1xf32>
    %320 = tpu.reciprocal %319 {approx = true} : vector<8x1xf32> -> vector<8x1xf32>
    %321 = vector.broadcast %320 : vector<8x1xf32> to vector<8x2xf32>
    %322 = arith.mulf %317, %321 : vector<8x2xf32>
    %323 = vector.extract_strided_slice %322 {offsets = [0, 0], sizes = [8, 1], strides = [1, 1]} : vector<8x2xf32> to vector<8x1xf32>
    %324 = vector.broadcast %323 : vector<8x1xf32> to vector<8x32xf32>
    %325 = arith.mulf %324, %306 : vector<8x32xf32>
    %326 = vector.extract_strided_slice %322 {offsets = [0, 1], sizes = [8, 1], strides = [1, 1]} : vector<8x2xf32> to vector<8x1xf32>
    %327 = vector.broadcast %326 : vector<8x1xf32> to vector<8x32xf32>
    %328 = arith.mulf %327, %311 : vector<8x32xf32>
    %329 = arith.addf %325, %328 : vector<8x32xf32>
    %cst_149 = arith.constant dense<0.000000e+00> : vector<8xf32>
    %330 = vector.multi_reduction <add>, %101, %cst_149 [1] : vector<8x32xf32> to vector<8xf32>
    %331 = vector.shape_cast %330 : vector<8xf32> to vector<8x1xf32>
    %cst_150 = arith.constant dense<0.000000e+00> : vector<8xf32>
    %332 = vector.multi_reduction <add>, %329, %cst_150 [1] : vector<8x32xf32> to vector<8xf32>
    %333 = vector.shape_cast %332 : vector<8xf32> to vector<8x1xf32>
    %334 = arith.addf %331, %333 : vector<8x1xf32>
    %cst_151 = arith.constant 1.562500e-02 : f32
    %335 = vector.broadcast %cst_151 : f32 to vector<8x1xf32>
    %336 = arith.mulf %334, %335 : vector<8x1xf32>
    %337 = vector.broadcast %336 : vector<8x1xf32> to vector<8x32xf32>
    %338 = arith.subf %101, %337 : vector<8x32xf32>
    %339 = vector.broadcast %336 : vector<8x1xf32> to vector<8x32xf32>
    %340 = arith.subf %329, %339 : vector<8x32xf32>
    %341 = arith.mulf %338, %338 : vector<8x32xf32>
    %cst_152 = arith.constant dense<0.000000e+00> : vector<8xf32>
    %342 = vector.multi_reduction <add>, %341, %cst_152 [1] : vector<8x32xf32> to vector<8xf32>
    %343 = vector.shape_cast %342 : vector<8xf32> to vector<8x1xf32>
    %344 = arith.mulf %340, %340 : vector<8x32xf32>
    %cst_153 = arith.constant dense<0.000000e+00> : vector<8xf32>
    %345 = vector.multi_reduction <add>, %344, %cst_153 [1] : vector<8x32xf32> to vector<8xf32>
    %346 = vector.shape_cast %345 : vector<8xf32> to vector<8x1xf32>
    %347 = arith.addf %343, %346 : vector<8x1xf32>
    %cst_154 = arith.constant 1.562500e-02 : f32
    %348 = vector.broadcast %cst_154 : f32 to vector<8x1xf32>
    %349 = arith.mulf %347, %348 : vector<8x1xf32>
    %cst_155 = arith.constant 9.99999974E-6 : f32
    %350 = vector.broadcast %cst_155 : f32 to vector<8x1xf32>
    %351 = arith.addf %349, %350 : vector<8x1xf32>
    %352 = math.rsqrt %351 : vector<8x1xf32>
    %353 = vector.broadcast %352 : vector<8x1xf32> to vector<8x32xf32>
    %354 = arith.mulf %338, %353 : vector<8x32xf32>
    %355 = arith.truncf %354 : vector<8x32xf32> to vector<8x32xbf16>
    %c1_156 = arith.constant 1 : index
    %c0_157 = arith.constant 0 : index
    %c0_158 = arith.constant 0 : index
    %356 = vector.load %arg9[%c1_156, %c0_157, %c0_158] : memref<3x32x32xbf16, #tpu.memory_space<vmem>>, vector<1x32x32xbf16>
    %357 = vector.shape_cast %356 : vector<1x32x32xbf16> to vector<32x32xbf16>
    %cst_159 = arith.constant dense<0.000000e+00> : vector<8x32xf32>
    %358 = tpu.matmul %355, %357, %cst_159 {dimension_numbers = #tpu.dot_dimension_numbers<[1], [0], [0], [1], [0, 0, 1, 1], [], []>} : vector<8x32xbf16>, vector<32x32xbf16>, vector<8x32xf32> -> vector<8x32xf32>
    %359 = vector.broadcast %352 : vector<8x1xf32> to vector<8x32xf32>
    %360 = arith.mulf %340, %359 : vector<8x32xf32>
    %361 = arith.truncf %360 : vector<8x32xf32> to vector<8x32xbf16>
    %c1_160 = arith.constant 1 : index
    %c0_161 = arith.constant 0 : index
    %c0_162 = arith.constant 0 : index
    %362 = vector.load %arg10[%c1_160, %c0_161, %c0_162] : memref<3x32x32xbf16, #tpu.memory_space<vmem>>, vector<1x32x32xbf16>
    %363 = vector.shape_cast %362 : vector<1x32x32xbf16> to vector<32x32xbf16>
    %cst_163 = arith.constant dense<0.000000e+00> : vector<8x32xf32>
    %364 = tpu.matmul %361, %363, %cst_163 {dimension_numbers = #tpu.dot_dimension_numbers<[1], [0], [0], [1], [0, 0, 1, 1], [], []>} : vector<8x32xbf16>, vector<32x32xbf16>, vector<8x32xf32> -> vector<8x32xf32>
    %365 = arith.addf %358, %364 : vector<8x32xf32>
    %c1_164 = arith.constant 1 : index
    %c0_165 = arith.constant 0 : index
    %c0_166 = arith.constant 0 : index
    %366 = vector.load %arg11[%c1_164, %c0_165, %c0_166] : memref<3x1x32xf32, #tpu.memory_space<vmem>>, vector<1x1x32xf32>
    %367 = vector.shape_cast %366 : vector<1x1x32xf32> to vector<1x32xf32>
    %368 = vector.broadcast %367 : vector<1x32xf32> to vector<8x32xf32>
    %369 = arith.addf %365, %368 : vector<8x32xf32>
    %cst_167 = arith.constant 0.000000e+00 : f32
    %370 = vector.broadcast %cst_167 : f32 to vector<8x32xf32>
    %371 = arith.cmpf oge, %369, %370 : vector<8x32xf32>
    %cst_168 = arith.constant 0.00999999977 : f32
    %372 = vector.broadcast %cst_168 : f32 to vector<8x32xf32>
    %373 = arith.mulf %372, %369 : vector<8x32xf32>
    %374 = arith.select %371, %369, %373 : vector<8x32xi1>, vector<8x32xf32>
    %375 = arith.truncf %374 : vector<8x32xf32> to vector<8x32xbf16>
    %c1_169 = arith.constant 1 : index
    %c0_170 = arith.constant 0 : index
    %c0_171 = arith.constant 0 : index
    %376 = vector.load %arg12[%c1_169, %c0_170, %c0_171] : memref<3x32x128xbf16, #tpu.memory_space<vmem>>, vector<1x32x128xbf16>
    %377 = vector.shape_cast %376 : vector<1x32x128xbf16> to vector<32x128xbf16>
    %cst_172 = arith.constant dense<0.000000e+00> : vector<8x128xf32>
    %378 = tpu.matmul %375, %377, %cst_172 {dimension_numbers = #tpu.dot_dimension_numbers<[1], [0], [0], [1], [0, 0, 1, 1], [], []>} : vector<8x32xbf16>, vector<32x128xbf16>, vector<8x128xf32> -> vector<8x128xf32>
    %c1_173 = arith.constant 1 : index
    %c0_174 = arith.constant 0 : index
    %c0_175 = arith.constant 0 : index
    %379 = vector.load %arg13[%c1_173, %c0_174, %c0_175] : memref<3x1x128xf32, #tpu.memory_space<vmem>>, vector<1x1x128xf32>
    %380 = vector.shape_cast %379 : vector<1x1x128xf32> to vector<1x128xf32>
    %381 = vector.broadcast %380 : vector<1x128xf32> to vector<8x128xf32>
    %382 = arith.addf %378, %381 : vector<8x128xf32>
    %c1_176 = arith.constant 1 : index
    %c0_177 = arith.constant 0 : index
    %c0_178 = arith.constant 0 : index
    %383 = vector.load %arg14[%c1_176, %c0_177, %c0_178] : memref<3x8x128xf32, #tpu.memory_space<vmem>>, vector<1x8x128xf32>
    %384 = vector.shape_cast %383 : vector<1x8x128xf32> to vector<8x128xf32>
    %385 = vector.shape_cast %382 : vector<8x128xf32> to vector<1x8x128xf32>
    tpu.vector_store %arg14[%c1_176, %c0_177, %c0_178], %385 {strides = array<i32>} : memref<3x8x128xf32, #tpu.memory_space<vmem>>, vector<1x8x128xf32>,
    %386 = vector.extract_strided_slice %215 {offsets = [16, 0], sizes = [8, 32], strides = [1, 1]} : vector<24x32xf32> to vector<8x32xf32>
    %387 = vector.extract_strided_slice %208 {offsets = [0, 0], sizes = [8, 32], strides = [1, 1]} : vector<24x32xf32> to vector<8x32xf32>
    %388 = arith.mulf %386, %387 : vector<8x32xf32>
    %cst_179 = arith.constant dense<0.000000e+00> : vector<8xf32>
    %389 = vector.multi_reduction <add>, %388, %cst_179 [1] : vector<8x32xf32> to vector<8xf32>
    %390 = vector.shape_cast %389 : vector<8xf32> to vector<8x1xf32>
    %391 = vector.extract_strided_slice %209 {offsets = [0, 0], sizes = [8, 32], strides = [1, 1]} : vector<24x32xf32> to vector<8x32xf32>
    %392 = vector.extract_strided_slice %208 {offsets = [8, 0], sizes = [8, 32], strides = [1, 1]} : vector<24x32xf32> to vector<8x32xf32>
    %393 = arith.mulf %386, %392 : vector<8x32xf32>
    %cst_180 = arith.constant dense<0.000000e+00> : vector<8xf32>
    %394 = vector.multi_reduction <add>, %393, %cst_180 [1] : vector<8x32xf32> to vector<8xf32>
    %395 = vector.shape_cast %394 : vector<8xf32> to vector<8x1xf32>
    %396 = vector.extract_strided_slice %209 {offsets = [8, 0], sizes = [8, 32], strides = [1, 1]} : vector<24x32xf32> to vector<8x32xf32>
    %397 = tpu.concatenate %390, %395 in 1 : vector<8x1xf32>, vector<8x1xf32> -> vector<8x2xf32>
    %cst_181 = arith.constant dense<0xFF800000> : vector<8xf32>
    %398 = vector.multi_reduction <maximumf>, %397, %cst_181 [1] : vector<8x2xf32> to vector<8xf32>
    %399 = vector.shape_cast %398 : vector<8xf32> to vector<8x1xf32>
    %400 = vector.broadcast %399 : vector<8x1xf32> to vector<8x2xf32>
    %401 = arith.subf %397, %400 : vector<8x2xf32>
    %402 = math.exp %401 : vector<8x2xf32>
    %cst_182 = arith.constant dense<0.000000e+00> : vector<8xf32>
    %403 = vector.multi_reduction <add>, %402, %cst_182 [1] : vector<8x2xf32> to vector<8xf32>
    %404 = vector.shape_cast %403 : vector<8xf32> to vector<8x1xf32>
    %405 = tpu.reciprocal %404 {approx = true} : vector<8x1xf32> -> vector<8x1xf32>
    %406 = vector.broadcast %405 : vector<8x1xf32> to vector<8x2xf32>
    %407 = arith.mulf %402, %406 : vector<8x2xf32>
    %408 = vector.extract_strided_slice %407 {offsets = [0, 0], sizes = [8, 1], strides = [1, 1]} : vector<8x2xf32> to vector<8x1xf32>
    %409 = vector.broadcast %408 : vector<8x1xf32> to vector<8x32xf32>
    %410 = arith.mulf %409, %391 : vector<8x32xf32>
    %411 = vector.extract_strided_slice %407 {offsets = [0, 1], sizes = [8, 1], strides = [1, 1]} : vector<8x2xf32> to vector<8x1xf32>
    %412 = vector.broadcast %411 : vector<8x1xf32> to vector<8x32xf32>
    %413 = arith.mulf %412, %396 : vector<8x32xf32>
    %414 = arith.addf %410, %413 : vector<8x32xf32>
    %cst_183 = arith.constant dense<0.000000e+00> : vector<8xf32>
    %415 = vector.multi_reduction <add>, %168, %cst_183 [1] : vector<8x32xf32> to vector<8xf32>
    %416 = vector.shape_cast %415 : vector<8xf32> to vector<8x1xf32>
    %cst_184 = arith.constant dense<0.000000e+00> : vector<8xf32>
    %417 = vector.multi_reduction <add>, %414, %cst_184 [1] : vector<8x32xf32> to vector<8xf32>
    %418 = vector.shape_cast %417 : vector<8xf32> to vector<8x1xf32>
    %419 = arith.addf %416, %418 : vector<8x1xf32>
    %cst_185 = arith.constant 1.562500e-02 : f32
    %420 = vector.broadcast %cst_185 : f32 to vector<8x1xf32>
    %421 = arith.mulf %419, %420 : vector<8x1xf32>
    %422 = vector.broadcast %421 : vector<8x1xf32> to vector<8x32xf32>
    %423 = arith.subf %168, %422 : vector<8x32xf32>
    %424 = vector.broadcast %421 : vector<8x1xf32> to vector<8x32xf32>
    %425 = arith.subf %414, %424 : vector<8x32xf32>
    %426 = arith.mulf %423, %423 : vector<8x32xf32>
    %cst_186 = arith.constant dense<0.000000e+00> : vector<8xf32>
    %427 = vector.multi_reduction <add>, %426, %cst_186 [1] : vector<8x32xf32> to vector<8xf32>
    %428 = vector.shape_cast %427 : vector<8xf32> to vector<8x1xf32>
    %429 = arith.mulf %425, %425 : vector<8x32xf32>
    %cst_187 = arith.constant dense<0.000000e+00> : vector<8xf32>
    %430 = vector.multi_reduction <add>, %429, %cst_187 [1] : vector<8x32xf32> to vector<8xf32>
    %431 = vector.shape_cast %430 : vector<8xf32> to vector<8x1xf32>
    %432 = arith.addf %428, %431 : vector<8x1xf32>
    %cst_188 = arith.constant 1.562500e-02 : f32
    %433 = vector.broadcast %cst_188 : f32 to vector<8x1xf32>
    %434 = arith.mulf %432, %433 : vector<8x1xf32>
    %cst_189 = arith.constant 9.99999974E-6 : f32
    %435 = vector.broadcast %cst_189 : f32 to vector<8x1xf32>
    %436 = arith.addf %434, %435 : vector<8x1xf32>
    %437 = math.rsqrt %436 : vector<8x1xf32>
    %438 = vector.broadcast %437 : vector<8x1xf32> to vector<8x32xf32>
    %439 = arith.mulf %423, %438 : vector<8x32xf32>
    %440 = arith.truncf %439 : vector<8x32xf32> to vector<8x32xbf16>
    %c2_190 = arith.constant 2 : index
    %c0_191 = arith.constant 0 : index
    %c0_192 = arith.constant 0 : index
    %441 = vector.load %arg9[%c2_190, %c0_191, %c0_192] : memref<3x32x32xbf16, #tpu.memory_space<vmem>>, vector<1x32x32xbf16>
    %442 = vector.shape_cast %441 : vector<1x32x32xbf16> to vector<32x32xbf16>
    %cst_193 = arith.constant dense<0.000000e+00> : vector<8x32xf32>
    %443 = tpu.matmul %440, %442, %cst_193 {dimension_numbers = #tpu.dot_dimension_numbers<[1], [0], [0], [1], [0, 0, 1, 1], [], []>} : vector<8x32xbf16>, vector<32x32xbf16>, vector<8x32xf32> -> vector<8x32xf32>
    %444 = vector.broadcast %437 : vector<8x1xf32> to vector<8x32xf32>
    %445 = arith.mulf %425, %444 : vector<8x32xf32>
    %446 = arith.truncf %445 : vector<8x32xf32> to vector<8x32xbf16>
    %c2_194 = arith.constant 2 : index
    %c0_195 = arith.constant 0 : index
    %c0_196 = arith.constant 0 : index
    %447 = vector.load %arg10[%c2_194, %c0_195, %c0_196] : memref<3x32x32xbf16, #tpu.memory_space<vmem>>, vector<1x32x32xbf16>
    %448 = vector.shape_cast %447 : vector<1x32x32xbf16> to vector<32x32xbf16>
    %cst_197 = arith.constant dense<0.000000e+00> : vector<8x32xf32>
    %449 = tpu.matmul %446, %448, %cst_197 {dimension_numbers = #tpu.dot_dimension_numbers<[1], [0], [0], [1], [0, 0, 1, 1], [], []>} : vector<8x32xbf16>, vector<32x32xbf16>, vector<8x32xf32> -> vector<8x32xf32>
    %450 = arith.addf %443, %449 : vector<8x32xf32>
    %c2_198 = arith.constant 2 : index
    %c0_199 = arith.constant 0 : index
    %c0_200 = arith.constant 0 : index
    %451 = vector.load %arg11[%c2_198, %c0_199, %c0_200] : memref<3x1x32xf32, #tpu.memory_space<vmem>>, vector<1x1x32xf32>
    %452 = vector.shape_cast %451 : vector<1x1x32xf32> to vector<1x32xf32>
    %453 = vector.broadcast %452 : vector<1x32xf32> to vector<8x32xf32>
    %454 = arith.addf %450, %453 : vector<8x32xf32>
    %cst_201 = arith.constant 0.000000e+00 : f32
    %455 = vector.broadcast %cst_201 : f32 to vector<8x32xf32>
    %456 = arith.cmpf oge, %454, %455 : vector<8x32xf32>
    %cst_202 = arith.constant 0.00999999977 : f32
    %457 = vector.broadcast %cst_202 : f32 to vector<8x32xf32>
    %458 = arith.mulf %457, %454 : vector<8x32xf32>
    %459 = arith.select %456, %454, %458 : vector<8x32xi1>, vector<8x32xf32>
    %460 = arith.truncf %459 : vector<8x32xf32> to vector<8x32xbf16>
    %c2_203 = arith.constant 2 : index
    %c0_204 = arith.constant 0 : index
    %c0_205 = arith.constant 0 : index
    %461 = vector.load %arg12[%c2_203, %c0_204, %c0_205] : memref<3x32x128xbf16, #tpu.memory_space<vmem>>, vector<1x32x128xbf16>
    %462 = vector.shape_cast %461 : vector<1x32x128xbf16> to vector<32x128xbf16>
    %cst_206 = arith.constant dense<0.000000e+00> : vector<8x128xf32>
    %463 = tpu.matmul %460, %462, %cst_206 {dimension_numbers = #tpu.dot_dimension_numbers<[1], [0], [0], [1], [0, 0, 1, 1], [], []>} : vector<8x32xbf16>, vector<32x128xbf16>, vector<8x128xf32> -> vector<8x128xf32>
    %c2_207 = arith.constant 2 : index
    %c0_208 = arith.constant 0 : index
    %c0_209 = arith.constant 0 : index
    %464 = vector.load %arg13[%c2_207, %c0_208, %c0_209] : memref<3x1x128xf32, #tpu.memory_space<vmem>>, vector<1x1x128xf32>
    %465 = vector.shape_cast %464 : vector<1x1x128xf32> to vector<1x128xf32>
    %466 = vector.broadcast %465 : vector<1x128xf32> to vector<8x128xf32>
    %467 = arith.addf %463, %466 : vector<8x128xf32>
    %c2_210 = arith.constant 2 : index
    %c0_211 = arith.constant 0 : index
    %c0_212 = arith.constant 0 : index
    %468 = vector.load %arg14[%c2_210, %c0_211, %c0_212] : memref<3x8x128xf32, #tpu.memory_space<vmem>>, vector<1x8x128xf32>
    %469 = vector.shape_cast %468 : vector<1x8x128xf32> to vector<8x128xf32>
    %470 = vector.shape_cast %467 : vector<8x128xf32> to vector<1x8x128xf32>
    tpu.vector_store %arg14[%c2_210, %c0_211, %c0_212], %470 {strides = array<i32>} : memref<3x8x128xf32, #tpu.memory_space<vmem>>, vector<1x8x128xf32>,
    return
  }
  func.func @transform_0(%arg0: i32) -> (i32, i32, i32) {
    %c0_i32 = arith.constant 0 : i32
    %c0_i32_0 = arith.constant 0 : i32
    %c0_i32_1 = arith.constant 0 : i32
    return %c0_i32, %arg0, %c0_i32_0 : i32, i32, i32
  }
  func.func @transform_1(%arg0: i32) -> (i32, i32, i32) {
    %c0_i32 = arith.constant 0 : i32
    %c0_i32_0 = arith.constant 0 : i32
    %c0_i32_1 = arith.constant 0 : i32
    return %c0_i32, %arg0, %c0_i32_0 : i32, i32, i32
  }
  func.func @transform_2(%arg0: i32) -> (i32, i32, i32) {
    %c0_i32 = arith.constant 0 : i32
    %c0_i32_0 = arith.constant 0 : i32
    %c0_i32_1 = arith.constant 0 : i32
    %c0_i32_2 = arith.constant 0 : i32
    return %c0_i32, %c0_i32_0, %c0_i32_1 : i32, i32, i32
  }
  func.func @transform_3(%arg0: i32) -> (i32, i32, i32) {
    %c0_i32 = arith.constant 0 : i32
    %c0_i32_0 = arith.constant 0 : i32
    %c0_i32_1 = arith.constant 0 : i32
    %c0_i32_2 = arith.constant 0 : i32
    return %c0_i32, %c0_i32_0, %c0_i32_1 : i32, i32, i32
  }
  func.func @transform_4(%arg0: i32) -> (i32, i32, i32) {
    %c0_i32 = arith.constant 0 : i32
    %c0_i32_0 = arith.constant 0 : i32
    %c0_i32_1 = arith.constant 0 : i32
    %c0_i32_2 = arith.constant 0 : i32
    return %c0_i32, %c0_i32_0, %c0_i32_1 : i32, i32, i32
  }
  func.func @transform_5(%arg0: i32) -> (i32, i32, i32) {
    %c0_i32 = arith.constant 0 : i32
    %c0_i32_0 = arith.constant 0 : i32
    %c0_i32_1 = arith.constant 0 : i32
    %c0_i32_2 = arith.constant 0 : i32
    return %c0_i32, %c0_i32_0, %c0_i32_1 : i32, i32, i32
  }
  func.func @transform_6(%arg0: i32) -> (i32, i32) {
    %c0_i32 = arith.constant 0 : i32
    %c0_i32_0 = arith.constant 0 : i32
    %c0_i32_1 = arith.constant 0 : i32
    return %c0_i32, %c0_i32_0 : i32, i32
  }
  func.func @transform_7(%arg0: i32) -> (i32, i32) {
    %c0_i32 = arith.constant 0 : i32
    %c0_i32_0 = arith.constant 0 : i32
    %c0_i32_1 = arith.constant 0 : i32
    return %c0_i32, %c0_i32_0 : i32, i32
  }
  func.func @transform_8(%arg0: i32) -> (i32, i32, i32) {
    %c0_i32 = arith.constant 0 : i32
    %c0_i32_0 = arith.constant 0 : i32
    %c0_i32_1 = arith.constant 0 : i32
    %c0_i32_2 = arith.constant 0 : i32
    return %c0_i32, %c0_i32_0, %c0_i32_1 : i32, i32, i32
  }
  func.func @transform_9(%arg0: i32) -> (i32, i32, i32) {
    %c0_i32 = arith.constant 0 : i32
    %c0_i32_0 = arith.constant 0 : i32
    %c0_i32_1 = arith.constant 0 : i32
    %c0_i32_2 = arith.constant 0 : i32
    return %c0_i32, %c0_i32_0, %c0_i32_1 : i32, i32, i32
  }
  func.func @transform_10(%arg0: i32) -> (i32, i32, i32) {
    %c0_i32 = arith.constant 0 : i32
    %c0_i32_0 = arith.constant 0 : i32
    %c0_i32_1 = arith.constant 0 : i32
    %c0_i32_2 = arith.constant 0 : i32
    return %c0_i32, %c0_i32_0, %c0_i32_1 : i32, i32, i32
  }
  func.func @transform_11(%arg0: i32) -> (i32, i32, i32) {
    %c0_i32 = arith.constant 0 : i32
    %c0_i32_0 = arith.constant 0 : i32
    %c0_i32_1 = arith.constant 0 : i32
    %c0_i32_2 = arith.constant 0 : i32
    return %c0_i32, %c0_i32_0, %c0_i32_1 : i32, i32, i32
  }
  func.func @transform_12(%arg0: i32) -> (i32, i32, i32) {
    %c0_i32 = arith.constant 0 : i32
    %c0_i32_0 = arith.constant 0 : i32
    %c0_i32_1 = arith.constant 0 : i32
    %c0_i32_2 = arith.constant 0 : i32
    return %c0_i32, %c0_i32_0, %c0_i32_1 : i32, i32, i32
  }
  func.func @transform_13(%arg0: i32) -> (i32, i32, i32) {
    %c0_i32 = arith.constant 0 : i32
    %c0_i32_0 = arith.constant 0 : i32
    %c0_i32_1 = arith.constant 0 : i32
    return %c0_i32, %arg0, %c0_i32_0 : i32, i32, i32
  }
}

module attributes {stable_mosaic.version = 11 : i64} {
  func.func @_fused_attention_critic_kernel(%arg0: i32, %arg1: memref<3x8x16xf32, #tpu.memory_space<vmem>>, %arg2: memref<3x8x24xf32, #tpu.memory_space<vmem>>, %arg3: memref<3x16x32xbf16, #tpu.memory_space<vmem>>, %arg4: memref<3x1x32xf32, #tpu.memory_space<vmem>>, %arg5: memref<3x24x32xbf16, #tpu.memory_space<vmem>>, %arg6: memref<3x1x32xf32, #tpu.memory_space<vmem>>, %arg7: memref<32x96xbf16, #tpu.memory_space<vmem>>, %arg8: memref<1x96xf32, #tpu.memory_space<vmem>>, %arg9: memref<3x32x32xbf16, #tpu.memory_space<vmem>>, %arg10: memref<3x32x32xbf16, #tpu.memory_space<vmem>>, %arg11: memref<3x1x32xf32, #tpu.memory_space<vmem>>, %arg12: memref<3x32x128xbf16, #tpu.memory_space<vmem>>, %arg13: memref<3x1x128xf32, #tpu.memory_space<vmem>>, %arg14: memref<3x8x128xf32, #tpu.memory_space<vmem>>, %arg15: memref<24x32xf32, #tpu.memory_space<vmem>>) attributes {dimension_semantics = [#tpu.dimension_semantics<parallel>], iteration_bounds = array<i64: 1>, scalar_prefetch = 0 : i64, scratch_operands = 1 : i64, tpu.core_type = #tpu.core_type<tc>, window_params = [{transform_indices = @transform_0, window_bounds = array<i64: 3, 8, 16>}, {transform_indices = @transform_1, window_bounds = array<i64: 3, 8, 24>}, {pipeline_mode = #tpu.pipeline_mode<synchronous>, transform_indices = @transform_2, window_bounds = array<i64: 3, 16, 32>}, {pipeline_mode = #tpu.pipeline_mode<synchronous>, transform_indices = @transform_3, window_bounds = array<i64: 3, 1, 32>}, {pipeline_mode = #tpu.pipeline_mode<synchronous>, transform_indices = @transform_4, window_bounds = array<i64: 3, 24, 32>}, {pipeline_mode = #tpu.pipeline_mode<synchronous>, transform_indices = @transform_5, window_bounds = array<i64: 3, 1, 32>}, {pipeline_mode = #tpu.pipeline_mode<synchronous>, transform_indices = @transform_6, window_bounds = array<i64: 32, 96>}, {pipeline_mode = #tpu.pipeline_mode<synchronous>, transform_indices = @transform_7, window_bounds = array<i64: 1, 96>}, {pipeline_mode = #tpu.pipeline_mode<synchronous>, transform_indices = @transform_8, window_bounds = array<i64: 3, 32, 32>}, {pipeline_mode = #tpu.pipeline_mode<synchronous>, transform_indices = @transform_9, window_bounds = array<i64: 3, 32, 32>}, {pipeline_mode = #tpu.pipeline_mode<synchronous>, transform_indices = @transform_10, window_bounds = array<i64: 3, 1, 32>}, {pipeline_mode = #tpu.pipeline_mode<synchronous>, transform_indices = @transform_11, window_bounds = array<i64: 3, 32, 128>}, {pipeline_mode = #tpu.pipeline_mode<synchronous>, transform_indices = @transform_12, window_bounds = array<i64: 3, 1, 128>}, {transform_indices = @transform_13, window_bounds = array<i64: 3, 8, 128>}]} {
    %c0 = arith.constant 0 : index
    %c0_0 = arith.constant 0 : index
    %c0_1 = arith.constant 0 : index
    %0 = vector.load %arg1[%c0, %c0_0, %c0_1] : memref<3x8x16xf32, #tpu.memory_space<vmem>>, vector<1x8x16xf32>
    %1 = vector.shape_cast %0 : vector<1x8x16xf32> to vector<8x16xf32>
    %c0_2 = arith.constant 0 : index
    %c0_3 = arith.constant 0 : index
    %c0_4 = arith.constant 0 : index
    %2 = vector.load %arg2[%c0_2, %c0_3, %c0_4] : memref<3x8x24xf32, #tpu.memory_space<vmem>>, vector<1x8x24xf32>
    %3 = vector.shape_cast %2 : vector<1x8x24xf32> to vector<8x24xf32>
    %cst = arith.constant dense<0.000000e+00> : vector<8xf32>
    %4 = vector.multi_reduction <add>, %1, %cst [1] : vector<8x16xf32> to vector<8xf32>
    %5 = vector.shape_cast %4 : vector<8xf32> to vector<8x1xf32>
    %cst_5 = arith.constant 1.600000e+01 : f32
    %6 = vector.broadcast %cst_5 : f32 to vector<8x1xf32>
    %7 = arith.divf %5, %6 : vector<8x1xf32>
    %8 = vector.broadcast %7 : vector<8x1xf32> to vector<8x16xf32>
    %9 = arith.subf %1, %8 : vector<8x16xf32>
    %10 = arith.mulf %9, %9 : vector<8x16xf32>
    %cst_6 = arith.constant dense<0.000000e+00> : vector<8xf32>
    %11 = vector.multi_reduction <add>, %10, %cst_6 [1] : vector<8x16xf32> to vector<8xf32>
    %12 = vector.shape_cast %11 : vector<8xf32> to vector<8x1xf32>
    %cst_7 = arith.constant 1.600000e+01 : f32
    %13 = vector.broadcast %cst_7 : f32 to vector<8x1xf32>
    %14 = arith.divf %12, %13 : vector<8x1xf32>
    %15 = vector.broadcast %7 : vector<8x1xf32> to vector<8x16xf32>
    %16 = arith.subf %1, %15 : vector<8x16xf32>
    %cst_8 = arith.constant 9.99999974E-6 : f32
    %17 = vector.broadcast %cst_8 : f32 to vector<8x1xf32>
    %18 = arith.addf %14, %17 : vector<8x1xf32>
    %19 = math.rsqrt %18 : vector<8x1xf32>
    %20 = vector.broadcast %19 : vector<8x1xf32> to vector<8x16xf32>
    %21 = arith.mulf %16, %20 : vector<8x16xf32>
    %22 = arith.truncf %21 : vector<8x16xf32> to vector<8x16xbf16>
    %c0_9 = arith.constant 0 : index
    %c0_10 = arith.constant 0 : index
    %c0_11 = arith.constant 0 : index
    %23 = vector.load %arg3[%c0_9, %c0_10, %c0_11] : memref<3x16x32xbf16, #tpu.memory_space<vmem>>, vector<1x16x32xbf16>
    %24 = vector.shape_cast %23 : vector<1x16x32xbf16> to vector<16x32xbf16>
    %cst_12 = arith.constant dense<0.000000e+00> : vector<8x32xf32>
    %25 = tpu.matmul %22, %24, %cst_12 {dimension_numbers = #tpu.dot_dimension_numbers<[1], [0], [0], [1], [0, 0, 1, 1], [], []>} : vector<8x16xbf16>, vector<16x32xbf16>, vector<8x32xf32> -> vector<8x32xf32>
    %c0_13 = arith.constant 0 : index
    %c0_14 = arith.constant 0 : index
    %c0_15 = arith.constant 0 : index
    %26 = vector.load %arg4[%c0_13, %c0_14, %c0_15] : memref<3x1x32xf32, #tpu.memory_space<vmem>>, vector<1x1x32xf32>
    %27 = vector.shape_cast %26 : vector<1x1x32xf32> to vector<1x32xf32>
    %28 = vector.broadcast %27 : vector<1x32xf32> to vector<8x32xf32>
    %29 = arith.addf %25, %28 : vector<8x32xf32>
    %cst_16 = arith.constant 0.000000e+00 : f32
    %30 = vector.broadcast %cst_16 : f32 to vector<8x32xf32>
    %31 = arith.cmpf oge, %29, %30 : vector<8x32xf32>
    %cst_17 = arith.constant 0.00999999977 : f32
    %32 = vector.broadcast %cst_17 : f32 to vector<8x32xf32>
    %33 = arith.mulf %32, %29 : vector<8x32xf32>
    %34 = arith.select %31, %29, %33 : vector<8x32xi1>, vector<8x32xf32>
    %cst_18 = arith.constant dense<0.000000e+00> : vector<8xf32>
    %35 = vector.multi_reduction <add>, %3, %cst_18 [1] : vector<8x24xf32> to vector<8xf32>
    %36 = vector.shape_cast %35 : vector<8xf32> to vector<8x1xf32>
    %cst_19 = arith.constant 2.400000e+01 : f32
    %37 = vector.broadcast %cst_19 : f32 to vector<8x1xf32>
    %38 = arith.divf %36, %37 : vector<8x1xf32>
    %39 = vector.broadcast %38 : vector<8x1xf32> to vector<8x24xf32>
    %40 = arith.subf %3, %39 : vector<8x24xf32>
    %41 = arith.mulf %40, %40 : vector<8x24xf32>
    %cst_20 = arith.constant dense<0.000000e+00> : vector<8xf32>
    %42 = vector.multi_reduction <add>, %41, %cst_20 [1] : vector<8x24xf32> to vector<8xf32>
    %43 = vector.shape_cast %42 : vector<8xf32> to vector<8x1xf32>
    %cst_21 = arith.constant 2.400000e+01 : f32
    %44 = vector.broadcast %cst_21 : f32 to vector<8x1xf32>
    %45 = arith.divf %43, %44 : vector<8x1xf32>
    %46 = vector.broadcast %38 : vector<8x1xf32> to vector<8x24xf32>
    %47 = arith.subf %3, %46 : vector<8x24xf32>
    %cst_22 = arith.constant 9.99999974E-6 : f32
    %48 = vector.broadcast %cst_22 : f32 to vector<8x1xf32>
    %49 = arith.addf %45, %48 : vector<8x1xf32>
    %50 = math.rsqrt %49 : vector<8x1xf32>
    %51 = vector.broadcast %50 : vector<8x1xf32> to vector<8x24xf32>
    %52 = arith.mulf %47, %51 : vector<8x24xf32>
    %53 = arith.truncf %52 : vector<8x24xf32> to vector<8x24xbf16>
    %c0_23 = arith.constant 0 : index
    %c0_24 = arith.constant 0 : index
    %c0_25 = arith.constant 0 : index
    %54 = vector.load %arg5[%c0_23, %c0_24, %c0_25] : memref<3x24x32xbf16, #tpu.memory_space<vmem>>, vector<1x24x32xbf16>
    %55 = vector.shape_cast %54 : vector<1x24x32xbf16> to vector<24x32xbf16>
    %cst_26 = arith.constant dense<0.000000e+00> : vector<8x32xf32>
    %56 = tpu.matmul %53, %55, %cst_26 {dimension_numbers = #tpu.dot_dimension_numbers<[1], [0], [0], [1], [0, 0, 1, 1], [], []>} : vector<8x24xbf16>, vector<24x32xbf16>, vector<8x32xf32> -> vector<8x32xf32>
    %c0_27 = arith.constant 0 : index
    %c0_28 = arith.constant 0 : index
    %c0_29 = arith.constant 0 : index
    %57 = vector.load %arg6[%c0_27, %c0_28, %c0_29] : memref<3x1x32xf32, #tpu.memory_space<vmem>>, vector<1x1x32xf32>
    %58 = vector.shape_cast %57 : vector<1x1x32xf32> to vector<1x32xf32>
    %59 = vector.broadcast %58 : vector<1x32xf32> to vector<8x32xf32>
    %60 = arith.addf %56, %59 : vector<8x32xf32>
    %cst_30 = arith.constant 0.000000e+00 : f32
    %61 = vector.broadcast %cst_30 : f32 to vector<8x32xf32>
    %62 = arith.cmpf oge, %60, %61 : vector<8x32xf32>
    %cst_31 = arith.constant 0.00999999977 : f32
    %63 = vector.broadcast %cst_31 : f32 to vector<8x32xf32>
    %64 = arith.mulf %63, %60 : vector<8x32xf32>
    %65 = arith.select %62, %60, %64 : vector<8x32xi1>, vector<8x32xf32>
    %c0_32 = arith.constant 0 : index
    %c0_33 = arith.constant 0 : index
    %66 = vector.load %arg15[%c0_32, %c0_33] : memref<24x32xf32, #tpu.memory_space<vmem>>, vector<8x32xf32>
    tpu.vector_store %arg15[%c0_32, %c0_33], %65 {strides = array<i32>} : memref<24x32xf32, #tpu.memory_space<vmem>>, vector<8x32xf32>,
    %c1 = arith.constant 1 : index
    %c0_34 = arith.constant 0 : index
    %c0_35 = arith.constant 0 : index
    %67 = vector.load %arg1[%c1, %c0_34, %c0_35] : memref<3x8x16xf32, #tpu.memory_space<vmem>>, vector<1x8x16xf32>
    %68 = vector.shape_cast %67 : vector<1x8x16xf32> to vector<8x16xf32>
    %c1_36 = arith.constant 1 : index
    %c0_37 = arith.constant 0 : index
    %c0_38 = arith.constant 0 : index
    %69 = vector.load %arg2[%c1_36, %c0_37, %c0_38] : memref<3x8x24xf32, #tpu.memory_space<vmem>>, vector<1x8x24xf32>
    %70 = vector.shape_cast %69 : vector<1x8x24xf32> to vector<8x24xf32>
    %cst_39 = arith.constant dense<0.000000e+00> : vector<8xf32>
    %71 = vector.multi_reduction <add>, %68, %cst_39 [1] : vector<8x16xf32> to vector<8xf32>
    %72 = vector.shape_cast %71 : vector<8xf32> to vector<8x1xf32>
    %cst_40 = arith.constant 1.600000e+01 : f32
    %73 = vector.broadcast %cst_40 : f32 to vector<8x1xf32>
    %74 = arith.divf %72, %73 : vector<8x1xf32>
    %75 = vector.broadcast %74 : vector<8x1xf32> to vector<8x16xf32>
    %76 = arith.subf %68, %75 : vector<8x16xf32>
    %77 = arith.mulf %76, %76 : vector<8x16xf32>
    %cst_41 = arith.constant dense<0.000000e+00> : vector<8xf32>
    %78 = vector.multi_reduction <add>, %77, %cst_41 [1] : vector<8x16xf32> to vector<8xf32>
    %79 = vector.shape_cast %78 : vector<8xf32> to vector<8x1xf32>
    %cst_42 = arith.constant 1.600000e+01 : f32
    %80 = vector.broadcast %cst_42 : f32 to vector<8x1xf32>
    %81 = arith.divf %79, %80 : vector<8x1xf32>
    %82 = vector.broadcast %74 : vector<8x1xf32> to vector<8x16xf32>
    %83 = arith.subf %68, %82 : vector<8x16xf32>
    %cst_43 = arith.constant 9.99999974E-6 : f32
    %84 = vector.broadcast %cst_43 : f32 to vector<8x1xf32>
    %85 = arith.addf %81, %84 : vector<8x1xf32>
    %86 = math.rsqrt %85 : vector<8x1xf32>
    %87 = vector.broadcast %86 : vector<8x1xf32> to vector<8x16xf32>
    %88 = arith.mulf %83, %87 : vector<8x16xf32>
    %89 = arith.truncf %88 : vector<8x16xf32> to vector<8x16xbf16>
    %c1_44 = arith.constant 1 : index
    %c0_45 = arith.constant 0 : index
    %c0_46 = arith.constant 0 : index
    %90 = vector.load %arg3[%c1_44, %c0_45, %c0_46] : memref<3x16x32xbf16, #tpu.memory_space<vmem>>, vector<1x16x32xbf16>
    %91 = vector.shape_cast %90 : vector<1x16x32xbf16> to vector<16x32xbf16>
    %cst_47 = arith.constant dense<0.000000e+00> : vector<8x32xf32>
    %92 = tpu.matmul %89, %91, %cst_47 {dimension_numbers = #tpu.dot_dimension_numbers<[1], [0], [0], [1], [0, 0, 1, 1], [], []>} : vector<8x16xbf16>, vector<16x32xbf16>, vector<8x32xf32> -> vector<8x32xf32>
    %c1_48 = arith.constant 1 : index
    %c0_49 = arith.constant 0 : index
    %c0_50 = arith.constant 0 : index
    %93 = vector.load %arg4[%c1_48, %c0_49, %c0_50] : memref<3x1x32xf32, #tpu.memory_space<vmem>>, vector<1x1x32xf32>
    %94 = vector.shape_cast %93 : vector<1x1x32xf32> to vector<1x32xf32>
    %95 = vector.broadcast %94 : vector<1x32xf32> to vector<8x32xf32>
    %96 = arith.addf %92, %95 : vector<8x32xf32>
    %cst_51 = arith.constant 0.000000e+00 : f32
    %97 = vector.broadcast %cst_51 : f32 to vector<8x32xf32>
    %98 = arith.cmpf oge, %96, %97 : vector<8x32xf32>
    %cst_52 = arith.constant 0.00999999977 : f32
    %99 = vector.broadcast %cst_52 : f32 to vector<8x32xf32>
    %100 = arith.mulf %99, %96 : vector<8x32xf32>
    %101 = arith.select %98, %96, %100 : vector<8x32xi1>, vector<8x32xf32>
    %cst_53 = arith.constant dense<0.000000e+00> : vector<8xf32>
    %102 = vector.multi_reduction <add>, %70, %cst_53 [1] : vector<8x24xf32> to vector<8xf32>
    %103 = vector.shape_cast %102 : vector<8xf32> to vector<8x1xf32>
    %cst_54 = arith.constant 2.400000e+01 : f32
    %104 = vector.broadcast %cst_54 : f32 to vector<8x1xf32>
    %105 = arith.divf %103, %104 : vector<8x1xf32>
    %106 = vector.broadcast %105 : vector<8x1xf32> to vector<8x24xf32>
    %107 = arith.subf %70, %106 : vector<8x24xf32>
    %108 = arith.mulf %107, %107 : vector<8x24xf32>
    %cst_55 = arith.constant dense<0.000000e+00> : vector<8xf32>
    %109 = vector.multi_reduction <add>, %108, %cst_55 [1] : vector<8x24xf32> to vector<8xf32>
    %110 = vector.shape_cast %109 : vector<8xf32> to vector<8x1xf32>
    %cst_56 = arith.constant 2.400000e+01 : f32
    %111 = vector.broadcast %cst_56 : f32 to vector<8x1xf32>
    %112 = arith.divf %110, %111 : vector<8x1xf32>
    %113 = vector.broadcast %105 : vector<8x1xf32> to vector<8x24xf32>
    %114 = arith.subf %70, %113 : vector<8x24xf32>
    %cst_57 = arith.constant 9.99999974E-6 : f32
    %115 = vector.broadcast %cst_57 : f32 to vector<8x1xf32>
    %116 = arith.addf %112, %115 : vector<8x1xf32>
    %117 = math.rsqrt %116 : vector<8x1xf32>
    %118 = vector.broadcast %117 : vector<8x1xf32> to vector<8x24xf32>
    %119 = arith.mulf %114, %118 : vector<8x24xf32>
    %120 = arith.truncf %119 : vector<8x24xf32> to vector<8x24xbf16>
    %c1_58 = arith.constant 1 : index
    %c0_59 = arith.constant 0 : index
    %c0_60 = arith.constant 0 : index
    %121 = vector.load %arg5[%c1_58, %c0_59, %c0_60] : memref<3x24x32xbf16, #tpu.memory_space<vmem>>, vector<1x24x32xbf16>
    %122 = vector.shape_cast %121 : vector<1x24x32xbf16> to vector<24x32xbf16>
    %cst_61 = arith.constant dense<0.000000e+00> : vector<8x32xf32>
    %123 = tpu.matmul %120, %122, %cst_61 {dimension_numbers = #tpu.dot_dimension_numbers<[1], [0], [0], [1], [0, 0, 1, 1], [], []>} : vector<8x24xbf16>, vector<24x32xbf16>, vector<8x32xf32> -> vector<8x32xf32>
    %c1_62 = arith.constant 1 : index
    %c0_63 = arith.constant 0 : index
    %c0_64 = arith.constant 0 : index
    %124 = vector.load %arg6[%c1_62, %c0_63, %c0_64] : memref<3x1x32xf32, #tpu.memory_space<vmem>>, vector<1x1x32xf32>
    %125 = vector.shape_cast %124 : vector<1x1x32xf32> to vector<1x32xf32>
    %126 = vector.broadcast %125 : vector<1x32xf32> to vector<8x32xf32>
    %127 = arith.addf %123, %126 : vector<8x32xf32>
    %cst_65 = arith.constant 0.000000e+00 : f32
    %128 = vector.broadcast %cst_65 : f32 to vector<8x32xf32>
    %129 = arith.cmpf oge, %127, %128 : vector<8x32xf32>
    %cst_66 = arith.constant 0.00999999977 : f32
    %130 = vector.broadcast %cst_66 : f32 to vector<8x32xf32>
    %131 = arith.mulf %130, %127 : vector<8x32xf32>
    %132 = arith.select %129, %127, %131 : vector<8x32xi1>, vector<8x32xf32>
    %c8 = arith.constant 8 : index
    %c0_67 = arith.constant 0 : index
    %133 = vector.load %arg15[%c8, %c0_67] : memref<24x32xf32, #tpu.memory_space<vmem>>, vector<8x32xf32>
    tpu.vector_store %arg15[%c8, %c0_67], %132 {strides = array<i32>} : memref<24x32xf32, #tpu.memory_space<vmem>>, vector<8x32xf32>,
    %c2 = arith.constant 2 : index
    %c0_68 = arith.constant 0 : index
    %c0_69 = arith.constant 0 : index
    %134 = vector.load %arg1[%c2, %c0_68, %c0_69] : memref<3x8x16xf32, #tpu.memory_space<vmem>>, vector<1x8x16xf32>
    %135 = vector.shape_cast %134 : vector<1x8x16xf32> to vector<8x16xf32>
    %c2_70 = arith.constant 2 : index
    %c0_71 = arith.constant 0 : index
    %c0_72 = arith.constant 0 : index
    %136 = vector.load %arg2[%c2_70, %c0_71, %c0_72] : memref<3x8x24xf32, #tpu.memory_space<vmem>>, vector<1x8x24xf32>
    %137 = vector.shape_cast %136 : vector<1x8x24xf32> to vector<8x24xf32>
    %cst_73 = arith.constant dense<0.000000e+00> : vector<8xf32>
    %138 = vector.multi_reduction <add>, %135, %cst_73 [1] : vector<8x16xf32> to vector<8xf32>
    %139 = vector.shape_cast %138 : vector<8xf32> to vector<8x1xf32>
    %cst_74 = arith.constant 1.600000e+01 : f32
    %140 = vector.broadcast %cst_74 : f32 to vector<8x1xf32>
    %141 = arith.divf %139, %140 : vector<8x1xf32>
    %142 = vector.broadcast %141 : vector<8x1xf32> to vector<8x16xf32>
    %143 = arith.subf %135, %142 : vector<8x16xf32>
    %144 = arith.mulf %143, %143 : vector<8x16xf32>
    %cst_75 = arith.constant dense<0.000000e+00> : vector<8xf32>
    %145 = vector.multi_reduction <add>, %144, %cst_75 [1] : vector<8x16xf32> to vector<8xf32>
    %146 = vector.shape_cast %145 : vector<8xf32> to vector<8x1xf32>
    %cst_76 = arith.constant 1.600000e+01 : f32
    %147 = vector.broadcast %cst_76 : f32 to vector<8x1xf32>
    %148 = arith.divf %146, %147 : vector<8x1xf32>
    %149 = vector.broadcast %141 : vector<8x1xf32> to vector<8x16xf32>
    %150 = arith.subf %135, %149 : vector<8x16xf32>
    %cst_77 = arith.constant 9.99999974E-6 : f32
    %151 = vector.broadcast %cst_77 : f32 to vector<8x1xf32>
    %152 = arith.addf %148, %151 : vector<8x1xf32>
    %153 = math.rsqrt %152 : vector<8x1xf32>
    %154 = vector.broadcast %153 : vector<8x1xf32> to vector<8x16xf32>
    %155 = arith.mulf %150, %154 : vector<8x16xf32>
    %156 = arith.truncf %155 : vector<8x16xf32> to vector<8x16xbf16>
    %c2_78 = arith.constant 2 : index
    %c0_79 = arith.constant 0 : index
    %c0_80 = arith.constant 0 : index
    %157 = vector.load %arg3[%c2_78, %c0_79, %c0_80] : memref<3x16x32xbf16, #tpu.memory_space<vmem>>, vector<1x16x32xbf16>
    %158 = vector.shape_cast %157 : vector<1x16x32xbf16> to vector<16x32xbf16>
    %cst_81 = arith.constant dense<0.000000e+00> : vector<8x32xf32>
    %159 = tpu.matmul %156, %158, %cst_81 {dimension_numbers = #tpu.dot_dimension_numbers<[1], [0], [0], [1], [0, 0, 1, 1], [], []>} : vector<8x16xbf16>, vector<16x32xbf16>, vector<8x32xf32> -> vector<8x32xf32>
    %c2_82 = arith.constant 2 : index
    %c0_83 = arith.constant 0 : index
    %c0_84 = arith.constant 0 : index
    %160 = vector.load %arg4[%c2_82, %c0_83, %c0_84] : memref<3x1x32xf32, #tpu.memory_space<vmem>>, vector<1x1x32xf32>
    %161 = vector.shape_cast %160 : vector<1x1x32xf32> to vector<1x32xf32>
    %162 = vector.broadcast %161 : vector<1x32xf32> to vector<8x32xf32>
    %163 = arith.addf %159, %162 : vector<8x32xf32>
    %cst_85 = arith.constant 0.000000e+00 : f32
    %164 = vector.broadcast %cst_85 : f32 to vector<8x32xf32>
    %165 = arith.cmpf oge, %163, %164 : vector<8x32xf32>
    %cst_86 = arith.constant 0.00999999977 : f32
    %166 = vector.broadcast %cst_86 : f32 to vector<8x32xf32>
    %167 = arith.mulf %166, %163 : vector<8x32xf32>
    %168 = arith.select %165, %163, %167 : vector<8x32xi1>, vector<8x32xf32>
    %cst_87 = arith.constant dense<0.000000e+00> : vector<8xf32>
    %169 = vector.multi_reduction <add>, %137, %cst_87 [1] : vector<8x24xf32> to vector<8xf32>
    %170 = vector.shape_cast %169 : vector<8xf32> to vector<8x1xf32>
    %cst_88 = arith.constant 2.400000e+01 : f32
    %171 = vector.broadcast %cst_88 : f32 to vector<8x1xf32>
    %172 = arith.divf %170, %171 : vector<8x1xf32>
    %173 = vector.broadcast %172 : vector<8x1xf32> to vector<8x24xf32>
    %174 = arith.subf %137, %173 : vector<8x24xf32>
    %175 = arith.mulf %174, %174 : vector<8x24xf32>
    %cst_89 = arith.constant dense<0.000000e+00> : vector<8xf32>
    %176 = vector.multi_reduction <add>, %175, %cst_89 [1] : vector<8x24xf32> to vector<8xf32>
    %177 = vector.shape_cast %176 : vector<8xf32> to vector<8x1xf32>
    %cst_90 = arith.constant 2.400000e+01 : f32
    %178 = vector.broadcast %cst_90 : f32 to vector<8x1xf32>
    %179 = arith.divf %177, %178 : vector<8x1xf32>
    %180 = vector.broadcast %172 : vector<8x1xf32> to vector<8x24xf32>
    %181 = arith.subf %137, %180 : vector<8x24xf32>
    %cst_91 = arith.constant 9.99999974E-6 : f32
    %182 = vector.broadcast %cst_91 : f32 to vector<8x1xf32>
    %183 = arith.addf %179, %182 : vector<8x1xf32>
    %184 = math.rsqrt %183 : vector<8x1xf32>
    %185 = vector.broadcast %184 : vector<8x1xf32> to vector<8x24xf32>
    %186 = arith.mulf %181, %185 : vector<8x24xf32>
    %187 = arith.truncf %186 : vector<8x24xf32> to vector<8x24xbf16>
    %c2_92 = arith.constant 2 : index
    %c0_93 = arith.constant 0 : index
    %c0_94 = arith.constant 0 : index
    %188 = vector.load %arg5[%c2_92, %c0_93, %c0_94] : memref<3x24x32xbf16, #tpu.memory_space<vmem>>, vector<1x24x32xbf16>
    %189 = vector.shape_cast %188 : vector<1x24x32xbf16> to vector<24x32xbf16>
    %cst_95 = arith.constant dense<0.000000e+00> : vector<8x32xf32>
    %190 = tpu.matmul %187, %189, %cst_95 {dimension_numbers = #tpu.dot_dimension_numbers<[1], [0], [0], [1], [0, 0, 1, 1], [], []>} : vector<8x24xbf16>, vector<24x32xbf16>, vector<8x32xf32> -> vector<8x32xf32>
    %c2_96 = arith.constant 2 : index
    %c0_97 = arith.constant 0 : index
    %c0_98 = arith.constant 0 : index
    %191 = vector.load %arg6[%c2_96, %c0_97, %c0_98] : memref<3x1x32xf32, #tpu.memory_space<vmem>>, vector<1x1x32xf32>
    %192 = vector.shape_cast %191 : vector<1x1x32xf32> to vector<1x32xf32>
    %193 = vector.broadcast %192 : vector<1x32xf32> to vector<8x32xf32>
    %194 = arith.addf %190, %193 : vector<8x32xf32>
    %cst_99 = arith.constant 0.000000e+00 : f32
    %195 = vector.broadcast %cst_99 : f32 to vector<8x32xf32>
    %196 = arith.cmpf oge, %194, %195 : vector<8x32xf32>
    %cst_100 = arith.constant 0.00999999977 : f32
    %197 = vector.broadcast %cst_100 : f32 to vector<8x32xf32>
    %198 = arith.mulf %197, %194 : vector<8x32xf32>
    %199 = arith.select %196, %194, %198 : vector<8x32xi1>, vector<8x32xf32>
    %c16 = arith.constant 16 : index
    %c0_101 = arith.constant 0 : index
    %200 = vector.load %arg15[%c16, %c0_101] : memref<24x32xf32, #tpu.memory_space<vmem>>, vector<8x32xf32>
    tpu.vector_store %arg15[%c16, %c0_101], %199 {strides = array<i32>} : memref<24x32xf32, #tpu.memory_space<vmem>>, vector<8x32xf32>,
    %c0_102 = arith.constant 0 : index
    %c0_103 = arith.constant 0 : index
    %201 = vector.load %arg15[%c0_102, %c0_103] : memref<24x32xf32, #tpu.memory_space<vmem>>, vector<24x32xf32>
    %202 = arith.truncf %201 : vector<24x32xf32> to vector<24x32xbf16>
    %c0_104 = arith.constant 0 : index
    %c0_105 = arith.constant 0 : index
    %203 = vector.load %arg7[%c0_104, %c0_105] : memref<32x96xbf16, #tpu.memory_space<vmem>>, vector<32x96xbf16>
    %cst_106 = arith.constant dense<0.000000e+00> : vector<24x96xf32>
    %204 = tpu.matmul %202, %203, %cst_106 {dimension_numbers = #tpu.dot_dimension_numbers<[1], [0], [0], [1], [0, 0, 1, 1], [], []>} : vector<24x32xbf16>, vector<32x96xbf16>, vector<24x96xf32> -> vector<24x96xf32>
    %c0_107 = arith.constant 0 : index
    %c0_108 = arith.constant 0 : index
    %205 = vector.load %arg8[%c0_107, %c0_108] : memref<1x96xf32, #tpu.memory_space<vmem>>, vector<1x96xf32>
    %206 = vector.broadcast %205 : vector<1x96xf32> to vector<24x96xf32>
    %207 = arith.addf %204, %206 : vector<24x96xf32>
    %208 = vector.extract_strided_slice %207 {offsets = [0, 0], sizes = [24, 32], strides = [1, 1]} : vector<24x96xf32> to vector<24x32xf32>
    %209 = vector.extract_strided_slice %207 {offsets = [0, 32], sizes = [24, 32], strides = [1, 1]} : vector<24x96xf32> to vector<24x32xf32>
    %210 = vector.extract_strided_slice %207 {offsets = [0, 64], sizes = [24, 32], strides = [1, 1]} : vector<24x96xf32> to vector<24x32xf32>
    %cst_109 = arith.constant 0.000000e+00 : f32
    %211 = vector.broadcast %cst_109 : f32 to vector<24x32xf32>
    %212 = arith.cmpf oge, %210, %211 : vector<24x32xf32>
    %cst_110 = arith.constant 0.00999999977 : f32
    %213 = vector.broadcast %cst_110 : f32 to vector<24x32xf32>
    %214 = arith.mulf %213, %210 : vector<24x32xf32>
    %215 = arith.select %212, %210, %214 : vector<24x32xi1>, vector<24x32xf32>
    %216 = vector.extract_strided_slice %215 {offsets = [0, 0], sizes = [8, 32], strides = [1, 1]} : vector<24x32xf32> to vector<8x32xf32>
    %217 = vector.extract_strided_slice %208 {offsets = [8, 0], sizes = [8, 32], strides = [1, 1]} : vector<24x32xf32> to vector<8x32xf32>
    %218 = arith.mulf %216, %217 : vector<8x32xf32>
    %cst_111 = arith.constant dense<0.000000e+00> : vector<8xf32>
    %219 = vector.multi_reduction <add>, %218, %cst_111 [1] : vector<8x32xf32> to vector<8xf32>
    %220 = vector.shape_cast %219 : vector<8xf32> to vector<8x1xf32>
    %221 = vector.extract_strided_slice %209 {offsets = [8, 0], sizes = [8, 32], strides = [1, 1]} : vector<24x32xf32> to vector<8x32xf32>
    %222 = vector.extract_strided_slice %208 {offsets = [16, 0], sizes = [8, 32], strides = [1, 1]} : vector<24x32xf32> to vector<8x32xf32>
    %223 = arith.mulf %216, %222 : vector<8x32xf32>
    %cst_112 = arith.constant dense<0.000000e+00> : vector<8xf32>
    %224 = vector.multi_reduction <add>, %223, %cst_112 [1] : vector<8x32xf32> to vector<8xf32>
    %225 = vector.shape_cast %224 : vector<8xf32> to vector<8x1xf32>
    %226 = vector.extract_strided_slice %209 {offsets = [16, 0], sizes = [8, 32], strides = [1, 1]} : vector<24x32xf32> to vector<8x32xf32>
    %227 = tpu.concatenate %220, %225 in 1 : vector<8x1xf32>, vector<8x1xf32> -> vector<8x2xf32>
    %cst_113 = arith.constant dense<0xFF800000> : vector<8xf32>
    %228 = vector.multi_reduction <maximumf>, %227, %cst_113 [1] : vector<8x2xf32> to vector<8xf32>
    %229 = vector.shape_cast %228 : vector<8xf32> to vector<8x1xf32>
    %230 = vector.broadcast %229 : vector<8x1xf32> to vector<8x2xf32>
    %231 = arith.subf %227, %230 : vector<8x2xf32>
    %232 = math.exp %231 : vector<8x2xf32>
    %cst_114 = arith.constant dense<0.000000e+00> : vector<8xf32>
    %233 = vector.multi_reduction <add>, %232, %cst_114 [1] : vector<8x2xf32> to vector<8xf32>
    %234 = vector.shape_cast %233 : vector<8xf32> to vector<8x1xf32>
    %235 = tpu.reciprocal %234 {approx = true} : vector<8x1xf32> -> vector<8x1xf32>
    %236 = vector.broadcast %235 : vector<8x1xf32> to vector<8x2xf32>
    %237 = arith.mulf %232, %236 : vector<8x2xf32>
    %238 = vector.extract_strided_slice %237 {offsets = [0, 0], sizes = [8, 1], strides = [1, 1]} : vector<8x2xf32> to vector<8x1xf32>
    %239 = vector.broadcast %238 : vector<8x1xf32> to vector<8x32xf32>
    %240 = arith.mulf %239, %221 : vector<8x32xf32>
    %241 = vector.extract_strided_slice %237 {offsets = [0, 1], sizes = [8, 1], strides = [1, 1]} : vector<8x2xf32> to vector<8x1xf32>
    %242 = vector.broadcast %241 : vector<8x1xf32> to vector<8x32xf32>
    %243 = arith.mulf %242, %226 : vector<8x32xf32>
    %244 = arith.addf %240, %243 : vector<8x32xf32>
    %cst_115 = arith.constant dense<0.000000e+00> : vector<8xf32>
    %245 = vector.multi_reduction <add>, %34, %cst_115 [1] : vector<8x32xf32> to vector<8xf32>
    %246 = vector.shape_cast %245 : vector<8xf32> to vector<8x1xf32>
    %cst_116 = arith.constant dense<0.000000e+00> : vector<8xf32>
    %247 = vector.multi_reduction <add>, %244, %cst_116 [1] : vector<8x32xf32> to vector<8xf32>
    %248 = vector.shape_cast %247 : vector<8xf32> to vector<8x1xf32>
    %249 = arith.addf %246, %248 : vector<8x1xf32>
    %cst_117 = arith.constant 1.562500e-02 : f32
    %250 = vector.broadcast %cst_117 : f32 to vector<8x1xf32>
    %251 = arith.mulf %249, %250 : vector<8x1xf32>
    %252 = vector.broadcast %251 : vector<8x1xf32> to vector<8x32xf32>
    %253 = arith.subf %34, %252 : vector<8x32xf32>
    %254 = vector.broadcast %251 : vector<8x1xf32> to vector<8x32xf32>
    %255 = arith.subf %244, %254 : vector<8x32xf32>
    %256 = arith.mulf %253, %253 : vector<8x32xf32>
    %cst_118 = arith.constant dense<0.000000e+00> : vector<8xf32>
    %257 = vector.multi_reduction <add>, %256, %cst_118 [1] : vector<8x32xf32> to vector<8xf32>
    %258 = vector.shape_cast %257 : vector<8xf32> to vector<8x1xf32>
    %259 = arith.mulf %255, %255 : vector<8x32xf32>
    %cst_119 = arith.constant dense<0.000000e+00> : vector<8xf32>
    %260 = vector.multi_reduction <add>, %259, %cst_119 [1] : vector<8x32xf32> to vector<8xf32>
    %261 = vector.shape_cast %260 : vector<8xf32> to vector<8x1xf32>
    %262 = arith.addf %258, %261 : vector<8x1xf32>
    %cst_120 = arith.constant 1.562500e-02 : f32
    %263 = vector.broadcast %cst_120 : f32 to vector<8x1xf32>
    %264 = arith.mulf %262, %263 : vector<8x1xf32>
    %cst_121 = arith.constant 9.99999974E-6 : f32
    %265 = vector.broadcast %cst_121 : f32 to vector<8x1xf32>
    %266 = arith.addf %264, %265 : vector<8x1xf32>
    %267 = math.rsqrt %266 : vector<8x1xf32>
    %268 = vector.broadcast %267 : vector<8x1xf32> to vector<8x32xf32>
    %269 = arith.mulf %253, %268 : vector<8x32xf32>
    %270 = arith.truncf %269 : vector<8x32xf32> to vector<8x32xbf16>
    %c0_122 = arith.constant 0 : index
    %c0_123 = arith.constant 0 : index
    %c0_124 = arith.constant 0 : index
    %271 = vector.load %arg9[%c0_122, %c0_123, %c0_124] : memref<3x32x32xbf16, #tpu.memory_space<vmem>>, vector<1x32x32xbf16>
    %272 = vector.shape_cast %271 : vector<1x32x32xbf16> to vector<32x32xbf16>
    %cst_125 = arith.constant dense<0.000000e+00> : vector<8x32xf32>
    %273 = tpu.matmul %270, %272, %cst_125 {dimension_numbers = #tpu.dot_dimension_numbers<[1], [0], [0], [1], [0, 0, 1, 1], [], []>} : vector<8x32xbf16>, vector<32x32xbf16>, vector<8x32xf32> -> vector<8x32xf32>
    %274 = vector.broadcast %267 : vector<8x1xf32> to vector<8x32xf32>
    %275 = arith.mulf %255, %274 : vector<8x32xf32>
    %276 = arith.truncf %275 : vector<8x32xf32> to vector<8x32xbf16>
    %c0_126 = arith.constant 0 : index
    %c0_127 = arith.constant 0 : index
    %c0_128 = arith.constant 0 : index
    %277 = vector.load %arg10[%c0_126, %c0_127, %c0_128] : memref<3x32x32xbf16, #tpu.memory_space<vmem>>, vector<1x32x32xbf16>
    %278 = vector.shape_cast %277 : vector<1x32x32xbf16> to vector<32x32xbf16>
    %cst_129 = arith.constant dense<0.000000e+00> : vector<8x32xf32>
    %279 = tpu.matmul %276, %278, %cst_129 {dimension_numbers = #tpu.dot_dimension_numbers<[1], [0], [0], [1], [0, 0, 1, 1], [], []>} : vector<8x32xbf16>, vector<32x32xbf16>, vector<8x32xf32> -> vector<8x32xf32>
    %280 = arith.addf %273, %279 : vector<8x32xf32>
    %c0_130 = arith.constant 0 : index
    %c0_131 = arith.constant 0 : index
    %c0_132 = arith.constant 0 : index
    %281 = vector.load %arg11[%c0_130, %c0_131, %c0_132] : memref<3x1x32xf32, #tpu.memory_space<vmem>>, vector<1x1x32xf32>
    %282 = vector.shape_cast %281 : vector<1x1x32xf32> to vector<1x32xf32>
    %283 = vector.broadcast %282 : vector<1x32xf32> to vector<8x32xf32>
    %284 = arith.addf %280, %283 : vector<8x32xf32>
    %cst_133 = arith.constant 0.000000e+00 : f32
    %285 = vector.broadcast %cst_133 : f32 to vector<8x32xf32>
    %286 = arith.cmpf oge, %284, %285 : vector<8x32xf32>
    %cst_134 = arith.constant 0.00999999977 : f32
    %287 = vector.broadcast %cst_134 : f32 to vector<8x32xf32>
    %288 = arith.mulf %287, %284 : vector<8x32xf32>
    %289 = arith.select %286, %284, %288 : vector<8x32xi1>, vector<8x32xf32>
    %290 = arith.truncf %289 : vector<8x32xf32> to vector<8x32xbf16>
    %c0_135 = arith.constant 0 : index
    %c0_136 = arith.constant 0 : index
    %c0_137 = arith.constant 0 : index
    %291 = vector.load %arg12[%c0_135, %c0_136, %c0_137] : memref<3x32x128xbf16, #tpu.memory_space<vmem>>, vector<1x32x128xbf16>
    %292 = vector.shape_cast %291 : vector<1x32x128xbf16> to vector<32x128xbf16>
    %cst_138 = arith.constant dense<0.000000e+00> : vector<8x128xf32>
    %293 = tpu.matmul %290, %292, %cst_138 {dimension_numbers = #tpu.dot_dimension_numbers<[1], [0], [0], [1], [0, 0, 1, 1], [], []>} : vector<8x32xbf16>, vector<32x128xbf16>, vector<8x128xf32> -> vector<8x128xf32>
    %c0_139 = arith.constant 0 : index
    %c0_140 = arith.constant 0 : index
    %c0_141 = arith.constant 0 : index
    %294 = vector.load %arg13[%c0_139, %c0_140, %c0_141] : memref<3x1x128xf32, #tpu.memory_space<vmem>>, vector<1x1x128xf32>
    %295 = vector.shape_cast %294 : vector<1x1x128xf32> to vector<1x128xf32>
    %296 = vector.broadcast %295 : vector<1x128xf32> to vector<8x128xf32>
    %297 = arith.addf %293, %296 : vector<8x128xf32>
    %c0_142 = arith.constant 0 : index
    %c0_143 = arith.constant 0 : index
    %c0_144 = arith.constant 0 : index
    %298 = vector.load %arg14[%c0_142, %c0_143, %c0_144] : memref<3x8x128xf32, #tpu.memory_space<vmem>>, vector<1x8x128xf32>
    %299 = vector.shape_cast %298 : vector<1x8x128xf32> to vector<8x128xf32>
    %300 = vector.shape_cast %297 : vector<8x128xf32> to vector<1x8x128xf32>
    tpu.vector_store %arg14[%c0_142, %c0_143, %c0_144], %300 {strides = array<i32>} : memref<3x8x128xf32, #tpu.memory_space<vmem>>, vector<1x8x128xf32>,
    %301 = vector.extract_strided_slice %215 {offsets = [8, 0], sizes = [8, 32], strides = [1, 1]} : vector<24x32xf32> to vector<8x32xf32>
    %302 = vector.extract_strided_slice %208 {offsets = [0, 0], sizes = [8, 32], strides = [1, 1]} : vector<24x32xf32> to vector<8x32xf32>
    %303 = arith.mulf %301, %302 : vector<8x32xf32>
    %cst_145 = arith.constant dense<0.000000e+00> : vector<8xf32>
    %304 = vector.multi_reduction <add>, %303, %cst_145 [1] : vector<8x32xf32> to vector<8xf32>
    %305 = vector.shape_cast %304 : vector<8xf32> to vector<8x1xf32>
    %306 = vector.extract_strided_slice %209 {offsets = [0, 0], sizes = [8, 32], strides = [1, 1]} : vector<24x32xf32> to vector<8x32xf32>
    %307 = vector.extract_strided_slice %208 {offsets = [16, 0], sizes = [8, 32], strides = [1, 1]} : vector<24x32xf32> to vector<8x32xf32>
    %308 = arith.mulf %301, %307 : vector<8x32xf32>
    %cst_146 = arith.constant dense<0.000000e+00> : vector<8xf32>
    %309 = vector.multi_reduction <add>, %308, %cst_146 [1] : vector<8x32xf32> to vector<8xf32>
    %310 = vector.shape_cast %309 : vector<8xf32> to vector<8x1xf32>
    %311 = vector.extract_strided_slice %209 {offsets = [16, 0], sizes = [8, 32], strides = [1, 1]} : vector<24x32xf32> to vector<8x32xf32>
    %312 = tpu.concatenate %305, %310 in 1 : vector<8x1xf32>, vector<8x1xf32> -> vector<8x2xf32>
    %cst_147 = arith.constant dense<0xFF800000> : vector<8xf32>
    %313 = vector.multi_reduction <maximumf>, %312, %cst_147 [1] : vector<8x2xf32> to vector<8xf32>
    %314 = vector.shape_cast %313 : vector<8xf32> to vector<8x1xf32>
    %315 = vector.broadcast %314 : vector<8x1xf32> to vector<8x2xf32>
    %316 = arith.subf %312, %315 : vector<8x2xf32>
    %317 = math.exp %316 : vector<8x2xf32>
    %cst_148 = arith.constant dense<0.000000e+00> : vector<8xf32>
    %318 = vector.multi_reduction <add>, %317, %cst_148 [1] : vector<8x2xf32> to vector<8xf32>
    %319 = vector.shape_cast %318 : vector<8xf32> to vector<8x1xf32>
    %320 = tpu.reciprocal %319 {approx = true} : vector<8x1xf32> -> vector<8x1xf32>
    %321 = vector.broadcast %320 : vector<8x1xf32> to vector<8x2xf32>
    %322 = arith.mulf %317, %321 : vector<8x2xf32>
    %323 = vector.extract_strided_slice %322 {offsets = [0, 0], sizes = [8, 1], strides = [1, 1]} : vector<8x2xf32> to vector<8x1xf32>
    %324 = vector.broadcast %323 : vector<8x1xf32> to vector<8x32xf32>
    %325 = arith.mulf %324, %306 : vector<8x32xf32>
    %326 = vector.extract_strided_slice %322 {offsets = [0, 1], sizes = [8, 1], strides = [1, 1]} : vector<8x2xf32> to vector<8x1xf32>
    %327 = vector.broadcast %326 : vector<8x1xf32> to vector<8x32xf32>
    %328 = arith.mulf %327, %311 : vector<8x32xf32>
    %329 = arith.addf %325, %328 : vector<8x32xf32>
    %cst_149 = arith.constant dense<0.000000e+00> : vector<8xf32>
    %330 = vector.multi_reduction <add>, %101, %cst_149 [1] : vector<8x32xf32> to vector<8xf32>
    %331 = vector.shape_cast %330 : vector<8xf32> to vector<8x1xf32>
    %cst_150 = arith.constant dense<0.000000e+00> : vector<8xf32>
    %332 = vector.multi_reduction <add>, %329, %cst_150 [1] : vector<8x32xf32> to vector<8xf32>
    %333 = vector.shape_cast %332 : vector<8xf32> to vector<8x1xf32>
    %334 = arith.addf %331, %333 : vector<8x1xf32>
    %cst_151 = arith.constant 1.562500e-02 : f32
    %335 = vector.broadcast %cst_151 : f32 to vector<8x1xf32>
    %336 = arith.mulf %334, %335 : vector<8x1xf32>
    %337 = vector.broadcast %336 : vector<8x1xf32> to vector<8x32xf32>
    %338 = arith.subf %101, %337 : vector<8x32xf32>
    %339 = vector.broadcast %336 : vector<8x1xf32> to vector<8x32xf32>
    %340 = arith.subf %329, %339 : vector<8x32xf32>
    %341 = arith.mulf %338, %338 : vector<8x32xf32>
    %cst_152 = arith.constant dense<0.000000e+00> : vector<8xf32>
    %342 = vector.multi_reduction <add>, %341, %cst_152 [1] : vector<8x32xf32> to vector<8xf32>
    %343 = vector.shape_cast %342 : vector<8xf32> to vector<8x1xf32>
    %344 = arith.mulf %340, %340 : vector<8x32xf32>
    %cst_153 = arith.constant dense<0.000000e+00> : vector<8xf32>
    %345 = vector.multi_reduction <add>, %344, %cst_153 [1] : vector<8x32xf32> to vector<8xf32>
    %346 = vector.shape_cast %345 : vector<8xf32> to vector<8x1xf32>
    %347 = arith.addf %343, %346 : vector<8x1xf32>
    %cst_154 = arith.constant 1.562500e-02 : f32
    %348 = vector.broadcast %cst_154 : f32 to vector<8x1xf32>
    %349 = arith.mulf %347, %348 : vector<8x1xf32>
    %cst_155 = arith.constant 9.99999974E-6 : f32
    %350 = vector.broadcast %cst_155 : f32 to vector<8x1xf32>
    %351 = arith.addf %349, %350 : vector<8x1xf32>
    %352 = math.rsqrt %351 : vector<8x1xf32>
    %353 = vector.broadcast %352 : vector<8x1xf32> to vector<8x32xf32>
    %354 = arith.mulf %338, %353 : vector<8x32xf32>
    %355 = arith.truncf %354 : vector<8x32xf32> to vector<8x32xbf16>
    %c1_156 = arith.constant 1 : index
    %c0_157 = arith.constant 0 : index
    %c0_158 = arith.constant 0 : index
    %356 = vector.load %arg9[%c1_156, %c0_157, %c0_158] : memref<3x32x32xbf16, #tpu.memory_space<vmem>>, vector<1x32x32xbf16>
    %357 = vector.shape_cast %356 : vector<1x32x32xbf16> to vector<32x32xbf16>
    %cst_159 = arith.constant dense<0.000000e+00> : vector<8x32xf32>
    %358 = tpu.matmul %355, %357, %cst_159 {dimension_numbers = #tpu.dot_dimension_numbers<[1], [0], [0], [1], [0, 0, 1, 1], [], []>} : vector<8x32xbf16>, vector<32x32xbf16>, vector<8x32xf32> -> vector<8x32xf32>
    %359 = vector.broadcast %352 : vector<8x1xf32> to vector<8x32xf32>
    %360 = arith.mulf %340, %359 : vector<8x32xf32>
    %361 = arith.truncf %360 : vector<8x32xf32> to vector<8x32xbf16>
    %c1_160 = arith.constant 1 : index
    %c0_161 = arith.constant 0 : index
    %c0_162 = arith.constant 0 : index
    %362 = vector.load %arg10[%c1_160, %c0_161, %c0_162] : memref<3x32x32xbf16, #tpu.memory_space<vmem>>, vector<1x32x32xbf16>
    %363 = vector.shape_cast %362 : vector<1x32x32xbf16> to vector<32x32xbf16>
    %cst_163 = arith.constant dense<0.000000e+00> : vector<8x32xf32>
    %364 = tpu.matmul %361, %363, %cst_163 {dimension_numbers = #tpu.dot_dimension_numbers<[1], [0], [0], [1], [0, 0, 1, 1], [], []>} : vector<8x32xbf16>, vector<32x32xbf16>, vector<8x32xf32> -> vector<8x32xf32>
    %365 = arith.addf %358, %364 : vector<8x32xf32>
    %c1_164 = arith.constant 1 : index
    %c0_165 = arith.constant 0 : index
    %c0_166 = arith.constant 0 : index
    %366 = vector.load %arg11[%c1_164, %c0_165, %c0_166] : memref<3x1x32xf32, #tpu.memory_space<vmem>>, vector<1x1x32xf32>
    %367 = vector.shape_cast %366 : vector<1x1x32xf32> to vector<1x32xf32>
    %368 = vector.broadcast %367 : vector<1x32xf32> to vector<8x32xf32>
    %369 = arith.addf %365, %368 : vector<8x32xf32>
    %cst_167 = arith.constant 0.000000e+00 : f32
    %370 = vector.broadcast %cst_167 : f32 to vector<8x32xf32>
    %371 = arith.cmpf oge, %369, %370 : vector<8x32xf32>
    %cst_168 = arith.constant 0.00999999977 : f32
    %372 = vector.broadcast %cst_168 : f32 to vector<8x32xf32>
    %373 = arith.mulf %372, %369 : vector<8x32xf32>
    %374 = arith.select %371, %369, %373 : vector<8x32xi1>, vector<8x32xf32>
    %375 = arith.truncf %374 : vector<8x32xf32> to vector<8x32xbf16>
    %c1_169 = arith.constant 1 : index
    %c0_170 = arith.constant 0 : index
    %c0_171 = arith.constant 0 : index
    %376 = vector.load %arg12[%c1_169, %c0_170, %c0_171] : memref<3x32x128xbf16, #tpu.memory_space<vmem>>, vector<1x32x128xbf16>
    %377 = vector.shape_cast %376 : vector<1x32x128xbf16> to vector<32x128xbf16>
    %cst_172 = arith.constant dense<0.000000e+00> : vector<8x128xf32>
    %378 = tpu.matmul %375, %377, %cst_172 {dimension_numbers = #tpu.dot_dimension_numbers<[1], [0], [0], [1], [0, 0, 1, 1], [], []>} : vector<8x32xbf16>, vector<32x128xbf16>, vector<8x128xf32> -> vector<8x128xf32>
    %c1_173 = arith.constant 1 : index
    %c0_174 = arith.constant 0 : index
    %c0_175 = arith.constant 0 : index
    %379 = vector.load %arg13[%c1_173, %c0_174, %c0_175] : memref<3x1x128xf32, #tpu.memory_space<vmem>>, vector<1x1x128xf32>
    %380 = vector.shape_cast %379 : vector<1x1x128xf32> to vector<1x128xf32>
    %381 = vector.broadcast %380 : vector<1x128xf32> to vector<8x128xf32>
    %382 = arith.addf %378, %381 : vector<8x128xf32>
    %c1_176 = arith.constant 1 : index
    %c0_177 = arith.constant 0 : index
    %c0_178 = arith.constant 0 : index
    %383 = vector.load %arg14[%c1_176, %c0_177, %c0_178] : memref<3x8x128xf32, #tpu.memory_space<vmem>>, vector<1x8x128xf32>
    %384 = vector.shape_cast %383 : vector<1x8x128xf32> to vector<8x128xf32>
    %385 = vector.shape_cast %382 : vector<8x128xf32> to vector<1x8x128xf32>
    tpu.vector_store %arg14[%c1_176, %c0_177, %c0_178], %385 {strides = array<i32>} : memref<3x8x128xf32, #tpu.memory_space<vmem>>, vector<1x8x128xf32>,
    %386 = vector.extract_strided_slice %215 {offsets = [16, 0], sizes = [8, 32], strides = [1, 1]} : vector<24x32xf32> to vector<8x32xf32>
    %387 = vector.extract_strided_slice %208 {offsets = [0, 0], sizes = [8, 32], strides = [1, 1]} : vector<24x32xf32> to vector<8x32xf32>
    %388 = arith.mulf %386, %387 : vector<8x32xf32>
    %cst_179 = arith.constant dense<0.000000e+00> : vector<8xf32>
    %389 = vector.multi_reduction <add>, %388, %cst_179 [1] : vector<8x32xf32> to vector<8xf32>
    %390 = vector.shape_cast %389 : vector<8xf32> to vector<8x1xf32>
    %391 = vector.extract_strided_slice %209 {offsets = [0, 0], sizes = [8, 32], strides = [1, 1]} : vector<24x32xf32> to vector<8x32xf32>
    %392 = vector.extract_strided_slice %208 {offsets = [8, 0], sizes = [8, 32], strides = [1, 1]} : vector<24x32xf32> to vector<8x32xf32>
    %393 = arith.mulf %386, %392 : vector<8x32xf32>
    %cst_180 = arith.constant dense<0.000000e+00> : vector<8xf32>
    %394 = vector.multi_reduction <add>, %393, %cst_180 [1] : vector<8x32xf32> to vector<8xf32>
    %395 = vector.shape_cast %394 : vector<8xf32> to vector<8x1xf32>
    %396 = vector.extract_strided_slice %209 {offsets = [8, 0], sizes = [8, 32], strides = [1, 1]} : vector<24x32xf32> to vector<8x32xf32>
    %397 = tpu.concatenate %390, %395 in 1 : vector<8x1xf32>, vector<8x1xf32> -> vector<8x2xf32>
    %cst_181 = arith.constant dense<0xFF800000> : vector<8xf32>
    %398 = vector.multi_reduction <maximumf>, %397, %cst_181 [1] : vector<8x2xf32> to vector<8xf32>
    %399 = vector.shape_cast %398 : vector<8xf32> to vector<8x1xf32>
    %400 = vector.broadcast %399 : vector<8x1xf32> to vector<8x2xf32>
    %401 = arith.subf %397, %400 : vector<8x2xf32>
    %402 = math.exp %401 : vector<8x2xf32>
    %cst_182 = arith.constant dense<0.000000e+00> : vector<8xf32>
    %403 = vector.multi_reduction <add>, %402, %cst_182 [1] : vector<8x2xf32> to vector<8xf32>
    %404 = vector.shape_cast %403 : vector<8xf32> to vector<8x1xf32>
    %405 = tpu.reciprocal %404 {approx = true} : vector<8x1xf32> -> vector<8x1xf32>
    %406 = vector.broadcast %405 : vector<8x1xf32> to vector<8x2xf32>
    %407 = arith.mulf %402, %406 : vector<8x2xf32>
    %408 = vector.extract_strided_slice %407 {offsets = [0, 0], sizes = [8, 1], strides = [1, 1]} : vector<8x2xf32> to vector<8x1xf32>
    %409 = vector.broadcast %408 : vector<8x1xf32> to vector<8x32xf32>
    %410 = arith.mulf %409, %391 : vector<8x32xf32>
    %411 = vector.extract_strided_slice %407 {offsets = [0, 1], sizes = [8, 1], strides = [1, 1]} : vector<8x2xf32> to vector<8x1xf32>
    %412 = vector.broadcast %411 : vector<8x1xf32> to vector<8x32xf32>
    %413 = arith.mulf %412, %396 : vector<8x32xf32>
    %414 = arith.addf %410, %413 : vector<8x32xf32>
    %cst_183 = arith.constant dense<0.000000e+00> : vector<8xf32>
    %415 = vector.multi_reduction <add>, %168, %cst_183 [1] : vector<8x32xf32> to vector<8xf32>
    %416 = vector.shape_cast %415 : vector<8xf32> to vector<8x1xf32>
    %cst_184 = arith.constant dense<0.000000e+00> : vector<8xf32>
    %417 = vector.multi_reduction <add>, %414, %cst_184 [1] : vector<8x32xf32> to vector<8xf32>
    %418 = vector.shape_cast %417 : vector<8xf32> to vector<8x1xf32>
    %419 = arith.addf %416, %418 : vector<8x1xf32>
    %cst_185 = arith.constant 1.562500e-02 : f32
    %420 = vector.broadcast %cst_185 : f32 to vector<8x1xf32>
    %421 = arith.mulf %419, %420 : vector<8x1xf32>
    %422 = vector.broadcast %421 : vector<8x1xf32> to vector<8x32xf32>
    %423 = arith.subf %168, %422 : vector<8x32xf32>
    %424 = vector.broadcast %421 : vector<8x1xf32> to vector<8x32xf32>
    %425 = arith.subf %414, %424 : vector<8x32xf32>
    %426 = arith.mulf %423, %423 : vector<8x32xf32>
    %cst_186 = arith.constant dense<0.000000e+00> : vector<8xf32>
    %427 = vector.multi_reduction <add>, %426, %cst_186 [1] : vector<8x32xf32> to vector<8xf32>
    %428 = vector.shape_cast %427 : vector<8xf32> to vector<8x1xf32>
    %429 = arith.mulf %425, %425 : vector<8x32xf32>
    %cst_187 = arith.constant dense<0.000000e+00> : vector<8xf32>
    %430 = vector.multi_reduction <add>, %429, %cst_187 [1] : vector<8x32xf32> to vector<8xf32>
    %431 = vector.shape_cast %430 : vector<8xf32> to vector<8x1xf32>
    %432 = arith.addf %428, %431 : vector<8x1xf32>
    %cst_188 = arith.constant 1.562500e-02 : f32
    %433 = vector.broadcast %cst_188 : f32 to vector<8x1xf32>
    %434 = arith.mulf %432, %433 : vector<8x1xf32>
    %cst_189 = arith.constant 9.99999974E-6 : f32
    %435 = vector.broadcast %cst_189 : f32 to vector<8x1xf32>
    %436 = arith.addf %434, %435 : vector<8x1xf32>
    %437 = math.rsqrt %436 : vector<8x1xf32>
    %438 = vector.broadcast %437 : vector<8x1xf32> to vector<8x32xf32>
    %439 = arith.mulf %423, %438 : vector<8x32xf32>
    %440 = arith.truncf %439 : vector<8x32xf32> to vector<8x32xbf16>
    %c2_190 = arith.constant 2 : index
    %c0_191 = arith.constant 0 : index
    %c0_192 = arith.constant 0 : index
    %441 = vector.load %arg9[%c2_190, %c0_191, %c0_192] : memref<3x32x32xbf16, #tpu.memory_space<vmem>>, vector<1x32x32xbf16>
    %442 = vector.shape_cast %441 : vector<1x32x32xbf16> to vector<32x32xbf16>
    %cst_193 = arith.constant dense<0.000000e+00> : vector<8x32xf32>
    %443 = tpu.matmul %440, %442, %cst_193 {dimension_numbers = #tpu.dot_dimension_numbers<[1], [0], [0], [1], [0, 0, 1, 1], [], []>} : vector<8x32xbf16>, vector<32x32xbf16>, vector<8x32xf32> -> vector<8x32xf32>
    %444 = vector.broadcast %437 : vector<8x1xf32> to vector<8x32xf32>
    %445 = arith.mulf %425, %444 : vector<8x32xf32>
    %446 = arith.truncf %445 : vector<8x32xf32> to vector<8x32xbf16>
    %c2_194 = arith.constant 2 : index
    %c0_195 = arith.constant 0 : index
    %c0_196 = arith.constant 0 : index
    %447 = vector.load %arg10[%c2_194, %c0_195, %c0_196] : memref<3x32x32xbf16, #tpu.memory_space<vmem>>, vector<1x32x32xbf16>
    %448 = vector.shape_cast %447 : vector<1x32x32xbf16> to vector<32x32xbf16>
    %cst_197 = arith.constant dense<0.000000e+00> : vector<8x32xf32>
    %449 = tpu.matmul %446, %448, %cst_197 {dimension_numbers = #tpu.dot_dimension_numbers<[1], [0], [0], [1], [0, 0, 1, 1], [], []>} : vector<8x32xbf16>, vector<32x32xbf16>, vector<8x32xf32> -> vector<8x32xf32>
    %450 = arith.addf %443, %449 : vector<8x32xf32>
    %c2_198 = arith.constant 2 : index
    %c0_199 = arith.constant 0 : index
    %c0_200 = arith.constant 0 : index
    %451 = vector.load %arg11[%c2_198, %c0_199, %c0_200] : memref<3x1x32xf32, #tpu.memory_space<vmem>>, vector<1x1x32xf32>
    %452 = vector.shape_cast %451 : vector<1x1x32xf32> to vector<1x32xf32>
    %453 = vector.broadcast %452 : vector<1x32xf32> to vector<8x32xf32>
    %454 = arith.addf %450, %453 : vector<8x32xf32>
    %cst_201 = arith.constant 0.000000e+00 : f32
    %455 = vector.broadcast %cst_201 : f32 to vector<8x32xf32>
    %456 = arith.cmpf oge, %454, %455 : vector<8x32xf32>
    %cst_202 = arith.constant 0.00999999977 : f32
    %457 = vector.broadcast %cst_202 : f32 to vector<8x32xf32>
    %458 = arith.mulf %457, %454 : vector<8x32xf32>
    %459 = arith.select %456, %454, %458 : vector<8x32xi1>, vector<8x32xf32>
    %460 = arith.truncf %459 : vector<8x32xf32> to vector<8x32xbf16>
    %c2_203 = arith.constant 2 : index
    %c0_204 = arith.constant 0 : index
    %c0_205 = arith.constant 0 : index
    %461 = vector.load %arg12[%c2_203, %c0_204, %c0_205] : memref<3x32x128xbf16, #tpu.memory_space<vmem>>, vector<1x32x128xbf16>
    %462 = vector.shape_cast %461 : vector<1x32x128xbf16> to vector<32x128xbf16>
    %cst_206 = arith.constant dense<0.000000e+00> : vector<8x128xf32>
    %463 = tpu.matmul %460, %462, %cst_206 {dimension_numbers = #tpu.dot_dimension_numbers<[1], [0], [0], [1], [0, 0, 1, 1], [], []>} : vector<8x32xbf16>, vector<32x128xbf16>, vector<8x128xf32> -> vector<8x128xf32>
    %c2_207 = arith.constant 2 : index
    %c0_208 = arith.constant 0 : index
    %c0_209 = arith.constant 0 : index
    %464 = vector.load %arg13[%c2_207, %c0_208, %c0_209] : memref<3x1x128xf32, #tpu.memory_space<vmem>>, vector<1x1x128xf32>
    %465 = vector.shape_cast %464 : vector<1x1x128xf32> to vector<1x128xf32>
    %466 = vector.broadcast %465 : vector<1x128xf32> to vector<8x128xf32>
    %467 = arith.addf %463, %466 : vector<8x128xf32>
    %c2_210 = arith.constant 2 : index
    %c0_211 = arith.constant 0 : index
    %c0_212 = arith.constant 0 : index
    %468 = vector.load %arg14[%c2_210, %c0_211, %c0_212] : memref<3x8x128xf32, #tpu.memory_space<vmem>>, vector<1x8x128xf32>
    %469 = vector.shape_cast %468 : vector<1x8x128xf32> to vector<8x128xf32>
    %470 = vector.shape_cast %467 : vector<8x128xf32> to vector<1x8x128xf32>
    tpu.vector_store %arg14[%c2_210, %c0_211, %c0_212], %470 {strides = array<i32>} : memref<3x8x128xf32, #tpu.memory_space<vmem>>, vector<1x8x128xf32>,
    return
  }
  func.func @transform_0(%arg0: i32) -> (i32, i32, i32) {
    %c0_i32 = arith.constant 0 : i32
    %c0_i32_0 = arith.constant 0 : i32
    %c0_i32_1 = arith.constant 0 : i32
    return %c0_i32, %arg0, %c0_i32_0 : i32, i32, i32
  }
  func.func @transform_1(%arg0: i32) -> (i32, i32, i32) {
    %c0_i32 = arith.constant 0 : i32
    %c0_i32_0 = arith.constant 0 : i32
    %c0_i32_1 = arith.constant 0 : i32
    return %c0_i32, %arg0, %c0_i32_0 : i32, i32, i32
  }
  func.func @transform_2(%arg0: i32) -> (i32, i32, i32) {
    %c0_i32 = arith.constant 0 : i32
    %c0_i32_0 = arith.constant 0 : i32
    %c0_i32_1 = arith.constant 0 : i32
    %c0_i32_2 = arith.constant 0 : i32
    return %c0_i32, %c0_i32_0, %c0_i32_1 : i32, i32, i32
  }
  func.func @transform_3(%arg0: i32) -> (i32, i32, i32) {
    %c0_i32 = arith.constant 0 : i32
    %c0_i32_0 = arith.constant 0 : i32
    %c0_i32_1 = arith.constant 0 : i32
    %c0_i32_2 = arith.constant 0 : i32
    return %c0_i32, %c0_i32_0, %c0_i32_1 : i32, i32, i32
  }
  func.func @transform_4(%arg0: i32) -> (i32, i32, i32) {
    %c0_i32 = arith.constant 0 : i32
    %c0_i32_0 = arith.constant 0 : i32
    %c0_i32_1 = arith.constant 0 : i32
    %c0_i32_2 = arith.constant 0 : i32
    return %c0_i32, %c0_i32_0, %c0_i32_1 : i32, i32, i32
  }
  func.func @transform_5(%arg0: i32) -> (i32, i32, i32) {
    %c0_i32 = arith.constant 0 : i32
    %c0_i32_0 = arith.constant 0 : i32
    %c0_i32_1 = arith.constant 0 : i32
    %c0_i32_2 = arith.constant 0 : i32
    return %c0_i32, %c0_i32_0, %c0_i32_1 : i32, i32, i32
  }
  func.func @transform_6(%arg0: i32) -> (i32, i32) {
    %c0_i32 = arith.constant 0 : i32
    %c0_i32_0 = arith.constant 0 : i32
    %c0_i32_1 = arith.constant 0 : i32
    return %c0_i32, %c0_i32_0 : i32, i32
  }
  func.func @transform_7(%arg0: i32) -> (i32, i32) {
    %c0_i32 = arith.constant 0 : i32
    %c0_i32_0 = arith.constant 0 : i32
    %c0_i32_1 = arith.constant 0 : i32
    return %c0_i32, %c0_i32_0 : i32, i32
  }
  func.func @transform_8(%arg0: i32) -> (i32, i32, i32) {
    %c0_i32 = arith.constant 0 : i32
    %c0_i32_0 = arith.constant 0 : i32
    %c0_i32_1 = arith.constant 0 : i32
    %c0_i32_2 = arith.constant 0 : i32
    return %c0_i32, %c0_i32_0, %c0_i32_1 : i32, i32, i32
  }
  func.func @transform_9(%arg0: i32) -> (i32, i32, i32) {
    %c0_i32 = arith.constant 0 : i32
    %c0_i32_0 = arith.constant 0 : i32
    %c0_i32_1 = arith.constant 0 : i32
    %c0_i32_2 = arith.constant 0 : i32
    return %c0_i32, %c0_i32_0, %c0_i32_1 : i32, i32, i32
  }
  func.func @transform_10(%arg0: i32) -> (i32, i32, i32) {
    %c0_i32 = arith.constant 0 : i32
    %c0_i32_0 = arith.constant 0 : i32
    %c0_i32_1 = arith.constant 0 : i32
    %c0_i32_2 = arith.constant 0 : i32
    return %c0_i32, %c0_i32_0, %c0_i32_1 : i32, i32, i32
  }
  func.func @transform_11(%arg0: i32) -> (i32, i32, i32) {
    %c0_i32 = arith.constant 0 : i32
    %c0_i32_0 = arith.constant 0 : i32
    %c0_i32_1 = arith.constant 0 : i32
    %c0_i32_2 = arith.constant 0 : i32
    return %c0_i32, %c0_i32_0, %c0_i32_1 : i32, i32, i32
  }
  func.func @transform_12(%arg0: i32) -> (i32, i32, i32) {
    %c0_i32 = arith.constant 0 : i32
    %c0_i32_0 = arith.constant 0 : i32
    %c0_i32_1 = arith.constant 0 : i32
    %c0_i32_2 = arith.constant 0 : i32
    return %c0_i32, %c0_i32_0, %c0_i32_1 : i32, i32, i32
  }
  func.func @transform_13(%arg0: i32) -> (i32, i32, i32) {
    %c0_i32 = arith.constant 0 : i32
    %c0_i32_0 = arith.constant 0 : i32
    %c0_i32_1 = arith.constant 0 : i32
    return %c0_i32, %arg0, %c0_i32_0 : i32, i32, i32
  }
}

</mosaic_0001>

<bundles_post_ra>
// kernel: tpu_custom_call.1
= control target key start
LH: loop header
LB: loop body
LE: loop exit
PB: predicated region body
PF: predicated region fallthrough
CT: control target
= control target key end

     0   :  { %18 = vsyncpa [#allocation4], 0  ;;  %s2125_s0 = inlined_call_operand.hbm [shape: f32[3,8,16], index: 0, kind: input, shape index: {}]   ;;  %s2126_s1 = inlined_call_operand.hbm [shape: f32[3,8,24], index: 1, kind: input, shape index: {}]   ;;  %s2127_s2 = inlined_call_operand.hbm [shape: bf16[3,16,32], index: 2, kind: input, shape index: {}]   ;;  %s2128_s3 = inlined_call_operand.hbm [shape: f32[3,1,32], index: 3, kind: input, shape index: {}]   ;;  %s2129_s4 = inlined_call_operand.hbm [shape: bf16[3,24,32], index: 4, kind: input, shape index: {}]   ;;  %s2130_s5 = inlined_call_operand.vmem [shape: f32[3,1,32], index: 5, kind: input, shape index: {}]   ;;  %s2131_s6 = inlined_call_operand.hbm [shape: bf16[32,96], index: 6, kind: input, shape index: {}]   ;;  %s2132_s7 = inlined_call_operand.hbm [shape: f32[1,96], index: 7, kind: input, shape index: {}]   ;;  %s2133_s8 = inlined_call_operand.hbm [shape: bf16[3,32,32], index: 8, kind: input, shape index: {}]   ;;  %s2134_s9 = inlined_call_operand.hbm [shape: bf16[3,32,32], index: 9, kind: input, shape index: {}]   ;;  %s2135_s10 = inlined_call_operand.vmem [shape: f32[3,1,32], index: 10, kind: input, shape index: {}]   ;;  %s2136_s11 = inlined_call_operand.hbm [shape: bf16[3,32,128], index: 11, kind: input, shape index: {}]   ;;  %s2137_s12 = inlined_call_operand.vmem [shape: f32[3,1,128], index: 12, kind: input, shape index: {}]   ;;  %s2138_s13 = inlined_call_operand.hbm [shape: f32[3,8,128], index: 13, kind: output, shape index: {}]  }
   0x1   :  { %19 = vsyncpa [#allocation7], 0 }
   0x2   :  { %20 = vsyncpa [#allocation10], 0 }
   0x3   :  { %21 = vsyncpa [#allocation13], 0 }
   0x4   :  { %22 = vsyncpa [#allocation16], 0 }
   0x5   :  { %23 = vsyncpa [#allocation19], 0 }
   0x6   :  { %24 = vsyncpa [#allocation5], 0  ;;  %s42_s27 = sshll.u32 %s2126_s1, 4  ;;  %s1784_s28 = smov [#allocation6]   ;;  %s43_s27 = int_to_ptr.hbm [resolvable:$true] %s42_s27 }
   0x7   :  { %s44_s29 = sshll.u32 %s1784_s28, 4  ;;  %s68_s15 = sshll.u32 %s2128_s3, 4  ;;  %s45_s29 = int_to_ptr.vmem [resolvable:$true] %s44_s29  ;;  %s69_s15 = int_to_ptr.hbm [resolvable:$true] %s68_s15 }
   0x8   :  { %s1785_s16 = smov 128   ;;  %s1786_s17 = smov 8  }
   0x9   :  { %50 = dma.hbm_to_vmem [thread:$0]  %s43_s27, 384, %s45_s29, [#allocation7], %s1785_s16, %s1785_s16, %s1786_s17  }
   0xa   :  { %s1787_s18 = smov [#allocation9]   ;;  %s1788_s20 = smov 16  }
   0xb   :  { %s70_s19 = sshll.u32 %s1787_s18, 4  ;;  %s1789_s1 = smov 1   ;;  %s71_s19 = int_to_ptr.vmem [resolvable:$true] %s70_s19 }
   0xc   :  { %76 = dma.hbm_to_vmem [thread:$0]  %s69_s15, 48, %s71_s19, [#allocation10], %s1788_s20, %s1788_s20, %s1789_s1  }
   0xd   :  { %s96_s23 = sshll.u32 %s2131_s6, 4  ;;  %s1790_s24 = smov [#allocation12]   ;;  %s97_s23 = int_to_ptr.hbm [resolvable:$true] %s96_s23 }
   0xe   :  { %s98_s3 = sshll.u32 %s1790_s24, 4  ;;  %s120_s28 = sshll.u32 %s2133_s8, 4  ;;  %s99_s3 = int_to_ptr.vmem [resolvable:$true] %s98_s3  ;;  %s121_s28 = int_to_ptr.hbm [resolvable:$true] %s120_s28 }
   0xf   :  { %s1791_s27 = smov 64   ;;  %s1792_s29 = smov 4  }
  0x10   :  { %104 = dma.hbm_to_vmem [thread:$0]  %s97_s23, 256, %s99_s3, [#allocation13], %s1791_s27, %s1791_s27, %s1792_s29  }
  0x11   :  { %s1793_s30 = smov [#allocation15]   ;;  %s29_s6 = sshll.u32 %s2125_s0, 4  ;;  %s30_s6 = int_to_ptr.hbm [resolvable:$true] %s29_s6 }
  0x12   :  { %s122_s14 = sshll.u32 %s1793_s30, 4  ;;  %s55_s20 = sshll.u32 %s2127_s2, 4  ;;  %s123_s14 = int_to_ptr.vmem [resolvable:$true] %s122_s14  ;;  %s56_s20 = int_to_ptr.hbm [resolvable:$true] %s55_s20 }
  0x13   :  { %128 = dma.hbm_to_vmem [thread:$0]  %s121_s28, 768, %s123_s14, [#allocation16], %s1791_s27, %s1791_s27, %s1792_s29  }
  0x14   :  { %s1794_s1 = smov [#allocation3]   ;;  %s1795_s22 = smov [#allocation8]  }
  0x15   :  { %s31_s21 = sshll.u32 %s1794_s1, 4  ;;  %s57_s0 = sshll.u32 %s1795_s22, 4  ;;  %s32_s21 = int_to_ptr.vmem [resolvable:$true] %s31_s21  ;;  %s58_s0 = int_to_ptr.vmem [resolvable:$true] %s57_s0 }
  0x16   :  { %37 = dma.hbm_to_vmem [thread:$0]  %s30_s6, 384, %s32_s21, [#allocation4], %s1785_s16, %s1785_s16, %s1786_s17  }
  0x17   :  { %s81_s3 = sshll.u32 %s2129_s4, 4  ;;  %s110_s26 = sshll.u32 %s2132_s7, 4  ;;  %s82_s3 = int_to_ptr.hbm [resolvable:$true] %s81_s3  ;;  %s111_s26 = int_to_ptr.hbm [resolvable:$true] %s110_s26 }
  0x18   :  { %63 = dma.hbm_to_vmem [thread:$0]  %s56_s20, 384, %s58_s0, [#allocation7], %s1791_s27, %s1791_s27, %s1792_s29  }
  0x19   :  { %s1796_s28 = smov [#allocation11]   ;;  %s1797_s14 = smov [#allocation14]  }
  0x1a   :  { %s83_s30 = sshll.u32 %s1796_s28, 4  ;;  %s112_s4 = sshll.u32 %s1797_s14, 4  ;;  %s84_s30 = int_to_ptr.vmem [resolvable:$true] %s83_s30  ;;  %s113_s4 = int_to_ptr.vmem [resolvable:$true] %s112_s4 }
  0x1b   :  { %89 = dma.hbm_to_vmem [thread:$0]  %s82_s3, 576, %s84_s30, [#allocation10], %s1791_s27, %s1791_s27, %s1792_s29  }
  0x1c   :  { %s133_s6 = sshll.u32 %s2134_s9, 4  ;;  %s148_s7 = sshll.u32 %s2136_s11, 4  ;;  %s134_s6 = int_to_ptr.hbm [resolvable:$true] %s133_s6  ;;  %s149_s7 = int_to_ptr.hbm [resolvable:$true] %s148_s7 }
  0x1d   :  { %115 = dma.hbm_to_vmem [thread:$0]  %s111_s26, 16, %s113_s4, [#allocation13]  }
  0x1e   :  { %s1798_s20 = smov [#allocation17]   ;;  %s1799_s21 = smov [#allocation18]  }
  0x1f   :  { %s135_s1 = sshll.u32 %s1798_s20, 4  ;;  %s150_s22 = sshll.u32 %s1799_s21, 4  ;;  %s136_s1 = int_to_ptr.vmem [resolvable:$true] %s135_s1  ;;  %s151_s22 = int_to_ptr.vmem [resolvable:$true] %s150_s22 }
  0x20   :  { %141 = dma.hbm_to_vmem [thread:$0]  %s134_s6, 768, %s136_s1, [#allocation16], %s1791_s27, %s1791_s27, %s1792_s29  }
  0x21   :  { %156 = dma.hbm_to_vmem [thread:$0]  %s149_s7, 768, %s151_s22, [#allocation19], %s1791_s27, %s1791_s27, %s1792_s29  }
  0x22   :  { %1770 = dma.done.wait [#allocation4], 384  }
  0x23   :  { %1771 = vsyncadd [#allocation4], 4294966912 }
  0x24   :  { %1772 = dma.done.wait [#allocation7], 768  }
  0x25   :  { %1773 = vsyncadd [#allocation7], 4294966528 }
  0x26   :  { %1774 = dma.done.wait [#allocation10], 624  }
  0x27   :  { %1775 = vsyncadd [#allocation10], 4294966672 }
  0x28   :  { %1776 = dma.done.wait [#allocation13], 272  }
  0x29   :  { %1777 = vsyncadd [#allocation13], 4294967024 }
  0x2a   :  { %1778 = dma.done.wait [#allocation16], 1536  }
  0x2b   :  { %1779 = vsyncadd [#allocation16], 4294965760 }
  0x2c   :  { %1780 = dma.done.wait [#allocation19], 768  }
  0x2d   :  { %1781 = vsyncadd [#allocation19], 4294966528  ;;  %vm202_vm0 = vcmask 130048   ;;  %vm264_vm1 = vcmask 195584   ;;  %v337_v0 = vld [vmem:[#allocation3 + $0x8] sm:$0xff]  ;;  %v201_v1 = vld [vmem:[#allocation6] sm:$0xff] }
  0x2e   :  { %v340_v2 = vsel %vm202_vm0, %v337_v0, 0.0  ;;  %v265_v3 = vsel %vm264_vm1, %v201_v1, 0.0  ;;  %v339_v4 = vld [vmem:[#allocation6 + $0x8] sm:$0xff]  ;;  %v463_v5 = vld [vmem:[#allocation6 + $0x10] sm:$0xff]  ;;  %v1800_v8 = vmov 16.0   ;;  %v1801_v9 = vmov 24.0  }
  0x2f   :  { %341 = vadd.xlane.f32.xlu0 %v340_v2  ;;  %266 = vadd.xlane.f32.xlu1 %v265_v3  ;;  %v396_v6 = vsel %vm264_vm1, %v339_v4, 0.0  ;;  %v520_v7 = vsel %vm264_vm1, %v463_v5, 0.0  ;;  %1472 = vrcp.f32 %v1800_v8  ;;  %v297_v42 = vld [vmem:[#allocation11 + $0x8] sm:$0xf]  ;;  %vm314_vm4 = vcmask 1043456   ;;  %v1408_v46 = vld [vmem:[#allocation11] sm:$0xff] }
  0x30   :  { %1474 = vrcp.f32 %v1801_v9  ;;  %v307_v43 = vunpack.c.l.b16 %v297_v42  ;;  %v1409_v47 = vld [vmem:[#allocation8 + $0x8] sm:$0xff]  ;;  %v422_v48 = vld [vmem:[#allocation11 + $0x14] sm:$0xf]  ;;  %v546_v53 = vld [vmem:[#allocation11 + $0x20] sm:$0xf]  ;;  %s1805_s6 = smov [#allocation20]  }
  0x31   :  { %v433_v49 = vunpack.c.l.b16 %v422_v48  ;;  %387 = vmatpush.bf16.msra.mxu2 %v1409_v47  ;;  %v1410_v52 = vld [vmem:[#allocation11 + $0xc] sm:$0xff]  ;;  %v557_v56 = vunpack.c.l.b16 %v546_v53  ;;  %v1412_v63 = vld [vmem:[#allocation11 + $0x18] sm:$0xff]  ;;  %s1260_s8 = sshll.u32 %s1805_s6, 4  ;;  %s1262_s20 = sshll.u32 %s2138_s13, 4  ;;  %s1261_s8 = int_to_ptr.vmem [resolvable:$true] %s1260_s8  ;;  %s1263_s20 = int_to_ptr.hbm [resolvable:$true] %s1262_s20 }
  0x32   :  { %v309_v44 = vpack.c.b16 %v307_v43, %v307_v43  ;;  %v1459_v47 = vld [vmem:[%s2130_s5] ss:$0 sm:$0xff] }
  0x33   :  { %v435_v50 = vpack.c.b16 %v433_v49, %v433_v49  ;;  %v559_v59 = vpack.c.b16 %v557_v56, %v557_v56 }
  0x34   :  { %v316_v45 = vsel %vm314_vm4, %v309_v44, 0 }
  0x35   :  { %v1473_v10 = vpop.eup %1472  ;;  %324 = vmatpush.bf16.msra.mxu1 %v316_v45  ;;  %v441_v51 = vsel %vm314_vm4, %v435_v50, 0  ;;  %v565_v62 = vsel %vm314_vm4, %v559_v59, 0  ;;  %v1414_v45 = vld [vmem:[#allocation12 + $0x8] sm:$0xff]  ;;  %vm334_vm4 = vcmask 261120  }
  0x36   :  { %v1475_v11 = vpop.eup %1474  ;;  %v207_v12 = vmul.f32 16.0, %v1473_v10  ;;  %vm211_vm2 = vweird.f32 %v1473_v10  ;;  %449 = vmatpush.bf16.msra.mxu3 %v441_v51  ;;  %573 = vmatpush.bf16.msrb.mxu2 %v565_v62 }
  0x37   :  { %397 = vadd.xlane.f32.xlu0 %v396_v6  ;;  %521 = vadd.xlane.f32.xlu1 %v520_v7  ;;  %v269_v13 = vmul.f32 24.0, %v1475_v11  ;;  %vm273_vm3 = vweird.f32 %v1475_v11 }
  0x38   :  { %v208_v14 = vsub.f32 1.0, %v207_v12 }
  0x39   :  { %v270_v15 = vsub.f32 1.0, %v269_v13  ;;  %325 = vmatpush.bf16.msra.mxu1 %v1408_v46  ;;  %v1413_v46 = vld [vmem:[#allocation12] sm:$0xff] }
  0x3a   :  { %v209_v16 = vmul.f32 %v1473_v10, %v208_v14  ;;  %450 = vmatpush.bf16.msra.mxu3 %v1410_v52  ;;  %574 = vmatpush.bf16.msrb.mxu2 %v1412_v63  ;;  %v1461_v52 = vld [vmem:[%s2130_s5 + $0x1] ss:$0 sm:$0xff] }
  0x3b   :  { %v271_v17 = vmul.f32 %v1475_v11, %v270_v15 }
  0x3c   :  { %v210_v18 = vadd.f32 %v1473_v10, %v209_v16 }
  0x3d   :  { %v272_v19 = vadd.f32 %v1475_v11, %v271_v17  ;;  %621 = vmatpush.bf16.msrb.mxu1 %v1414_v45 }
  0x3e   :  { %v1934_v20 = vsel %vm211_vm2, %v1473_v10, %v210_v18 }
  0x3f   :  { %v274_v21 = vsel %vm273_vm3, %v1475_v11, %v272_v19 }
  0x41   :  { %622 = vmatpush.bf16.msrb.mxu1 %v1413_v46 }
  0xa2   :  { %v342_v22 = vpop.xlane.xlu0 %341  ;;  %v267_v23 = vpop.xlane.xlu1 %266 }
  0xa3   :  { %v343_v24 = vmul.f32 %v342_v22, %v1934_v20  ;;  %v275_v25 = vmul.f32 %v274_v21, %v267_v23 }
  0xa5   :  { %v1937_v26 = vsub.f32 %v337_v0, %v343_v24  ;;  %v1939_v27 = vsub.f32 %v201_v1, %v275_v25 }
  0xa7   :  { %v345_v28 = vmul.f32 %v1937_v26, %v1937_v26  ;;  %v277_v29 = vmul.f32 %v1939_v27, %v1939_v27 }
  0xa9   :  { %v346_v30 = vsel %vm202_vm0, %v345_v28, 0.0  ;;  %v278_v31 = vsel %vm264_vm1, %v277_v29, 0.0 }
  0xaa   :  { %347 = vadd.xlane.f32.xlu2 %v346_v30  ;;  %v398_v32 = vpop.xlane.xlu0 %397  ;;  %279 = vadd.xlane.f32.xlu0 %v278_v31  ;;  %v522_v33 = vpop.xlane.xlu1 %521 }
  0xab   :  { %v399_v34 = vmul.f32 %v398_v32, %v274_v21  ;;  %v523_v35 = vmul.f32 %v522_v33, %v274_v21 }
  0xad   :  { %v1947_v36 = vsub.f32 %v339_v4, %v399_v34  ;;  %v1949_v37 = vsub.f32 %v463_v5, %v523_v35 }
  0xaf   :  { %v401_v38 = vmul.f32 %v1947_v36, %v1947_v36  ;;  %v525_v39 = vmul.f32 %v1949_v37, %v1949_v37 }
  0xb1   :  { %v402_v40 = vsel %vm264_vm1, %v401_v38, 0.0  ;;  %v526_v41 = vsel %vm264_vm1, %v525_v39, 0.0 }
  0xb2   :  { %403 = vadd.xlane.f32.xlu2 %v402_v40  ;;  %527 = vadd.xlane.f32.xlu1 %v526_v41 }
 0x11d   :  { %v348_v54 = vpop.xlane.xlu2 %347  ;;  %v280_v55 = vpop.xlane.xlu0 %279 }
 0x11e   :  { %v349_v57 = vmul.f32 %v348_v54, %v1934_v20  ;;  %v281_v58 = vmul.f32 %v280_v55, %v274_v21 }
 0x120   :  { %v350_v60 = vadd.f32 1e-05, %v349_v57  ;;  %v282_v61 = vadd.f32 1e-05, %v281_v58  ;;  %v1462_v58 = vld [vmem:[%s2130_s5 + $0x2] ss:$0 sm:$0xff] }
 0x121   :  { %s1804_s5 = smov 96  }
 0x122   :  { %1476 = vrsqrt.f32 %v350_v60  ;;  %vm289_vm5 = vweird.f32 %v282_v61  ;;  %vm357_vm8 = vweird.f32 %v350_v60 }
 0x123   :  { %1478 = vrsqrt.f32 %v282_v61 }
 0x125   :  { %v404_v0 = vpop.xlane.xlu2 %403  ;;  %v528_v1 = vpop.xlane.xlu1 %527 }
 0x126   :  { %v405_v2 = vmul.f32 %v404_v0, %v274_v21  ;;  %v529_v3 = vmul.f32 %v528_v1, %v274_v21 }
 0x128   :  { %v1477_v4 = vpop.eup %1476  ;;  %v406_v5 = vadd.f32 1e-05, %v405_v2  ;;  %v530_v6 = vadd.f32 1e-05, %v529_v3 }
 0x129   :  { %v1479_v7 = vpop.eup %1478  ;;  %v352_v8 = vmul.f32 %v1477_v4, %v350_v60  ;;  %vm358_vm7 = vweird.f32 %v1477_v4 }
 0x12a   :  { %v284_v9 = vmul.f32 %v1479_v7, %v282_v61  ;;  %1480 = vrsqrt.f32 %v406_v5  ;;  %vm290_vm6 = vweird.f32 %v1479_v7  ;;  %vm359_vm10 = vmor %vm357_vm8, %vm358_vm7  ;;  %vm413_vm12 = vweird.f32 %v406_v5 }
 0x12b   :  { %v353_v10 = vmul.f32 %v1477_v4, %v352_v8  ;;  %1482 = vrsqrt.f32 %v530_v6  ;;  %vm291_vm9 = vmor %vm289_vm5, %vm290_vm6  ;;  %vm537_vm13 = vweird.f32 %v530_v6 }
 0x12c   :  { %v285_v11 = vmul.f32 %v1479_v7, %v284_v9 }
 0x12d   :  { %v354_v12 = vmul.f32 0.5, %v353_v10 }
 0x12e   :  { %v286_v13 = vmul.f32 0.5, %v285_v11 }
 0x12f   :  { %v355_v14 = vsub.f32 1.5, %v354_v12 }
 0x130   :  { %v1481_v15 = vpop.eup %1480  ;;  %v287_v16 = vsub.f32 1.5, %v286_v13 }
 0x131   :  { %v1483_v17 = vpop.eup %1482  ;;  %v408_v18 = vmul.f32 %v1481_v15, %v406_v5  ;;  %v356_v19 = vmul.f32 %v1477_v4, %v355_v14  ;;  %vm414_vm11 = vweird.f32 %v1481_v15 }
 0x132   :  { %v532_v21 = vmul.f32 %v1483_v17, %v530_v6  ;;  %v288_v22 = vmul.f32 %v1479_v7, %v287_v16  ;;  %vm538_vm14 = vweird.f32 %v1483_v17  ;;  %vm415_vm15 = vmor %vm413_vm12, %vm414_vm11  ;;  %v1463_v6 = vld [vmem:[#allocation14] ss:$0 sm:$0xff] }
 0x133   :  { %v409_v23 = vmul.f32 %v1481_v15, %v408_v18  ;;  %v360_v24 = vsel %vm359_vm10, %v1477_v4, %v356_v19  ;;  %vm539_vm2 = vmor %vm537_vm13, %vm538_vm14  ;;  %vm668_vm10 = vcmask 15360  }
 0x134   :  { %v533_v25 = vmul.f32 %v1483_v17, %v532_v21  ;;  %v292_v28 = vsel %vm291_vm9, %v1479_v7, %v288_v22  ;;  %v361_v29 = vmul.f32 %v360_v24, %v1937_v26  ;;  %vm666_vm9 = vcmask 7168  }
 0x135   :  { %v410_v30 = vmul.f32 0.5, %v409_v23  ;;  %v293_v31 = vmul.f32 %v292_v28, %v1939_v27 }
 0x136   :  { %v534_v32 = vmul.f32 0.5, %v533_v25  ;;  %v362_v33 = vpack.c.bf16 %v361_v29, %v361_v29 }
 0x137   :  { %v411_v34 = vsub.f32 1.5, %v410_v30  ;;  %v294_v35 = vpack.c.bf16 %v293_v31, %v293_v31 }
 0x138   :  { %v535_v38 = vsub.f32 1.5, %v534_v32  ;;  %1294 = vmatmul.msk.bf16.vlgmr.msra.gmra.mxu2 %vm202_vm0, %v362_v33  ;;  %v200_v32 = vld [vmem:[#allocation3] sm:$0xff] }
 0x139   :  { %1289 = vmatmul.msk.bf16.vlgmr.msra.gmra.mxu1 %vm264_vm1, %v294_v35  ;;  %v412_v39 = vmul.f32 %v1481_v15, %v411_v34  ;;  %v203_v33 = vsel %vm202_vm0, %v200_v32, 0.0 }
 0x13a   :  { %v536_v40 = vmul.f32 %v1483_v17, %v535_v38  ;;  %v461_v38 = vld [vmem:[#allocation3 + $0x10] sm:$0xff] }
 0x13b   :  { %v416_v26 = vsel %vm415_vm15, %v1481_v15, %v412_v39  ;;  %v464_v39 = vsel %vm202_vm0, %v461_v38, 0.0 }
 0x13c   :  { %v417_v27 = vmul.f32 %v416_v26, %v1947_v36  ;;  %v540_v42 = vsel %vm539_vm2, %v1483_v17, %v536_v40 }
 0x13d   :  { %v541_v43 = vmul.f32 %v540_v42, %v1949_v37 }
 0x13e   :  { %v418_v41 = vpack.c.bf16 %v417_v27, %v417_v27 }
 0x13f   :  { %v542_v44 = vpack.c.bf16 %v541_v43, %v541_v43 }
 0x140   :  { %1300 = vmatmul.msk.bf16.vlgmr.msra.gmra.mxu3 %vm264_vm1, %v418_v41 }
 0x148   :  { %1311 = vmatmul.msk.bf16.vlgmr.msrb.gmra.mxu2 %vm264_vm1, %v542_v44 }
 0x1b6   :  { %v327_v48 = vpop.f32.mrf.mxu1 }
 0x1b7   :  { %v328_v49 = vadd.f32 %v1459_v47, %v327_v48 }
 0x1b9   :  { %vm331_vm3 = vcmp.ge.f32.partialorder %v328_v49, 0.0  ;;  %v332_v36 = vmul.f32 0.01, %v328_v49 }
 0x1bb   :  { %v333_v50 = vsel %vm331_vm3, %v328_v49, %v332_v36  ;;  %v1972_v51 = vpop.f32.mrf.mxu2 }
 0x1bc   :  { %335 = vst.msk [vmem:[#allocation2] sm:$0xff] %vm334_vm4, %v333_v50 }
 0x1be   :  { %v329_v37 = vpop.f32.mrf.mxu1 }
 0x1c3   :  { %v391_v53 = vpop.f32.mrf.mxu2  ;;  %v452_v54 = vpop.f32.mrf.mxu3  ;;  %v584_v0 = vld [vmem:[#allocation2] sm:$0xff] }
 0x1c4   :  { %v453_v55 = vadd.f32 %v1461_v52, %v452_v54 }
 0x1c6   :  { %vm456_vm1 = vcmp.ge.f32.partialorder %v453_v55, 0.0  ;;  %v457_v56 = vmul.f32 0.01, %v453_v55 }
 0x1c8   :  { %v458_v57 = vsel %vm456_vm1, %v453_v55, %v457_v56 }
 0x1c9   :  { %459 = vst.msk [vmem:[#allocation2 + $0x8] sm:$0xff] %vm334_vm4, %v458_v57 }
 0x1cb   :  { %v454_v59 = vpop.f32.mrf.mxu3  ;;  %v576_v60 = vpop.f32.mrf.mxu2 }
 0x1cc   :  { %v577_v61 = vadd.f32 %v1462_v58, %v576_v60 }
 0x1ce   :  { %vm580_vm5 = vcmp.ge.f32.partialorder %v577_v61, 0.0  ;;  %v581_v62 = vmul.f32 0.01, %v577_v61 }
 0x1d0   :  { %v582_v63 = vsel %vm580_vm5, %v577_v61, %v581_v62  ;;  %v585_v1 = vld [vmem:[#allocation2 + $0x8] sm:$0xff] }
 0x1d1   :  { %583 = vst.msk [vmem:[#allocation2 + $0x10] sm:$0xff] %vm334_vm4, %v582_v63  ;;  %v587_v2 = vpack.c.bf16 %v585_v1, %v584_v0 }
 0x1d3   :  { %v578_v3 = vpop.f32.mrf.mxu2  ;;  %1320 = vmatmul.msk.bf16.vlgmr.msrb.gmra.mxu1 %vm334_vm4, %v587_v2 }
 0x1d8   :  { %v586_v4 = vld [vmem:[#allocation2 + $0x10] sm:$0xff] }
 0x1d9   :  { %v588_v5 = vpack.c.bf16 %v586_v4, %v586_v4 }
 0x1e3   :  { %1321 = vmatmul.msk.bf16.gmra.mxu1 %vm334_vm4, %v588_v5  ;;  %v1407_v5 = vld [vmem:[#allocation8] sm:$0xff] }
 0x1e4   :  { %255 = vmatpush.bf16.msra.mxu0 %v1407_v5 }
 0x250   :  { %v624_v7 = vpop.f32.mrf.mxu1 }
 0x251   :  { %v1985_v8 = vadd.f32 %v1463_v6, %v624_v7 }
 0x253   :  { %849 = vrot.lane.b32.xlu1 %v1985_v8, %s1791_s27  ;;  %v636_v14 = vmul.f32 0.01, %v1985_v8  ;;  %vm633_vm6 = vcmp.ge.f32.partialorder %v1985_v8, 0.0 }
 0x255   :  { %v639_v17 = vsel %vm633_vm6, %v1985_v8, %v636_v14 }
 0x258   :  { %v626_v9 = vpop.f32.mrf.mxu1 }
 0x259   :  { %v1989_v10 = vadd.f32 %v1463_v6, %v626_v9 }
 0x25b   :  { %643 = vrot.lane.b32.xlu2 %v1989_v10, %s1791_s27  ;;  %v637_v22 = vmul.f32 0.01, %v1989_v10  ;;  %vm634_vm8 = vcmp.ge.f32.partialorder %v1989_v10, 0.0 }
 0x25d   :  { %v640_v24 = vsel %vm634_vm8, %v1989_v10, %v637_v22 }
 0x260   :  { %v629_v11 = vpop.f32.mrf.mxu1 }
 0x261   :  { %v1993_v12 = vadd.f32 %v1463_v6, %v629_v11 }
 0x263   :  { %655 = vrot.lane.b32.xlu0 %v1993_v12, %s1791_s27  ;;  %v638_v15 = vmul.f32 0.01, %v1993_v12  ;;  %vm635_vm7 = vcmp.ge.f32.partialorder %v1993_v12, 0.0 }
 0x265   :  { %v641_v18 = vsel %vm635_vm7, %v1993_v12, %v638_v15 }
 0x268   :  { %v631_v13 = vpop.f32.mrf.mxu1 }
 0x2b5   :  { %v644_v16 = vpop.permute.xlu2 %643 }
 0x2b6   :  { %v646_v19 = vmul.f32 %v644_v16, %v639_v17  ;;  %v1062_v21 = vmul.f32 %v644_v16, %v641_v18  ;;  %v1411_v16 = vld [vmem:[#allocation8 + $0x10] sm:$0xff] }
 0x2b7   :  { %511 = vmatpush.bf16.msrb.mxu0 %v1411_v16 }
 0x2b8   :  { %648 = vrot.lane.b32.xlu2 %v646_v19, %s1791_s27  ;;  %1064 = vrot.lane.b32.xlu1 %v1062_v21, %s1791_s27 }
 0x2c5   :  { %v850_v23 = vpop.permute.xlu1 %849 }
 0x2c6   :  { %v852_v25 = vmul.f32 %v850_v23, %v640_v24  ;;  %v1054_v28 = vmul.f32 %v850_v23, %v641_v18 }
 0x2c8   :  { %854 = vrot.lane.b32.xlu2 %v852_v25, %s1791_s27 }
 0x2d0   :  { %1056 = vrot.lane.b32.xlu2 %v1054_v28, %s1791_s27 }
 0x2d5   :  { %v656_v29 = vpop.permute.xlu0 %655 }
 0x2d6   :  { %v658_v30 = vmul.f32 %v656_v29, %v639_v17  ;;  %v860_v31 = vmul.f32 %v656_v29, %v640_v24 }
 0x2d8   :  { %660 = vrot.lane.b32.xlu0 %v658_v30, %s1791_s27  ;;  %862 = vrot.lane.b32.xlu1 %v860_v31, %s1791_s27 }
 0x302   :  { %204 = vadd.xlane.f32.xlu0 %v203_v33 }
 0x312   :  { %v649_v34 = vpop.permute.xlu2 %648 }
 0x313   :  { %v651_v35 = vsel %vm334_vm4, %v649_v34, 0.0 }
 0x314   :  { %652 = vadd.xlane.f32.xlu2 %v651_v35 }
 0x31c   :  { %465 = vadd.xlane.f32.xlu2 %v464_v39 }
 0x322   :  { %v855_v40 = vpop.permute.xlu2 %854 }
 0x323   :  { %v857_v26 = vsel %vm334_vm4, %v855_v40, 0.0 }
 0x324   :  { %858 = vadd.xlane.f32.xlu0 %v857_v26 }
 0x32a   :  { %v1065_v27 = vpop.permute.xlu1 %1064  ;;  %v1057_v46 = vpop.permute.xlu2 %1056 }
 0x32b   :  { %v1067_v41 = vsel %vm334_vm4, %v1065_v27, 0.0  ;;  %v1059_v47 = vsel %vm334_vm4, %v1057_v46, 0.0 }
 0x32c   :  { %1068 = vadd.xlane.f32.xlu2 %v1067_v41 }
 0x34a   :  { %v661_v42 = vpop.permute.xlu0 %660  ;;  %v863_v43 = vpop.permute.xlu1 %862 }
 0x34b   :  { %v663_v44 = vsel %vm334_vm4, %v661_v42, 0.0  ;;  %v865_v45 = vsel %vm334_vm4, %v863_v43, 0.0 }
 0x34c   :  { %664 = vadd.xlane.f32.xlu1 %v663_v44  ;;  %866 = vadd.xlane.f32.xlu0 %v865_v45 }
 0x354   :  { %1060 = vadd.xlane.f32.xlu0 %v1059_v47 }
 0x375   :  { %v205_v48 = vpop.xlane.xlu0 %204 }
 0x376   :  { %v213_v49 = vmul.f32 %v1934_v20, %v205_v48 }
 0x378   :  { %v214_v36 = vsub.f32 %v200_v32, %v213_v49 }
 0x37a   :  { %v215_v50 = vmul.f32 %v214_v36, %v214_v36 }
 0x37c   :  { %v216_v37 = vsel %vm202_vm0, %v215_v50, 0.0 }
 0x37d   :  { %217 = vadd.xlane.f32.xlu1 %v216_v37 }
 0x387   :  { %v653_v52 = vpop.xlane.xlu2 %652 }
 0x38f   :  { %v466_v53 = vpop.xlane.xlu2 %465 }
 0x390   :  { %v467_v54 = vmul.f32 %v466_v53, %v1934_v20  ;;  %v1803_v53 = vmov 0  }
 0x391   :  { %1457 = vset.pattern.permute.xlu1 %v1803_v53  ;;  %1455 = vset.pattern.permute.xlu0 %v1803_v53 }
 0x392   :  { %v468_v55 = vsub.f32 %v461_v38, %v467_v54 }
 0x394   :  { %v469_v56 = vmul.f32 %v468_v55, %v468_v55 }
 0x396   :  { %v470_v57 = vsel %vm202_vm0, %v469_v56, 0.0 }
 0x397   :  { %471 = vadd.xlane.f32.xlu2 %v470_v57  ;;  %v859_v58 = vpop.xlane.xlu0 %858 }
 0x39f   :  { %v1069_v1 = vpop.xlane.xlu2 %1068 }
 0x3bf   :  { %v665_v59 = vpop.xlane.xlu1 %664  ;;  %v867_v60 = vpop.xlane.xlu0 %866 }
 0x3c0   :  { %v667_v61 = vsel %vm666_vm9, %v653_v52, %v665_v59  ;;  %v868_v62 = vsel %vm666_vm9, %v859_v58, %v867_v60  ;;  %v1802_v52 = vmov 1  }
 0x3c1   :  { %v669_v63 = vsel %vm668_vm10, %v667_v61, -inf  ;;  %v869_v0 = vsel %vm668_vm10, %v868_v62, -inf  ;;  %1456 = vset.pattern.permute.xlu2 %v1802_v52 }
 0x3c2   :  { %670 = vmax.xlane.f32.xlu1 %v669_v63  ;;  %870 = vmax.xlane.f32.xlu0 %v869_v0 }
 0x3c7   :  { %v1061_v2 = vpop.xlane.xlu0 %1060 }
 0x3c8   :  { %v1070_v3 = vsel %vm666_vm9, %v1061_v2, %v1069_v1 }
 0x3c9   :  { %v1071_v4 = vsel %vm668_vm10, %v1070_v3, -inf }
 0x3ca   :  { %1072 = vmax.xlane.f32.xlu1 %v1071_v4 }
 0x3f0   :  { %v218_v6 = vpop.xlane.xlu1 %217 }
 0x3f1   :  { %v219_v7 = vmul.f32 %v218_v6, %v1934_v20 }
 0x3f3   :  { %v220_v9 = vadd.f32 1e-05, %v219_v7 }
 0x3f5   :  { %1484 = vrsqrt.f32 %v220_v9  ;;  %vm227_vm11 = vweird.f32 %v220_v9 }
 0x3fb   :  { %v1485_v11 = vpop.eup %1484 }
 0x3fc   :  { %v222_v13 = vmul.f32 %v1485_v11, %v220_v9  ;;  %vm228_vm12 = vweird.f32 %v1485_v11 }
 0x3fd   :  { %vm229_vm13 = vmor %vm227_vm11, %vm228_vm12 }
 0x3fe   :  { %v223_v14 = vmul.f32 %v1485_v11, %v222_v13 }
 0x400   :  { %v224_v15 = vmul.f32 0.5, %v223_v14 }
 0x402   :  { %v225_v17 = vsub.f32 1.5, %v224_v15 }
 0x404   :  { %v226_v18 = vmul.f32 %v1485_v11, %v225_v17 }
 0x406   :  { %v230_v19 = vsel %vm229_vm13, %v1485_v11, %v226_v18 }
 0x407   :  { %v231_v21 = vmul.f32 %v230_v19, %v214_v36  ;;  %v1464_v19 = vld [vmem:[#allocation9] ss:$0 sm:$0xff] }
 0x409   :  { %v232_v22 = vpack.c.bf16 %v231_v21, %v231_v21  ;;  %v1460_v21 = vld [vmem:[#allocation9 + $0x1] ss:$0 sm:$0xff] }
 0x40a   :  { %v472_v23 = vpop.xlane.xlu2 %471 }
 0x40b   :  { %v473_v24 = vmul.f32 %v472_v23, %v1934_v20  ;;  %1284 = vmatmul.msk.bf16.vlgmr.msra.gmra.mxu0 %vm202_vm0, %v232_v22  ;;  %v390_v23 = vadd.f32 %v1460_v21, %v1972_v51 }
 0x40d   :  { %v474_v25 = vadd.f32 1e-05, %v473_v24  ;;  %vm393_vm3 = vcmp.ge.f32.partialorder %v390_v23, 0.0 }
 0x40f   :  { %1486 = vrsqrt.f32 %v474_v25  ;;  %vm481_vm14 = vweird.f32 %v474_v25 }
 0x415   :  { %v1487_v28 = vpop.eup %1486 }
 0x416   :  { %v476_v29 = vmul.f32 %v1487_v28, %v474_v25  ;;  %vm482_vm15 = vweird.f32 %v1487_v28 }
 0x417   :  { %vm483_vm2 = vmor %vm481_vm14, %vm482_vm15 }
 0x418   :  { %v477_v30 = vmul.f32 %v1487_v28, %v476_v29 }
 0x41a   :  { %v478_v31 = vmul.f32 0.5, %v477_v30 }
 0x41c   :  { %v479_v32 = vsub.f32 1.5, %v478_v31  ;;  %v1465_v31 = vld [vmem:[#allocation9 + $0x2] ss:$0 sm:$0xff] }
 0x41e   :  { %v480_v33 = vmul.f32 %v1487_v28, %v479_v32 }
 0x420   :  { %v484_v34 = vsel %vm483_vm2, %v1487_v28, %v480_v33  ;;  %v394_v28 = vmul.f32 0.01, %v390_v23 }
 0x421   :  { %v485_v35 = vmul.f32 %v484_v34, %v468_v55 }
 0x422   :  { %v395_v29 = vsel %vm393_vm3, %v390_v23, %v394_v28 }
 0x423   :  { %v486_v38 = vpack.c.bf16 %v485_v35, %v485_v35 }
 0x425   :  { %1305 = vmatmul.msk.bf16.vlgmr.msrb.gmra.mxu0 %vm202_vm0, %v486_v38 }
 0x435   :  { %v671_v39 = vpop.xlane.xlu1 %670  ;;  %v871_v20 = vpop.xlane.xlu0 %870 }
 0x436   :  { %v672_v40 = vsub.f32 %v667_v61, %v671_v39  ;;  %v872_v26 = vsub.f32 %v868_v62, %v871_v20 }
 0x438   :  { %v673_v27 = vmul.f32 1.442695, %v672_v40  ;;  %v873_v41 = vmul.f32 1.442695, %v872_v26 }
 0x43a   :  { %1488 = vpow2.f32 %v673_v27 }
 0x43b   :  { %1490 = vpow2.f32 %v873_v41 }
 0x43d   :  { %v1073_v42 = vpop.xlane.xlu1 %1072 }
 0x43e   :  { %v1074_v43 = vsub.f32 %v1070_v3, %v1073_v42 }
 0x440   :  { %v1489_v44 = vpop.eup %1488  ;;  %v1075_v45 = vmul.f32 1.442695, %v1074_v43 }
 0x441   :  { %v1491_v46 = vpop.eup %1490  ;;  %v675_v47 = vsel %vm668_vm10, %v1489_v44, 0.0 }
 0x442   :  { %1492 = vpow2.f32 %v1075_v45  ;;  %676 = vadd.xlane.f32.xlu0 %v675_v47  ;;  %v875_v48 = vsel %vm668_vm10, %v1491_v46, 0.0 }
 0x443   :  { %876 = vadd.xlane.f32.xlu2 %v875_v48 }
 0x448   :  { %v1493_v49 = vpop.eup %1492 }
 0x449   :  { %v1077_v36 = vsel %vm668_vm10, %v1493_v49, 0.0 }
 0x44a   :  { %1078 = vadd.xlane.f32.xlu1 %v1077_v36 }
 0x488   :  { %v257_v50 = vpop.f32.mrf.mxu0 }
 0x490   :  { %v259_v37 = vpop.f32.mrf.mxu0 }
 0x4a2   :  { %v513_v54 = vpop.f32.mrf.mxu0 }
 0x4a3   :  { %v514_v32 = vadd.f32 %v1465_v31, %v513_v54 }
 0x4a5   :  { %v518_v35 = vmul.f32 0.01, %v514_v32  ;;  %vm517_vm1 = vcmp.ge.f32.partialorder %v514_v32, 0.0 }
 0x4a7   :  { %v519_v39 = vsel %vm517_vm1, %v514_v32, %v518_v35 }
 0x4a8   :  { %v1094_v20 = vsel %vm334_vm4, %v519_v39, 0.0 }
 0x4aa   :  { %v515_v55 = vpop.f32.mrf.mxu0 }
 0x4b5   :  { %v677_v56 = vpop.xlane.xlu0 %676 }
 0x4b6   :  { %v877_v57 = vpop.xlane.xlu2 %876  ;;  %1494 = vrcp.f32 %v677_v56 }
 0x4b7   :  { %1496 = vrcp.f32 %v877_v57 }
 0x4bc   :  { %v1495_v58 = vpop.eup %1494 }
 0x4bd   :  { %v1497_v59 = vpop.eup %1496  ;;  %v1079_v60 = vpop.xlane.xlu1 %1078  ;;  %v679_v61 = vmul.f32 %v1495_v58, %v1489_v44 }
 0x4be   :  { %1498 = vrcp.f32 %v1079_v60  ;;  %v879_v62 = vmul.f32 %v1497_v59, %v1491_v46 }
 0x4bf   :  { %687 = vperm.xlu2 %1456, %v679_v61   ;;  %682 = vperm.xlu0 %1455, %v679_v61  }
 0x4c0   :  { %882 = vperm.xlu1 %1457, %v879_v62  }
 0x4c4   :  { %v1499_v63 = vpop.eup %1498 }
 0x4c5   :  { %v1081_v0 = vmul.f32 %v1499_v63, %v1493_v49 }
 0x4c7   :  { %887 = vperm.xlu2 %1456, %v879_v62   ;;  %1458 = vset.pattern.permute.xlu0 %v1802_v52 }
 0x4c8   :  { %1084 = vperm.xlu1 %1457, %v1081_v0  }
 0x4cf   :  { %1089 = vperm.xlu2 %1456, %v1081_v0  }
 0x519   :  { %v688_v1 = vpop.permute.xlu2 %687 }
 0x51a   :  { %v690_v4 = vmul.f32 %v688_v1, %v1993_v12 }
 0x521   :  { %v888_v2 = vpop.permute.xlu2 %887 }
 0x522   :  { %v890_v7 = vmul.f32 %v888_v2, %v1993_v12  ;;  %v258_v12 = vadd.f32 %v1464_v19, %v257_v50 }
 0x524   :  { %v262_v22 = vmul.f32 0.01, %v258_v12  ;;  %vm261_vm0 = vcmp.ge.f32.partialorder %v258_v12, 0.0 }
 0x526   :  { %v263_v24 = vsel %vm261_vm0, %v258_v12, %v262_v22  ;;  %v1422_v12 = vld [vmem:[#allocation15 + $0x18] sm:$0xff]  ;;  %v1421_v22 = vld [vmem:[#allocation15 + $0x10] sm:$0xff] }
 0x527   :  { %v692_v25 = vsel %vm334_vm4, %v263_v24, 0.0 }
 0x529   :  { %v1090_v14 = vpop.permute.xlu2 %1089 }
 0x52a   :  { %v1092_v16 = vmul.f32 %v1090_v14, %v1989_v10 }
 0x531   :  { %v683_v3 = vpop.permute.xlu0 %682 }
 0x532   :  { %v883_v5 = vpop.permute.xlu1 %882  ;;  %v685_v6 = vmul.f32 %v683_v3, %v1989_v10  ;;  %v892_v10 = vsel %vm334_vm4, %v395_v29, 0.0 }
 0x533   :  { %v885_v9 = vmul.f32 %v883_v5, %v1985_v8 }
 0x534   :  { %v691_v11 = vadd.f32 %v690_v4, %v685_v6  ;;  %v1416_v6 = vld [vmem:[#allocation15 + $0x8] sm:$0xff] }
 0x535   :  { %v891_v13 = vadd.f32 %v890_v7, %v885_v9  ;;  %795 = vmatpush.bf16.msra.mxu0 %v1416_v6  ;;  %v1415_v9 = vld [vmem:[#allocation15] sm:$0xff] }
 0x536   :  { %696 = vrot.lane.b32.xlu1 %v691_v11, %s1804_s5 }
 0x537   :  { %896 = vrot.lane.b32.xlu0 %v891_v13, %s1804_s5 }
 0x539   :  { %796 = vmatpush.bf16.msra.mxu0 %v1415_v9 }
 0x53a   :  { %v1085_v15 = vpop.permute.xlu1 %1084 }
 0x53b   :  { %v1087_v17 = vmul.f32 %v1085_v15, %v1985_v8 }
 0x53d   :  { %v1093_v18 = vadd.f32 %v1092_v16, %v1087_v17  ;;  %997 = vmatpush.bf16.msrb.mxu0 %v1422_v12 }
 0x53f   :  { %1098 = vrot.lane.b32.xlu2 %v1093_v18, %s1804_s5 }
 0x541   :  { %998 = vmatpush.bf16.msrb.mxu0 %v1421_v22 }
 0x560   :  { %693 = vadd.xlane.f32.xlu1 %v692_v25 }
 0x568   :  { %893 = vadd.xlane.f32.xlu2 %v892_v10 }
 0x599   :  { %v1099_v8 = vpop.permute.xlu2 %1098 }
 0x59a   :  { %v1101_v30 = vsel %vm334_vm4, %v1099_v8, 0.0  ;;  %v1430_v8 = vld [vmem:[#allocation17 + $0x28] sm:$0xff] }
 0x59b   :  { %1102 = vadd.xlane.f32.xlu2 %v1101_v30  ;;  %1171 = vmatpush.bf16.msra.mxu1 %v1430_v8 }
 0x5a8   :  { %v697_v33 = vpop.permute.xlu1 %696 }
 0x5a9   :  { %v897_v34 = vpop.permute.xlu0 %896  ;;  %v699_v51 = vsel %vm334_vm4, %v697_v33, 0.0  ;;  %v1429_v33 = vld [vmem:[#allocation17 + $0x20] sm:$0xff] }
 0x5aa   :  { %700 = vadd.xlane.f32.xlu0 %v699_v51  ;;  %v899_v38 = vsel %vm334_vm4, %v897_v34, 0.0  ;;  %1172 = vmatpush.bf16.msra.mxu1 %v1429_v33 }
 0x5ab   :  { %900 = vadd.xlane.f32.xlu1 %v899_v38 }
 0x5b2   :  { %1095 = vadd.xlane.f32.xlu0 %v1094_v20 }
 0x5d3   :  { %v694_v40 = vpop.xlane.xlu1 %693 }
 0x5db   :  { %v894_v26 = vpop.xlane.xlu2 %893 }
 0x60e   :  { %v1103_v49 = vpop.xlane.xlu2 %1102 }
 0x61d   :  { %v701_v27 = vpop.xlane.xlu0 %700 }
 0x61e   :  { %v901_v41 = vpop.xlane.xlu1 %900  ;;  %v702_v42 = vadd.f32 %v701_v27, %v694_v40 }
 0x61f   :  { %v902_v43 = vadd.f32 %v901_v41, %v894_v26 }
 0x620   :  { %v703_v44 = vmul.f32 0.015625, %v702_v42 }
 0x621   :  { %v903_v45 = vmul.f32 0.015625, %v902_v43 }
 0x622   :  { %v2050_v46 = vsub.f32 %v691_v11, %v703_v44  ;;  %v2065_v55 = vsub.f32 %v263_v24, %v703_v44 }
 0x623   :  { %v2052_v47 = vsub.f32 %v891_v13, %v903_v45  ;;  %v2069_v57 = vsub.f32 %v395_v29, %v903_v45 }
 0x624   :  { %v710_v48 = vmul.f32 %v2050_v46, %v2050_v46  ;;  %v706_v56 = vmul.f32 %v2065_v55, %v2065_v55 }
 0x625   :  { %v1096_v36 = vpop.xlane.xlu0 %1095  ;;  %v910_v50 = vmul.f32 %v2052_v47, %v2052_v47  ;;  %v906_v59 = vmul.f32 %v2069_v57, %v2069_v57 }
 0x626   :  { %v1104_v37 = vadd.f32 %v1103_v49, %v1096_v36  ;;  %712 = vrot.lane.b32.xlu1 %v710_v48, %s1804_s5  ;;  %v707_v58 = vsel %vm334_vm4, %v706_v56, 0.0 }
 0x627   :  { %912 = vrot.lane.b32.xlu0 %v910_v50, %s1804_s5  ;;  %v907_v60 = vsel %vm334_vm4, %v906_v59, 0.0 }
 0x628   :  { %v1105_v52 = vmul.f32 0.015625, %v1104_v37 }
 0x62a   :  { %v2060_v53 = vsub.f32 %v1093_v18, %v1105_v52  ;;  %v2076_v0 = vsub.f32 %v519_v39, %v1105_v52 }
 0x62c   :  { %v1112_v54 = vmul.f32 %v2060_v53, %v2060_v53  ;;  %v1108_v4 = vmul.f32 %v2076_v0, %v2076_v0 }
 0x62e   :  { %1114 = vrot.lane.b32.xlu2 %v1112_v54, %s1804_s5  ;;  %v1109_v5 = vsel %vm334_vm4, %v1108_v4, 0.0 }
 0x651   :  { %708 = vadd.xlane.f32.xlu0 %v707_v58 }
 0x657   :  { %908 = vadd.xlane.f32.xlu2 %v907_v60  ;;  %v1418_v60 = vld [vmem:[#allocation17 + $0x8] sm:$0xff] }
 0x658   :  { %767 = vmatpush.bf16.msrb.mxu3 %v1418_v60 }
 0x688   :  { %v1115_v61 = vpop.permute.xlu2 %1114 }
 0x689   :  { %v1117_v62 = vsel %vm334_vm4, %v1115_v61, 0.0  ;;  %v1417_v61 = vld [vmem:[#allocation17] sm:$0xff] }
 0x68a   :  { %1118 = vadd.xlane.f32.xlu2 %v1117_v62  ;;  %768 = vmatpush.bf16.msrb.mxu3 %v1417_v61  ;;  %v1424_v62 = vld [vmem:[#allocation17 + $0x18] sm:$0xff] }
 0x68e   :  { %969 = vmatpush.bf16.msra.mxu3 %v1424_v62 }
 0x698   :  { %v713_v63 = vpop.permute.xlu1 %712 }
 0x699   :  { %v913_v1 = vpop.permute.xlu0 %912  ;;  %v715_v2 = vsel %vm334_vm4, %v713_v63, 0.0  ;;  %v1423_v63 = vld [vmem:[#allocation17 + $0x10] sm:$0xff] }
 0x69a   :  { %716 = vadd.xlane.f32.xlu1 %v715_v2  ;;  %v915_v3 = vsel %vm334_vm4, %v913_v1, 0.0  ;;  %970 = vmatpush.bf16.msra.mxu3 %v1423_v63 }
 0x69b   :  { %916 = vadd.xlane.f32.xlu0 %v915_v3 }
 0x6a2   :  { %1110 = vadd.xlane.f32.xlu1 %v1109_v5 }
 0x6c4   :  { %v709_v7 = vpop.xlane.xlu0 %708 }
 0x6ca   :  { %v909_v11 = vpop.xlane.xlu2 %908 }
 0x6fd   :  { %v1119_v23 = vpop.xlane.xlu2 %1118 }
 0x70d   :  { %v717_v13 = vpop.xlane.xlu1 %716 }
 0x70e   :  { %v718_v14 = vadd.f32 %v717_v13, %v709_v7  ;;  %v917_v15 = vpop.xlane.xlu0 %916  ;;  %v1420_v13 = vld [vmem:[#allocation18 + $0x8] sm:$0xff] }
 0x70f   :  { %v918_v16 = vadd.f32 %v917_v15, %v909_v11  ;;  %840 = vmatpush.bf16.msra.mxu2 %v1420_v13 }
 0x710   :  { %v719_v17 = vmul.f32 0.015625, %v718_v14  ;;  %v1419_v14 = vld [vmem:[#allocation18] sm:$0xff] }
 0x711   :  { %v919_v18 = vmul.f32 0.015625, %v918_v16 }
 0x712   :  { %v720_v19 = vadd.f32 1e-05, %v719_v17  ;;  %v1426_v17 = vld [vmem:[#allocation18 + $0x18] sm:$0xff] }
 0x713   :  { %v920_v21 = vadd.f32 1e-05, %v919_v18  ;;  %841 = vmatpush.bf16.msra.mxu2 %v1419_v14  ;;  %v1425_v18 = vld [vmem:[#allocation18 + $0x10] sm:$0xff] }
 0x714   :  { %1500 = vrsqrt.f32 %v720_v19  ;;  %vm727_vm7 = vweird.f32 %v720_v19 }
 0x715   :  { %1502 = vrsqrt.f32 %v920_v21  ;;  %v1111_v24 = vpop.xlane.xlu1 %1110  ;;  %vm927_vm9 = vweird.f32 %v920_v21 }
 0x716   :  { %v1120_v25 = vadd.f32 %v1119_v23, %v1111_v24  ;;  %v1431_v24 = vld [vmem:[#allocation18 + $0x20] sm:$0xff] }
 0x717   :  { %1045 = vmatpush.bf16.msrb.mxu2 %v1426_v17 }
 0x718   :  { %v1121_v28 = vmul.f32 0.015625, %v1120_v25 }
 0x71a   :  { %v1501_v29 = vpop.eup %1500  ;;  %v1122_v10 = vadd.f32 1e-05, %v1121_v28 }
 0x71b   :  { %v1503_v30 = vpop.eup %1502  ;;  %v722_v31 = vmul.f32 %v1501_v29, %v720_v19  ;;  %vm728_vm5 = vweird.f32 %v1501_v29  ;;  %1046 = vmatpush.bf16.msrb.mxu2 %v1425_v18  ;;  %v1432_v19 = vld [vmem:[#allocation18 + $0x28] sm:$0xff] }
 0x71c   :  { %v922_v32 = vmul.f32 %v1503_v30, %v920_v21  ;;  %1504 = vrsqrt.f32 %v1122_v10  ;;  %vm928_vm6 = vweird.f32 %v1503_v30  ;;  %vm729_vm8 = vmor %vm727_vm7, %vm728_vm5  ;;  %vm1129_vm12 = vweird.f32 %v1122_v10 }
 0x71d   :  { %v723_v34 = vmul.f32 %v1501_v29, %v722_v31  ;;  %vm929_vm10 = vmor %vm927_vm9, %vm928_vm6 }
 0x71e   :  { %v923_v51 = vmul.f32 %v1503_v30, %v922_v32 }
 0x71f   :  { %v724_v35 = vmul.f32 0.5, %v723_v34 }
 0x720   :  { %v924_v38 = vmul.f32 0.5, %v923_v51 }
 0x721   :  { %v725_v39 = vsub.f32 1.5, %v724_v35  ;;  %v1468_v35 = vld [vmem:[%s2135_s10 + $0x2] ss:$0 sm:$0xff] }
 0x722   :  { %v1505_v20 = vpop.eup %1504  ;;  %v925_v40 = vsub.f32 1.5, %v924_v38 }
 0x723   :  { %v1124_v26 = vmul.f32 %v1505_v20, %v1122_v10  ;;  %v726_v27 = vmul.f32 %v1501_v29, %v725_v39  ;;  %vm1130_vm11 = vweird.f32 %v1505_v20  ;;  %v1467_v10 = vld [vmem:[%s2135_s10 + $0x1] ss:$0 sm:$0xff] }
 0x724   :  { %v926_v41 = vmul.f32 %v1503_v30, %v925_v40  ;;  %vm1131_vm13 = vmor %vm1129_vm12, %vm1130_vm11 }
 0x725   :  { %v1125_v42 = vmul.f32 %v1505_v20, %v1124_v26  ;;  %v730_v43 = vsel %vm729_vm8, %v1501_v29, %v726_v27 }
 0x726   :  { %v737_v44 = vmul.f32 %v730_v43, %v2050_v46  ;;  %v731_v45 = vmul.f32 %v730_v43, %v2065_v55  ;;  %v930_v48 = vsel %vm929_vm10, %v1503_v30, %v926_v41 }
 0x727   :  { %v1126_v49 = vmul.f32 0.5, %v1125_v42  ;;  %v938_v36 = vmul.f32 %v930_v48, %v2052_v47  ;;  %v931_v47 = vmul.f32 %v930_v48, %v2069_v57  ;;  %v1427_v57 = vld [vmem:[#allocation15 + $0x20] sm:$0xff] }
 0x728   :  { %v738_v50 = vpack.c.bf16 %v737_v44, %v737_v44  ;;  %v732_v37 = vpack.c.bf16 %v731_v45, %v731_v45  ;;  %v1469_v42 = vld [vmem:[%s2137_s12] ss:$0 sm:$0xff]  ;;  %v1470_v48 = vld [vmem:[%s2137_s12 + $0x1] ss:$0 sm:$0xff] }
 0x729   :  { %v1127_v52 = vsub.f32 1.5, %v1126_v49  ;;  %v939_v54 = vpack.c.bf16 %v938_v36, %v938_v36  ;;  %v932_v59 = vpack.c.bf16 %v931_v47, %v931_v47 }
 0x72a   :  { %744 = vrot.lane.b32.xlu0 %v738_v50, %s1804_s5  ;;  %1339 = vmatmul.msk.bf16.vlgmr.msra.gmra.mxu0 %vm334_vm4, %v732_v37  ;;  %v1471_v50 = vld [vmem:[%s2137_s12 + $0x2] ss:$0 sm:$0xff] }
 0x72b   :  { %946 = vrot.lane.b32.xlu1 %v939_v54, %s1804_s5  ;;  %v1128_v56 = vmul.f32 %v1505_v20, %v1127_v52  ;;  %1247 = vmatpush.bf16.msra.mxu0 %v1432_v19 }
 0x72d   :  { %v1132_v46 = vsel %vm1131_vm13, %v1505_v20, %v1128_v56 }
 0x72e   :  { %v1140_v55 = vmul.f32 %v1132_v46, %v2060_v53  ;;  %v1428_v53 = vld [vmem:[#allocation15 + $0x28] sm:$0xff]  ;;  %v1133_v6 = vmul.f32 %v1132_v46, %v2076_v0  ;;  %v1466_v0 = vld [vmem:[%s2135_s10] ss:$0 sm:$0xff] }
 0x72f   :  { %1248 = vmatpush.bf16.msra.mxu0 %v1431_v24 }
 0x730   :  { %v1141_v58 = vpack.c.bf16 %v1140_v55, %v1140_v55  ;;  %v1134_v9 = vpack.c.bf16 %v1133_v6, %v1133_v6 }
 0x732   :  { %1148 = vrot.lane.b32.xlu2 %v1141_v58, %s1804_s5 }
 0x73a   :  { %1366 = vmatmul.msk.bf16.vlgmr.msrb.gmra.mxu0 %vm334_vm4, %v932_v59 }
 0x78c   :  { %v1149_v1 = vpop.permute.xlu2 %1148 }
 0x78d   :  { %1386 = vmatmul.msk.bf16.vlgmr.msra.gmra.mxu1 %vm334_vm4, %v1149_v1 }
 0x79c   :  { %v745_v2 = vpop.permute.xlu0 %744 }
 0x79d   :  { %1330 = vmatmul.msk.bf16.vlgmr.msrb.gmra.mxu3 %vm334_vm4, %v745_v2  ;;  %v947_v4 = vpop.permute.xlu1 %946 }
 0x79e   :  { %1199 = vmatpush.bf16.msrb.mxu3 %v1428_v53 }
 0x7a2   :  { %1200 = vmatpush.bf16.msrb.mxu3 %v1427_v57 }
 0x7a7   :  { %v798_v3 = vpop.f32.mrf.mxu0 }
 0x7ad   :  { %1357 = vmatmul.msk.bf16.vlgmr.msra.gmra.mxu3 %vm334_vm4, %v947_v4 }
 0x7af   :  { %v800_v5 = vpop.f32.mrf.mxu0 }
 0x7b7   :  { %v1000_v7 = vpop.f32.mrf.mxu0 }
 0x7bd   :  { %1395 = vmatmul.msk.bf16.vlgmr.msrb.gmra.mxu3 %vm334_vm4, %v1134_v9 }
 0x7bf   :  { %v1002_v11 = vpop.f32.mrf.mxu0 }
 0x80a   :  { %v1174_v15 = vpop.f32.mrf.mxu1 }
 0x812   :  { %v1176_v16 = vpop.f32.mrf.mxu1 }
 0x820   :  { %v770_v12 = vpop.f32.mrf.mxu3 }
 0x821   :  { %v799_v21 = vadd.f32 %v798_v3, %v770_v12 }
 0x823   :  { %v806_v22 = vadd.f32 %v1466_v0, %v799_v21 }
 0x825   :  { %vm807_vm14 = vcmp.ge.f32.partialorder %v806_v22, 0.0  ;;  %v808_v23 = vmul.f32 0.01, %v806_v22 }
 0x827   :  { %v809_v25 = vsel %vm807_vm14, %v806_v22, %v808_v23 }
 0x828   :  { %v810_v28 = vpack.c.bf16 %v809_v25, %v809_v25  ;;  %v772_v29 = vpop.f32.mrf.mxu3 }
 0x82a   :  { %1348 = vmatmul.msk.bf16.vlgmr.msra.gmra.mxu2 %vm334_vm4, %v810_v28 }
 0x830   :  { %v972_v8 = vpop.f32.mrf.mxu3 }
 0x831   :  { %v1001_v30 = vadd.f32 %v1000_v7, %v972_v8 }
 0x833   :  { %v1009_v31 = vadd.f32 %v1467_v10, %v1001_v30 }
 0x835   :  { %vm1010_vm15 = vcmp.ge.f32.partialorder %v1009_v31, 0.0  ;;  %v1011_v32 = vmul.f32 0.01, %v1009_v31 }
 0x837   :  { %v1012_v33 = vsel %vm1010_vm15, %v1009_v31, %v1011_v32 }
 0x838   :  { %v1013_v34 = vpack.c.bf16 %v1012_v33, %v1012_v33  ;;  %v974_v51 = vpop.f32.mrf.mxu3 }
 0x83a   :  { %1377 = vmatmul.msk.bf16.vlgmr.msrb.gmra.mxu2 %vm334_vm4, %v1013_v34 }
 0x840   :  { %v1202_v38 = vpop.f32.mrf.mxu3 }
 0x841   :  { %v1203_v39 = vadd.f32 %v1202_v38, %v1174_v15 }
 0x843   :  { %v1211_v20 = vadd.f32 %v1468_v35, %v1203_v39 }
 0x845   :  { %vm1212_vm2 = vcmp.ge.f32.partialorder %v1211_v20, 0.0  ;;  %v1213_v40 = vmul.f32 0.01, %v1211_v20 }
 0x847   :  { %v1214_v26 = vsel %vm1212_vm2, %v1211_v20, %v1213_v40 }
 0x848   :  { %v1215_v27 = vpack.c.bf16 %v1214_v26, %v1214_v26  ;;  %v1204_v41 = vpop.f32.mrf.mxu3 }
 0x84a   :  { %1406 = vmatmul.msk.bf16.vlgmr.msra.gmra.mxu0 %vm334_vm4, %v1215_v27 }
 0x8ad   :  { %v843_v43 = vpop.f32.mrf.mxu2 }
 0x8ae   :  { %v844_v44 = vadd.f32 %v1469_v42, %v843_v43 }
 0x8b0   :  { %847 = vst [vmem:[#allocation20] sm:$0xff] %v844_v44 }
 0x8b5   :  { %v845_v45 = vpop.f32.mrf.mxu2 }
 0x8bd   :  { %v1048_v49 = vpop.f32.mrf.mxu2 }
 0x8be   :  { %v1049_v36 = vadd.f32 %v1470_v48, %v1048_v49 }
 0x8c0   :  { %1053 = vst [vmem:[#allocation20 + $0x8] sm:$0xff] %v1049_v36 }
 0x8c5   :  { %v1050_v37 = vpop.f32.mrf.mxu2 }
 0x8c7   :  { %v1250_v52 = vpop.f32.mrf.mxu0 }
 0x8c8   :  { %v1251_v54 = vadd.f32 %v1471_v50, %v1250_v52 }
 0x8ca   :  { %1255 = vst [vmem:[#allocation20 + $0x10] sm:$0xff] %v1251_v54 }
 0x8cb   :  { %1268 = dma.vmem_to_hbm [thread:$0]  %s1261_s8, 384, %s1263_s20, [#allocation5], %s1785_s16, %s1785_s16, %s1786_s17  }
 0x8cf   :  { %v1252_v56 = vpop.f32.mrf.mxu0 }
 0x8d0   :  { %1782 = dma.done.wait [#allocation5], 384  }
 0x8d1   :  { %1783 = vsyncadd [#allocation5], 4294966912 }
 0x8d2   :  { %1273 = vsyncpa [#allocation4], 1 }
 0x8d3   :  { %1274 = vsyncpa [#allocation7], 1 }
 0x8d4   :  { %1275 = vsyncpa [#allocation10], 1 }
 0x8d5   :  { %1276 = vsyncpa [#allocation13], 1 }
 0x8d6   :  { %1277 = vsyncpa [#allocation16], 1 }
 0x8d7   :  { %1278 = vsyncpa [#allocation19], 1 }
 0x8d8   :  { %1279 = vsyncpa [#allocation5], 1 }

// kernel: tpu_custom_call.1
= control target key start
LH: loop header
LB: loop body
LE: loop exit
PB: predicated region body
PF: predicated region fallthrough
CT: control target
= control target key end

     0   :  { %18 = vsyncpa [#allocation4], 0  ;;  %s2125_s0 = inlined_call_operand.hbm [shape: f32[3,8,16], index: 0, kind: input, shape index: {}]   ;;  %s2126_s1 = inlined_call_operand.hbm [shape: f32[3,8,24], index: 1, kind: input, shape index: {}]   ;;  %s2127_s2 = inlined_call_operand.hbm [shape: bf16[3,16,32], index: 2, kind: input, shape index: {}]   ;;  %s2128_s3 = inlined_call_operand.hbm [shape: f32[3,1,32], index: 3, kind: input, shape index: {}]   ;;  %s2129_s4 = inlined_call_operand.hbm [shape: bf16[3,24,32], index: 4, kind: input, shape index: {}]   ;;  %s2130_s5 = inlined_call_operand.vmem [shape: f32[3,1,32], index: 5, kind: input, shape index: {}]   ;;  %s2131_s6 = inlined_call_operand.hbm [shape: bf16[32,96], index: 6, kind: input, shape index: {}]   ;;  %s2132_s7 = inlined_call_operand.hbm [shape: f32[1,96], index: 7, kind: input, shape index: {}]   ;;  %s2133_s8 = inlined_call_operand.hbm [shape: bf16[3,32,32], index: 8, kind: input, shape index: {}]   ;;  %s2134_s9 = inlined_call_operand.hbm [shape: bf16[3,32,32], index: 9, kind: input, shape index: {}]   ;;  %s2135_s10 = inlined_call_operand.vmem [shape: f32[3,1,32], index: 10, kind: input, shape index: {}]   ;;  %s2136_s11 = inlined_call_operand.hbm [shape: bf16[3,32,128], index: 11, kind: input, shape index: {}]   ;;  %s2137_s12 = inlined_call_operand.vmem [shape: f32[3,1,128], index: 12, kind: input, shape index: {}]   ;;  %s2138_s13 = inlined_call_operand.hbm [shape: f32[3,8,128], index: 13, kind: output, shape index: {}]  }
   0x1   :  { %19 = vsyncpa [#allocation7], 0 }
   0x2   :  { %20 = vsyncpa [#allocation10], 0 }
   0x3   :  { %21 = vsyncpa [#allocation13], 0 }
   0x4   :  { %22 = vsyncpa [#allocation16], 0 }
   0x5   :  { %23 = vsyncpa [#allocation19], 0 }
   0x6   :  { %24 = vsyncpa [#allocation5], 0  ;;  %s42_s27 = sshll.u32 %s2126_s1, 4  ;;  %s1784_s28 = smov [#allocation6]   ;;  %s43_s27 = int_to_ptr.hbm [resolvable:$true] %s42_s27 }
   0x7   :  { %s44_s29 = sshll.u32 %s1784_s28, 4  ;;  %s68_s15 = sshll.u32 %s2128_s3, 4  ;;  %s45_s29 = int_to_ptr.vmem [resolvable:$true] %s44_s29  ;;  %s69_s15 = int_to_ptr.hbm [resolvable:$true] %s68_s15 }
   0x8   :  { %s1785_s16 = smov 128   ;;  %s1786_s17 = smov 8  }
   0x9   :  { %50 = dma.hbm_to_vmem [thread:$0]  %s43_s27, 384, %s45_s29, [#allocation7], %s1785_s16, %s1785_s16, %s1786_s17  }
   0xa   :  { %s1787_s18 = smov [#allocation9]   ;;  %s1788_s20 = smov 16  }
   0xb   :  { %s70_s19 = sshll.u32 %s1787_s18, 4  ;;  %s1789_s1 = smov 1   ;;  %s71_s19 = int_to_ptr.vmem [resolvable:$true] %s70_s19 }
   0xc   :  { %76 = dma.hbm_to_vmem [thread:$0]  %s69_s15, 48, %s71_s19, [#allocation10], %s1788_s20, %s1788_s20, %s1789_s1  }
   0xd   :  { %s96_s23 = sshll.u32 %s2131_s6, 4  ;;  %s1790_s24 = smov [#allocation12]   ;;  %s97_s23 = int_to_ptr.hbm [resolvable:$true] %s96_s23 }
   0xe   :  { %s98_s3 = sshll.u32 %s1790_s24, 4  ;;  %s120_s28 = sshll.u32 %s2133_s8, 4  ;;  %s99_s3 = int_to_ptr.vmem [resolvable:$true] %s98_s3  ;;  %s121_s28 = int_to_ptr.hbm [resolvable:$true] %s120_s28 }
   0xf   :  { %s1791_s27 = smov 64   ;;  %s1792_s29 = smov 4  }
  0x10   :  { %104 = dma.hbm_to_vmem [thread:$0]  %s97_s23, 256, %s99_s3, [#allocation13], %s1791_s27, %s1791_s27, %s1792_s29  }
  0x11   :  { %s1793_s30 = smov [#allocation15]   ;;  %s29_s6 = sshll.u32 %s2125_s0, 4  ;;  %s30_s6 = int_to_ptr.hbm [resolvable:$true] %s29_s6 }
  0x12   :  { %s122_s14 = sshll.u32 %s1793_s30, 4  ;;  %s55_s20 = sshll.u32 %s2127_s2, 4  ;;  %s123_s14 = int_to_ptr.vmem [resolvable:$true] %s122_s14  ;;  %s56_s20 = int_to_ptr.hbm [resolvable:$true] %s55_s20 }
  0x13   :  { %128 = dma.hbm_to_vmem [thread:$0]  %s121_s28, 768, %s123_s14, [#allocation16], %s1791_s27, %s1791_s27, %s1792_s29  }
  0x14   :  { %s1794_s1 = smov [#allocation3]   ;;  %s1795_s22 = smov [#allocation8]  }
  0x15   :  { %s31_s21 = sshll.u32 %s1794_s1, 4  ;;  %s57_s0 = sshll.u32 %s1795_s22, 4  ;;  %s32_s21 = int_to_ptr.vmem [resolvable:$true] %s31_s21  ;;  %s58_s0 = int_to_ptr.vmem [resolvable:$true] %s57_s0 }
  0x16   :  { %37 = dma.hbm_to_vmem [thread:$0]  %s30_s6, 384, %s32_s21, [#allocation4], %s1785_s16, %s1785_s16, %s1786_s17  }
  0x17   :  { %s81_s3 = sshll.u32 %s2129_s4, 4  ;;  %s110_s26 = sshll.u32 %s2132_s7, 4  ;;  %s82_s3 = int_to_ptr.hbm [resolvable:$true] %s81_s3  ;;  %s111_s26 = int_to_ptr.hbm [resolvable:$true] %s110_s26 }
  0x18   :  { %63 = dma.hbm_to_vmem [thread:$0]  %s56_s20, 384, %s58_s0, [#allocation7], %s1791_s27, %s1791_s27, %s1792_s29  }
  0x19   :  { %s1796_s28 = smov [#allocation11]   ;;  %s1797_s14 = smov [#allocation14]  }
  0x1a   :  { %s83_s30 = sshll.u32 %s1796_s28, 4  ;;  %s112_s4 = sshll.u32 %s1797_s14, 4  ;;  %s84_s30 = int_to_ptr.vmem [resolvable:$true] %s83_s30  ;;  %s113_s4 = int_to_ptr.vmem [resolvable:$true] %s112_s4 }
  0x1b   :  { %89 = dma.hbm_to_vmem [thread:$0]  %s82_s3, 576, %s84_s30, [#allocation10], %s1791_s27, %s1791_s27, %s1792_s29  }
  0x1c   :  { %s133_s6 = sshll.u32 %s2134_s9, 4  ;;  %s148_s7 = sshll.u32 %s2136_s11, 4  ;;  %s134_s6 = int_to_ptr.hbm [resolvable:$true] %s133_s6  ;;  %s149_s7 = int_to_ptr.hbm [resolvable:$true] %s148_s7 }
  0x1d   :  { %115 = dma.hbm_to_vmem [thread:$0]  %s111_s26, 16, %s113_s4, [#allocation13]  }
  0x1e   :  { %s1798_s20 = smov [#allocation17]   ;;  %s1799_s21 = smov [#allocation18]  }
  0x1f   :  { %s135_s1 = sshll.u32 %s1798_s20, 4  ;;  %s150_s22 = sshll.u32 %s1799_s21, 4  ;;  %s136_s1 = int_to_ptr.vmem [resolvable:$true] %s135_s1  ;;  %s151_s22 = int_to_ptr.vmem [resolvable:$true] %s150_s22 }
  0x20   :  { %141 = dma.hbm_to_vmem [thread:$0]  %s134_s6, 768, %s136_s1, [#allocation16], %s1791_s27, %s1791_s27, %s1792_s29  }
  0x21   :  { %156 = dma.hbm_to_vmem [thread:$0]  %s149_s7, 768, %s151_s22, [#allocation19], %s1791_s27, %s1791_s27, %s1792_s29  }
  0x22   :  { %1770 = dma.done.wait [#allocation4], 384  }
  0x23   :  { %1771 = vsyncadd [#allocation4], 4294966912 }
  0x24   :  { %1772 = dma.done.wait [#allocation7], 768  }
  0x25   :  { %1773 = vsyncadd [#allocation7], 4294966528 }
  0x26   :  { %1774 = dma.done.wait [#allocation10], 624  }
  0x27   :  { %1775 = vsyncadd [#allocation10], 4294966672 }
  0x28   :  { %1776 = dma.done.wait [#allocation13], 272  }
  0x29   :  { %1777 = vsyncadd [#allocation13], 4294967024 }
  0x2a   :  { %1778 = dma.done.wait [#allocation16], 1536  }
  0x2b   :  { %1779 = vsyncadd [#allocation16], 4294965760 }
  0x2c   :  { %1780 = dma.done.wait [#allocation19], 768  }
  0x2d   :  { %1781 = vsyncadd [#allocation19], 4294966528  ;;  %vm202_vm0 = vcmask 130048   ;;  %vm264_vm1 = vcmask 195584   ;;  %v337_v0 = vld [vmem:[#allocation3 + $0x8] sm:$0xff]  ;;  %v201_v1 = vld [vmem:[#allocation6] sm:$0xff] }
  0x2e   :  { %v340_v2 = vsel %vm202_vm0, %v337_v0, 0.0  ;;  %v265_v3 = vsel %vm264_vm1, %v201_v1, 0.0  ;;  %v339_v4 = vld [vmem:[#allocation6 + $0x8] sm:$0xff]  ;;  %v463_v5 = vld [vmem:[#allocation6 + $0x10] sm:$0xff]  ;;  %v1800_v8 = vmov 16.0   ;;  %v1801_v9 = vmov 24.0  }
  0x2f   :  { %341 = vadd.xlane.f32.xlu0 %v340_v2  ;;  %266 = vadd.xlane.f32.xlu1 %v265_v3  ;;  %v396_v6 = vsel %vm264_vm1, %v339_v4, 0.0  ;;  %v520_v7 = vsel %vm264_vm1, %v463_v5, 0.0  ;;  %1472 = vrcp.f32 %v1800_v8  ;;  %v297_v42 = vld [vmem:[#allocation11 + $0x8] sm:$0xf]  ;;  %vm314_vm4 = vcmask 1043456   ;;  %v1408_v46 = vld [vmem:[#allocation11] sm:$0xff] }
  0x30   :  { %1474 = vrcp.f32 %v1801_v9  ;;  %v307_v43 = vunpack.c.l.b16 %v297_v42  ;;  %v1409_v47 = vld [vmem:[#allocation8 + $0x8] sm:$0xff]  ;;  %v422_v48 = vld [vmem:[#allocation11 + $0x14] sm:$0xf]  ;;  %v546_v53 = vld [vmem:[#allocation11 + $0x20] sm:$0xf]  ;;  %s1805_s6 = smov [#allocation20]  }
  0x31   :  { %v433_v49 = vunpack.c.l.b16 %v422_v48  ;;  %387 = vmatpush.bf16.msra.mxu2 %v1409_v47  ;;  %v1410_v52 = vld [vmem:[#allocation11 + $0xc] sm:$0xff]  ;;  %v557_v56 = vunpack.c.l.b16 %v546_v53  ;;  %v1412_v63 = vld [vmem:[#allocation11 + $0x18] sm:$0xff]  ;;  %s1260_s8 = sshll.u32 %s1805_s6, 4  ;;  %s1262_s20 = sshll.u32 %s2138_s13, 4  ;;  %s1261_s8 = int_to_ptr.vmem [resolvable:$true] %s1260_s8  ;;  %s1263_s20 = int_to_ptr.hbm [resolvable:$true] %s1262_s20 }
  0x32   :  { %v309_v44 = vpack.c.b16 %v307_v43, %v307_v43  ;;  %v1459_v47 = vld [vmem:[%s2130_s5] ss:$0 sm:$0xff] }
  0x33   :  { %v435_v50 = vpack.c.b16 %v433_v49, %v433_v49  ;;  %v559_v59 = vpack.c.b16 %v557_v56, %v557_v56 }
  0x34   :  { %v316_v45 = vsel %vm314_vm4, %v309_v44, 0 }
  0x35   :  { %v1473_v10 = vpop.eup %1472  ;;  %324 = vmatpush.bf16.msra.mxu1 %v316_v45  ;;  %v441_v51 = vsel %vm314_vm4, %v435_v50, 0  ;;  %v565_v62 = vsel %vm314_vm4, %v559_v59, 0  ;;  %v1414_v45 = vld [vmem:[#allocation12 + $0x8] sm:$0xff]  ;;  %vm334_vm4 = vcmask 261120  }
  0x36   :  { %v1475_v11 = vpop.eup %1474  ;;  %v207_v12 = vmul.f32 16.0, %v1473_v10  ;;  %vm211_vm2 = vweird.f32 %v1473_v10  ;;  %449 = vmatpush.bf16.msra.mxu3 %v441_v51  ;;  %573 = vmatpush.bf16.msrb.mxu2 %v565_v62 }
  0x37   :  { %397 = vadd.xlane.f32.xlu0 %v396_v6  ;;  %521 = vadd.xlane.f32.xlu1 %v520_v7  ;;  %v269_v13 = vmul.f32 24.0, %v1475_v11  ;;  %vm273_vm3 = vweird.f32 %v1475_v11 }
  0x38   :  { %v208_v14 = vsub.f32 1.0, %v207_v12 }
  0x39   :  { %v270_v15 = vsub.f32 1.0, %v269_v13  ;;  %325 = vmatpush.bf16.msra.mxu1 %v1408_v46  ;;  %v1413_v46 = vld [vmem:[#allocation12] sm:$0xff] }
  0x3a   :  { %v209_v16 = vmul.f32 %v1473_v10, %v208_v14  ;;  %450 = vmatpush.bf16.msra.mxu3 %v1410_v52  ;;  %574 = vmatpush.bf16.msrb.mxu2 %v1412_v63  ;;  %v1461_v52 = vld [vmem:[%s2130_s5 + $0x1] ss:$0 sm:$0xff] }
  0x3b   :  { %v271_v17 = vmul.f32 %v1475_v11, %v270_v15 }
  0x3c   :  { %v210_v18 = vadd.f32 %v1473_v10, %v209_v16 }
  0x3d   :  { %v272_v19 = vadd.f32 %v1475_v11, %v271_v17  ;;  %621 = vmatpush.bf16.msrb.mxu1 %v1414_v45 }
  0x3e   :  { %v1934_v20 = vsel %vm211_vm2, %v1473_v10, %v210_v18 }
  0x3f   :  { %v274_v21 = vsel %vm273_vm3, %v1475_v11, %v272_v19 }
  0x41   :  { %622 = vmatpush.bf16.msrb.mxu1 %v1413_v46 }
  0xa2   :  { %v342_v22 = vpop.xlane.xlu0 %341  ;;  %v267_v23 = vpop.xlane.xlu1 %266 }
  0xa3   :  { %v343_v24 = vmul.f32 %v342_v22, %v1934_v20  ;;  %v275_v25 = vmul.f32 %v274_v21, %v267_v23 }
  0xa5   :  { %v1937_v26 = vsub.f32 %v337_v0, %v343_v24  ;;  %v1939_v27 = vsub.f32 %v201_v1, %v275_v25 }
  0xa7   :  { %v345_v28 = vmul.f32 %v1937_v26, %v1937_v26  ;;  %v277_v29 = vmul.f32 %v1939_v27, %v1939_v27 }
  0xa9   :  { %v346_v30 = vsel %vm202_vm0, %v345_v28, 0.0  ;;  %v278_v31 = vsel %vm264_vm1, %v277_v29, 0.0 }
  0xaa   :  { %347 = vadd.xlane.f32.xlu2 %v346_v30  ;;  %v398_v32 = vpop.xlane.xlu0 %397  ;;  %279 = vadd.xlane.f32.xlu0 %v278_v31  ;;  %v522_v33 = vpop.xlane.xlu1 %521 }
  0xab   :  { %v399_v34 = vmul.f32 %v398_v32, %v274_v21  ;;  %v523_v35 = vmul.f32 %v522_v33, %v274_v21 }
  0xad   :  { %v1947_v36 = vsub.f32 %v339_v4, %v399_v34  ;;  %v1949_v37 = vsub.f32 %v463_v5, %v523_v35 }
  0xaf   :  { %v401_v38 = vmul.f32 %v1947_v36, %v1947_v36  ;;  %v525_v39 = vmul.f32 %v1949_v37, %v1949_v37 }
  0xb1   :  { %v402_v40 = vsel %vm264_vm1, %v401_v38, 0.0  ;;  %v526_v41 = vsel %vm264_vm1, %v525_v39, 0.0 }
  0xb2   :  { %403 = vadd.xlane.f32.xlu2 %v402_v40  ;;  %527 = vadd.xlane.f32.xlu1 %v526_v41 }
 0x11d   :  { %v348_v54 = vpop.xlane.xlu2 %347  ;;  %v280_v55 = vpop.xlane.xlu0 %279 }
 0x11e   :  { %v349_v57 = vmul.f32 %v348_v54, %v1934_v20  ;;  %v281_v58 = vmul.f32 %v280_v55, %v274_v21 }
 0x120   :  { %v350_v60 = vadd.f32 1e-05, %v349_v57  ;;  %v282_v61 = vadd.f32 1e-05, %v281_v58  ;;  %v1462_v58 = vld [vmem:[%s2130_s5 + $0x2] ss:$0 sm:$0xff] }
 0x121   :  { %s1804_s5 = smov 96  }
 0x122   :  { %1476 = vrsqrt.f32 %v350_v60  ;;  %vm289_vm5 = vweird.f32 %v282_v61  ;;  %vm357_vm8 = vweird.f32 %v350_v60 }
 0x123   :  { %1478 = vrsqrt.f32 %v282_v61 }
 0x125   :  { %v404_v0 = vpop.xlane.xlu2 %403  ;;  %v528_v1 = vpop.xlane.xlu1 %527 }
 0x126   :  { %v405_v2 = vmul.f32 %v404_v0, %v274_v21  ;;  %v529_v3 = vmul.f32 %v528_v1, %v274_v21 }
 0x128   :  { %v1477_v4 = vpop.eup %1476  ;;  %v406_v5 = vadd.f32 1e-05, %v405_v2  ;;  %v530_v6 = vadd.f32 1e-05, %v529_v3 }
 0x129   :  { %v1479_v7 = vpop.eup %1478  ;;  %v352_v8 = vmul.f32 %v1477_v4, %v350_v60  ;;  %vm358_vm7 = vweird.f32 %v1477_v4 }
 0x12a   :  { %v284_v9 = vmul.f32 %v1479_v7, %v282_v61  ;;  %1480 = vrsqrt.f32 %v406_v5  ;;  %vm290_vm6 = vweird.f32 %v1479_v7  ;;  %vm359_vm10 = vmor %vm357_vm8, %vm358_vm7  ;;  %vm413_vm12 = vweird.f32 %v406_v5 }
 0x12b   :  { %v353_v10 = vmul.f32 %v1477_v4, %v352_v8  ;;  %1482 = vrsqrt.f32 %v530_v6  ;;  %vm291_vm9 = vmor %vm289_vm5, %vm290_vm6  ;;  %vm537_vm13 = vweird.f32 %v530_v6 }
 0x12c   :  { %v285_v11 = vmul.f32 %v1479_v7, %v284_v9 }
 0x12d   :  { %v354_v12 = vmul.f32 0.5, %v353_v10 }
 0x12e   :  { %v286_v13 = vmul.f32 0.5, %v285_v11 }
 0x12f   :  { %v355_v14 = vsub.f32 1.5, %v354_v12 }
 0x130   :  { %v1481_v15 = vpop.eup %1480  ;;  %v287_v16 = vsub.f32 1.5, %v286_v13 }
 0x131   :  { %v1483_v17 = vpop.eup %1482  ;;  %v408_v18 = vmul.f32 %v1481_v15, %v406_v5  ;;  %v356_v19 = vmul.f32 %v1477_v4, %v355_v14  ;;  %vm414_vm11 = vweird.f32 %v1481_v15 }
 0x132   :  { %v532_v21 = vmul.f32 %v1483_v17, %v530_v6  ;;  %v288_v22 = vmul.f32 %v1479_v7, %v287_v16  ;;  %vm538_vm14 = vweird.f32 %v1483_v17  ;;  %vm415_vm15 = vmor %vm413_vm12, %vm414_vm11  ;;  %v1463_v6 = vld [vmem:[#allocation14] ss:$0 sm:$0xff] }
 0x133   :  { %v409_v23 = vmul.f32 %v1481_v15, %v408_v18  ;;  %v360_v24 = vsel %vm359_vm10, %v1477_v4, %v356_v19  ;;  %vm539_vm2 = vmor %vm537_vm13, %vm538_vm14  ;;  %vm668_vm10 = vcmask 15360  }
 0x134   :  { %v533_v25 = vmul.f32 %v1483_v17, %v532_v21  ;;  %v292_v28 = vsel %vm291_vm9, %v1479_v7, %v288_v22  ;;  %v361_v29 = vmul.f32 %v360_v24, %v1937_v26  ;;  %vm666_vm9 = vcmask 7168  }
 0x135   :  { %v410_v30 = vmul.f32 0.5, %v409_v23  ;;  %v293_v31 = vmul.f32 %v292_v28, %v1939_v27 }
 0x136   :  { %v534_v32 = vmul.f32 0.5, %v533_v25  ;;  %v362_v33 = vpack.c.bf16 %v361_v29, %v361_v29 }
 0x137   :  { %v411_v34 = vsub.f32 1.5, %v410_v30  ;;  %v294_v35 = vpack.c.bf16 %v293_v31, %v293_v31 }
 0x138   :  { %v535_v38 = vsub.f32 1.5, %v534_v32  ;;  %1294 = vmatmul.msk.bf16.vlgmr.msra.gmra.mxu2 %vm202_vm0, %v362_v33  ;;  %v200_v32 = vld [vmem:[#allocation3] sm:$0xff] }
 0x139   :  { %1289 = vmatmul.msk.bf16.vlgmr.msra.gmra.mxu1 %vm264_vm1, %v294_v35  ;;  %v412_v39 = vmul.f32 %v1481_v15, %v411_v34  ;;  %v203_v33 = vsel %vm202_vm0, %v200_v32, 0.0 }
 0x13a   :  { %v536_v40 = vmul.f32 %v1483_v17, %v535_v38  ;;  %v461_v38 = vld [vmem:[#allocation3 + $0x10] sm:$0xff] }
 0x13b   :  { %v416_v26 = vsel %vm415_vm15, %v1481_v15, %v412_v39  ;;  %v464_v39 = vsel %vm202_vm0, %v461_v38, 0.0 }
 0x13c   :  { %v417_v27 = vmul.f32 %v416_v26, %v1947_v36  ;;  %v540_v42 = vsel %vm539_vm2, %v1483_v17, %v536_v40 }
 0x13d   :  { %v541_v43 = vmul.f32 %v540_v42, %v1949_v37 }
 0x13e   :  { %v418_v41 = vpack.c.bf16 %v417_v27, %v417_v27 }
 0x13f   :  { %v542_v44 = vpack.c.bf16 %v541_v43, %v541_v43 }
 0x140   :  { %1300 = vmatmul.msk.bf16.vlgmr.msra.gmra.mxu3 %vm264_vm1, %v418_v41 }
 0x148   :  { %1311 = vmatmul.msk.bf16.vlgmr.msrb.gmra.mxu2 %vm264_vm1, %v542_v44 }
 0x1b6   :  { %v327_v48 = vpop.f32.mrf.mxu1 }
 0x1b7   :  { %v328_v49 = vadd.f32 %v1459_v47, %v327_v48 }
 0x1b9   :  { %vm331_vm3 = vcmp.ge.f32.partialorder %v328_v49, 0.0  ;;  %v332_v36 = vmul.f32 0.01, %v328_v49 }
 0x1bb   :  { %v333_v50 = vsel %vm331_vm3, %v328_v49, %v332_v36  ;;  %v1972_v51 = vpop.f32.mrf.mxu2 }
 0x1bc   :  { %335 = vst.msk [vmem:[#allocation2] sm:$0xff] %vm334_vm4, %v333_v50 }
 0x1be   :  { %v329_v37 = vpop.f32.mrf.mxu1 }
 0x1c3   :  { %v391_v53 = vpop.f32.mrf.mxu2  ;;  %v452_v54 = vpop.f32.mrf.mxu3  ;;  %v584_v0 = vld [vmem:[#allocation2] sm:$0xff] }
 0x1c4   :  { %v453_v55 = vadd.f32 %v1461_v52, %v452_v54 }
 0x1c6   :  { %vm456_vm1 = vcmp.ge.f32.partialorder %v453_v55, 0.0  ;;  %v457_v56 = vmul.f32 0.01, %v453_v55 }
 0x1c8   :  { %v458_v57 = vsel %vm456_vm1, %v453_v55, %v457_v56 }
 0x1c9   :  { %459 = vst.msk [vmem:[#allocation2 + $0x8] sm:$0xff] %vm334_vm4, %v458_v57 }
 0x1cb   :  { %v454_v59 = vpop.f32.mrf.mxu3  ;;  %v576_v60 = vpop.f32.mrf.mxu2 }
 0x1cc   :  { %v577_v61 = vadd.f32 %v1462_v58, %v576_v60 }
 0x1ce   :  { %vm580_vm5 = vcmp.ge.f32.partialorder %v577_v61, 0.0  ;;  %v581_v62 = vmul.f32 0.01, %v577_v61 }
 0x1d0   :  { %v582_v63 = vsel %vm580_vm5, %v577_v61, %v581_v62  ;;  %v585_v1 = vld [vmem:[#allocation2 + $0x8] sm:$0xff] }
 0x1d1   :  { %583 = vst.msk [vmem:[#allocation2 + $0x10] sm:$0xff] %vm334_vm4, %v582_v63  ;;  %v587_v2 = vpack.c.bf16 %v585_v1, %v584_v0 }
 0x1d3   :  { %v578_v3 = vpop.f32.mrf.mxu2  ;;  %1320 = vmatmul.msk.bf16.vlgmr.msrb.gmra.mxu1 %vm334_vm4, %v587_v2 }
 0x1d8   :  { %v586_v4 = vld [vmem:[#allocation2 + $0x10] sm:$0xff] }
 0x1d9   :  { %v588_v5 = vpack.c.bf16 %v586_v4, %v586_v4 }
 0x1e3   :  { %1321 = vmatmul.msk.bf16.gmra.mxu1 %vm334_vm4, %v588_v5  ;;  %v1407_v5 = vld [vmem:[#allocation8] sm:$0xff] }
 0x1e4   :  { %255 = vmatpush.bf16.msra.mxu0 %v1407_v5 }
 0x250   :  { %v624_v7 = vpop.f32.mrf.mxu1 }
 0x251   :  { %v1985_v8 = vadd.f32 %v1463_v6, %v624_v7 }
 0x253   :  { %849 = vrot.lane.b32.xlu1 %v1985_v8, %s1791_s27  ;;  %v636_v14 = vmul.f32 0.01, %v1985_v8  ;;  %vm633_vm6 = vcmp.ge.f32.partialorder %v1985_v8, 0.0 }
 0x255   :  { %v639_v17 = vsel %vm633_vm6, %v1985_v8, %v636_v14 }
 0x258   :  { %v626_v9 = vpop.f32.mrf.mxu1 }
 0x259   :  { %v1989_v10 = vadd.f32 %v1463_v6, %v626_v9 }
 0x25b   :  { %643 = vrot.lane.b32.xlu2 %v1989_v10, %s1791_s27  ;;  %v637_v22 = vmul.f32 0.01, %v1989_v10  ;;  %vm634_vm8 = vcmp.ge.f32.partialorder %v1989_v10, 0.0 }
 0x25d   :  { %v640_v24 = vsel %vm634_vm8, %v1989_v10, %v637_v22 }
 0x260   :  { %v629_v11 = vpop.f32.mrf.mxu1 }
 0x261   :  { %v1993_v12 = vadd.f32 %v1463_v6, %v629_v11 }
 0x263   :  { %655 = vrot.lane.b32.xlu0 %v1993_v12, %s1791_s27  ;;  %v638_v15 = vmul.f32 0.01, %v1993_v12  ;;  %vm635_vm7 = vcmp.ge.f32.partialorder %v1993_v12, 0.0 }
 0x265   :  { %v641_v18 = vsel %vm635_vm7, %v1993_v12, %v638_v15 }
 0x268   :  { %v631_v13 = vpop.f32.mrf.mxu1 }
 0x2b5   :  { %v644_v16 = vpop.permute.xlu2 %643 }
 0x2b6   :  { %v646_v19 = vmul.f32 %v644_v16, %v639_v17  ;;  %v1062_v21 = vmul.f32 %v644_v16, %v641_v18  ;;  %v1411_v16 = vld [vmem:[#allocation8 + $0x10] sm:$0xff] }
 0x2b7   :  { %511 = vmatpush.bf16.msrb.mxu0 %v1411_v16 }
 0x2b8   :  { %648 = vrot.lane.b32.xlu2 %v646_v19, %s1791_s27  ;;  %1064 = vrot.lane.b32.xlu1 %v1062_v21, %s1791_s27 }
 0x2c5   :  { %v850_v23 = vpop.permute.xlu1 %849 }
 0x2c6   :  { %v852_v25 = vmul.f32 %v850_v23, %v640_v24  ;;  %v1054_v28 = vmul.f32 %v850_v23, %v641_v18 }
 0x2c8   :  { %854 = vrot.lane.b32.xlu2 %v852_v25, %s1791_s27 }
 0x2d0   :  { %1056 = vrot.lane.b32.xlu2 %v1054_v28, %s1791_s27 }
 0x2d5   :  { %v656_v29 = vpop.permute.xlu0 %655 }
 0x2d6   :  { %v658_v30 = vmul.f32 %v656_v29, %v639_v17  ;;  %v860_v31 = vmul.f32 %v656_v29, %v640_v24 }
 0x2d8   :  { %660 = vrot.lane.b32.xlu0 %v658_v30, %s1791_s27  ;;  %862 = vrot.lane.b32.xlu1 %v860_v31, %s1791_s27 }
 0x302   :  { %204 = vadd.xlane.f32.xlu0 %v203_v33 }
 0x312   :  { %v649_v34 = vpop.permute.xlu2 %648 }
 0x313   :  { %v651_v35 = vsel %vm334_vm4, %v649_v34, 0.0 }
 0x314   :  { %652 = vadd.xlane.f32.xlu2 %v651_v35 }
 0x31c   :  { %465 = vadd.xlane.f32.xlu2 %v464_v39 }
 0x322   :  { %v855_v40 = vpop.permute.xlu2 %854 }
 0x323   :  { %v857_v26 = vsel %vm334_vm4, %v855_v40, 0.0 }
 0x324   :  { %858 = vadd.xlane.f32.xlu0 %v857_v26 }
 0x32a   :  { %v1065_v27 = vpop.permute.xlu1 %1064  ;;  %v1057_v46 = vpop.permute.xlu2 %1056 }
 0x32b   :  { %v1067_v41 = vsel %vm334_vm4, %v1065_v27, 0.0  ;;  %v1059_v47 = vsel %vm334_vm4, %v1057_v46, 0.0 }
 0x32c   :  { %1068 = vadd.xlane.f32.xlu2 %v1067_v41 }
 0x34a   :  { %v661_v42 = vpop.permute.xlu0 %660  ;;  %v863_v43 = vpop.permute.xlu1 %862 }
 0x34b   :  { %v663_v44 = vsel %vm334_vm4, %v661_v42, 0.0  ;;  %v865_v45 = vsel %vm334_vm4, %v863_v43, 0.0 }
 0x34c   :  { %664 = vadd.xlane.f32.xlu1 %v663_v44  ;;  %866 = vadd.xlane.f32.xlu0 %v865_v45 }
 0x354   :  { %1060 = vadd.xlane.f32.xlu0 %v1059_v47 }
 0x375   :  { %v205_v48 = vpop.xlane.xlu0 %204 }
 0x376   :  { %v213_v49 = vmul.f32 %v1934_v20, %v205_v48 }
 0x378   :  { %v214_v36 = vsub.f32 %v200_v32, %v213_v49 }
 0x37a   :  { %v215_v50 = vmul.f32 %v214_v36, %v214_v36 }
 0x37c   :  { %v216_v37 = vsel %vm202_vm0, %v215_v50, 0.0 }
 0x37d   :  { %217 = vadd.xlane.f32.xlu1 %v216_v37 }
 0x387   :  { %v653_v52 = vpop.xlane.xlu2 %652 }
 0x38f   :  { %v466_v53 = vpop.xlane.xlu2 %465 }
 0x390   :  { %v467_v54 = vmul.f32 %v466_v53, %v1934_v20  ;;  %v1803_v53 = vmov 0  }
 0x391   :  { %1457 = vset.pattern.permute.xlu1 %v1803_v53  ;;  %1455 = vset.pattern.permute.xlu0 %v1803_v53 }
 0x392   :  { %v468_v55 = vsub.f32 %v461_v38, %v467_v54 }
 0x394   :  { %v469_v56 = vmul.f32 %v468_v55, %v468_v55 }
 0x396   :  { %v470_v57 = vsel %vm202_vm0, %v469_v56, 0.0 }
 0x397   :  { %471 = vadd.xlane.f32.xlu2 %v470_v57  ;;  %v859_v58 = vpop.xlane.xlu0 %858 }
 0x39f   :  { %v1069_v1 = vpop.xlane.xlu2 %1068 }
 0x3bf   :  { %v665_v59 = vpop.xlane.xlu1 %664  ;;  %v867_v60 = vpop.xlane.xlu0 %866 }
 0x3c0   :  { %v667_v61 = vsel %vm666_vm9, %v653_v52, %v665_v59  ;;  %v868_v62 = vsel %vm666_vm9, %v859_v58, %v867_v60  ;;  %v1802_v52 = vmov 1  }
 0x3c1   :  { %v669_v63 = vsel %vm668_vm10, %v667_v61, -inf  ;;  %v869_v0 = vsel %vm668_vm10, %v868_v62, -inf  ;;  %1456 = vset.pattern.permute.xlu2 %v1802_v52 }
 0x3c2   :  { %670 = vmax.xlane.f32.xlu1 %v669_v63  ;;  %870 = vmax.xlane.f32.xlu0 %v869_v0 }
 0x3c7   :  { %v1061_v2 = vpop.xlane.xlu0 %1060 }
 0x3c8   :  { %v1070_v3 = vsel %vm666_vm9, %v1061_v2, %v1069_v1 }
 0x3c9   :  { %v1071_v4 = vsel %vm668_vm10, %v1070_v3, -inf }
 0x3ca   :  { %1072 = vmax.xlane.f32.xlu1 %v1071_v4 }
 0x3f0   :  { %v218_v6 = vpop.xlane.xlu1 %217 }
 0x3f1   :  { %v219_v7 = vmul.f32 %v218_v6, %v1934_v20 }
 0x3f3   :  { %v220_v9 = vadd.f32 1e-05, %v219_v7 }
 0x3f5   :  { %1484 = vrsqrt.f32 %v220_v9  ;;  %vm227_vm11 = vweird.f32 %v220_v9 }
 0x3fb   :  { %v1485_v11 = vpop.eup %1484 }
 0x3fc   :  { %v222_v13 = vmul.f32 %v1485_v11, %v220_v9  ;;  %vm228_vm12 = vweird.f32 %v1485_v11 }
 0x3fd   :  { %vm229_vm13 = vmor %vm227_vm11, %vm228_vm12 }
 0x3fe   :  { %v223_v14 = vmul.f32 %v1485_v11, %v222_v13 }
 0x400   :  { %v224_v15 = vmul.f32 0.5, %v223_v14 }
 0x402   :  { %v225_v17 = vsub.f32 1.5, %v224_v15 }
 0x404   :  { %v226_v18 = vmul.f32 %v1485_v11, %v225_v17 }
 0x406   :  { %v230_v19 = vsel %vm229_vm13, %v1485_v11, %v226_v18 }
 0x407   :  { %v231_v21 = vmul.f32 %v230_v19, %v214_v36  ;;  %v1464_v19 = vld [vmem:[#allocation9] ss:$0 sm:$0xff] }
 0x409   :  { %v232_v22 = vpack.c.bf16 %v231_v21, %v231_v21  ;;  %v1460_v21 = vld [vmem:[#allocation9 + $0x1] ss:$0 sm:$0xff] }
 0x40a   :  { %v472_v23 = vpop.xlane.xlu2 %471 }
 0x40b   :  { %v473_v24 = vmul.f32 %v472_v23, %v1934_v20  ;;  %1284 = vmatmul.msk.bf16.vlgmr.msra.gmra.mxu0 %vm202_vm0, %v232_v22  ;;  %v390_v23 = vadd.f32 %v1460_v21, %v1972_v51 }
 0x40d   :  { %v474_v25 = vadd.f32 1e-05, %v473_v24  ;;  %vm393_vm3 = vcmp.ge.f32.partialorder %v390_v23, 0.0 }
 0x40f   :  { %1486 = vrsqrt.f32 %v474_v25  ;;  %vm481_vm14 = vweird.f32 %v474_v25 }
 0x415   :  { %v1487_v28 = vpop.eup %1486 }
 0x416   :  { %v476_v29 = vmul.f32 %v1487_v28, %v474_v25  ;;  %vm482_vm15 = vweird.f32 %v1487_v28 }
 0x417   :  { %vm483_vm2 = vmor %vm481_vm14, %vm482_vm15 }
 0x418   :  { %v477_v30 = vmul.f32 %v1487_v28, %v476_v29 }
 0x41a   :  { %v478_v31 = vmul.f32 0.5, %v477_v30 }
 0x41c   :  { %v479_v32 = vsub.f32 1.5, %v478_v31  ;;  %v1465_v31 = vld [vmem:[#allocation9 + $0x2] ss:$0 sm:$0xff] }
 0x41e   :  { %v480_v33 = vmul.f32 %v1487_v28, %v479_v32 }
 0x420   :  { %v484_v34 = vsel %vm483_vm2, %v1487_v28, %v480_v33  ;;  %v394_v28 = vmul.f32 0.01, %v390_v23 }
 0x421   :  { %v485_v35 = vmul.f32 %v484_v34, %v468_v55 }
 0x422   :  { %v395_v29 = vsel %vm393_vm3, %v390_v23, %v394_v28 }
 0x423   :  { %v486_v38 = vpack.c.bf16 %v485_v35, %v485_v35 }
 0x425   :  { %1305 = vmatmul.msk.bf16.vlgmr.msrb.gmra.mxu0 %vm202_vm0, %v486_v38 }
 0x435   :  { %v671_v39 = vpop.xlane.xlu1 %670  ;;  %v871_v20 = vpop.xlane.xlu0 %870 }
 0x436   :  { %v672_v40 = vsub.f32 %v667_v61, %v671_v39  ;;  %v872_v26 = vsub.f32 %v868_v62, %v871_v20 }
 0x438   :  { %v673_v27 = vmul.f32 1.442695, %v672_v40  ;;  %v873_v41 = vmul.f32 1.442695, %v872_v26 }
 0x43a   :  { %1488 = vpow2.f32 %v673_v27 }
 0x43b   :  { %1490 = vpow2.f32 %v873_v41 }
 0x43d   :  { %v1073_v42 = vpop.xlane.xlu1 %1072 }
 0x43e   :  { %v1074_v43 = vsub.f32 %v1070_v3, %v1073_v42 }
 0x440   :  { %v1489_v44 = vpop.eup %1488  ;;  %v1075_v45 = vmul.f32 1.442695, %v1074_v43 }
 0x441   :  { %v1491_v46 = vpop.eup %1490  ;;  %v675_v47 = vsel %vm668_vm10, %v1489_v44, 0.0 }
 0x442   :  { %1492 = vpow2.f32 %v1075_v45  ;;  %676 = vadd.xlane.f32.xlu0 %v675_v47  ;;  %v875_v48 = vsel %vm668_vm10, %v1491_v46, 0.0 }
 0x443   :  { %876 = vadd.xlane.f32.xlu2 %v875_v48 }
 0x448   :  { %v1493_v49 = vpop.eup %1492 }
 0x449   :  { %v1077_v36 = vsel %vm668_vm10, %v1493_v49, 0.0 }
 0x44a   :  { %1078 = vadd.xlane.f32.xlu1 %v1077_v36 }
 0x488   :  { %v257_v50 = vpop.f32.mrf.mxu0 }
 0x490   :  { %v259_v37 = vpop.f32.mrf.mxu0 }
 0x4a2   :  { %v513_v54 = vpop.f32.mrf.mxu0 }
 0x4a3   :  { %v514_v32 = vadd.f32 %v1465_v31, %v513_v54 }
 0x4a5   :  { %v518_v35 = vmul.f32 0.01, %v514_v32  ;;  %vm517_vm1 = vcmp.ge.f32.partialorder %v514_v32, 0.0 }
 0x4a7   :  { %v519_v39 = vsel %vm517_vm1, %v514_v32, %v518_v35 }
 0x4a8   :  { %v1094_v20 = vsel %vm334_vm4, %v519_v39, 0.0 }
 0x4aa   :  { %v515_v55 = vpop.f32.mrf.mxu0 }
 0x4b5   :  { %v677_v56 = vpop.xlane.xlu0 %676 }
 0x4b6   :  { %v877_v57 = vpop.xlane.xlu2 %876  ;;  %1494 = vrcp.f32 %v677_v56 }
 0x4b7   :  { %1496 = vrcp.f32 %v877_v57 }
 0x4bc   :  { %v1495_v58 = vpop.eup %1494 }
 0x4bd   :  { %v1497_v59 = vpop.eup %1496  ;;  %v1079_v60 = vpop.xlane.xlu1 %1078  ;;  %v679_v61 = vmul.f32 %v1495_v58, %v1489_v44 }
 0x4be   :  { %1498 = vrcp.f32 %v1079_v60  ;;  %v879_v62 = vmul.f32 %v1497_v59, %v1491_v46 }
 0x4bf   :  { %687 = vperm.xlu2 %1456, %v679_v61   ;;  %682 = vperm.xlu0 %1455, %v679_v61  }
 0x4c0   :  { %882 = vperm.xlu1 %1457, %v879_v62  }
 0x4c4   :  { %v1499_v63 = vpop.eup %1498 }
 0x4c5   :  { %v1081_v0 = vmul.f32 %v1499_v63, %v1493_v49 }
 0x4c7   :  { %887 = vperm.xlu2 %1456, %v879_v62   ;;  %1458 = vset.pattern.permute.xlu0 %v1802_v52 }
 0x4c8   :  { %1084 = vperm.xlu1 %1457, %v1081_v0  }
 0x4cf   :  { %1089 = vperm.xlu2 %1456, %v1081_v0  }
 0x519   :  { %v688_v1 = vpop.permute.xlu2 %687 }
 0x51a   :  { %v690_v4 = vmul.f32 %v688_v1, %v1993_v12 }
 0x521   :  { %v888_v2 = vpop.permute.xlu2 %887 }
 0x522   :  { %v890_v7 = vmul.f32 %v888_v2, %v1993_v12  ;;  %v258_v12 = vadd.f32 %v1464_v19, %v257_v50 }
 0x524   :  { %v262_v22 = vmul.f32 0.01, %v258_v12  ;;  %vm261_vm0 = vcmp.ge.f32.partialorder %v258_v12, 0.0 }
 0x526   :  { %v263_v24 = vsel %vm261_vm0, %v258_v12, %v262_v22  ;;  %v1422_v12 = vld [vmem:[#allocation15 + $0x18] sm:$0xff]  ;;  %v1421_v22 = vld [vmem:[#allocation15 + $0x10] sm:$0xff] }
 0x527   :  { %v692_v25 = vsel %vm334_vm4, %v263_v24, 0.0 }
 0x529   :  { %v1090_v14 = vpop.permute.xlu2 %1089 }
 0x52a   :  { %v1092_v16 = vmul.f32 %v1090_v14, %v1989_v10 }
 0x531   :  { %v683_v3 = vpop.permute.xlu0 %682 }
 0x532   :  { %v883_v5 = vpop.permute.xlu1 %882  ;;  %v685_v6 = vmul.f32 %v683_v3, %v1989_v10  ;;  %v892_v10 = vsel %vm334_vm4, %v395_v29, 0.0 }
 0x533   :  { %v885_v9 = vmul.f32 %v883_v5, %v1985_v8 }
 0x534   :  { %v691_v11 = vadd.f32 %v690_v4, %v685_v6  ;;  %v1416_v6 = vld [vmem:[#allocation15 + $0x8] sm:$0xff] }
 0x535   :  { %v891_v13 = vadd.f32 %v890_v7, %v885_v9  ;;  %795 = vmatpush.bf16.msra.mxu0 %v1416_v6  ;;  %v1415_v9 = vld [vmem:[#allocation15] sm:$0xff] }
 0x536   :  { %696 = vrot.lane.b32.xlu1 %v691_v11, %s1804_s5 }
 0x537   :  { %896 = vrot.lane.b32.xlu0 %v891_v13, %s1804_s5 }
 0x539   :  { %796 = vmatpush.bf16.msra.mxu0 %v1415_v9 }
 0x53a   :  { %v1085_v15 = vpop.permute.xlu1 %1084 }
 0x53b   :  { %v1087_v17 = vmul.f32 %v1085_v15, %v1985_v8 }
 0x53d   :  { %v1093_v18 = vadd.f32 %v1092_v16, %v1087_v17  ;;  %997 = vmatpush.bf16.msrb.mxu0 %v1422_v12 }
 0x53f   :  { %1098 = vrot.lane.b32.xlu2 %v1093_v18, %s1804_s5 }
 0x541   :  { %998 = vmatpush.bf16.msrb.mxu0 %v1421_v22 }
 0x560   :  { %693 = vadd.xlane.f32.xlu1 %v692_v25 }
 0x568   :  { %893 = vadd.xlane.f32.xlu2 %v892_v10 }
 0x599   :  { %v1099_v8 = vpop.permute.xlu2 %1098 }
 0x59a   :  { %v1101_v30 = vsel %vm334_vm4, %v1099_v8, 0.0  ;;  %v1430_v8 = vld [vmem:[#allocation17 + $0x28] sm:$0xff] }
 0x59b   :  { %1102 = vadd.xlane.f32.xlu2 %v1101_v30  ;;  %1171 = vmatpush.bf16.msra.mxu1 %v1430_v8 }
 0x5a8   :  { %v697_v33 = vpop.permute.xlu1 %696 }
 0x5a9   :  { %v897_v34 = vpop.permute.xlu0 %896  ;;  %v699_v51 = vsel %vm334_vm4, %v697_v33, 0.0  ;;  %v1429_v33 = vld [vmem:[#allocation17 + $0x20] sm:$0xff] }
 0x5aa   :  { %700 = vadd.xlane.f32.xlu0 %v699_v51  ;;  %v899_v38 = vsel %vm334_vm4, %v897_v34, 0.0  ;;  %1172 = vmatpush.bf16.msra.mxu1 %v1429_v33 }
 0x5ab   :  { %900 = vadd.xlane.f32.xlu1 %v899_v38 }
 0x5b2   :  { %1095 = vadd.xlane.f32.xlu0 %v1094_v20 }
 0x5d3   :  { %v694_v40 = vpop.xlane.xlu1 %693 }
 0x5db   :  { %v894_v26 = vpop.xlane.xlu2 %893 }
 0x60e   :  { %v1103_v49 = vpop.xlane.xlu2 %1102 }
 0x61d   :  { %v701_v27 = vpop.xlane.xlu0 %700 }
 0x61e   :  { %v901_v41 = vpop.xlane.xlu1 %900  ;;  %v702_v42 = vadd.f32 %v701_v27, %v694_v40 }
 0x61f   :  { %v902_v43 = vadd.f32 %v901_v41, %v894_v26 }
 0x620   :  { %v703_v44 = vmul.f32 0.015625, %v702_v42 }
 0x621   :  { %v903_v45 = vmul.f32 0.015625, %v902_v43 }
 0x622   :  { %v2050_v46 = vsub.f32 %v691_v11, %v703_v44  ;;  %v2065_v55 = vsub.f32 %v263_v24, %v703_v44 }
 0x623   :  { %v2052_v47 = vsub.f32 %v891_v13, %v903_v45  ;;  %v2069_v57 = vsub.f32 %v395_v29, %v903_v45 }
 0x624   :  { %v710_v48 = vmul.f32 %v2050_v46, %v2050_v46  ;;  %v706_v56 = vmul.f32 %v2065_v55, %v2065_v55 }
 0x625   :  { %v1096_v36 = vpop.xlane.xlu0 %1095  ;;  %v910_v50 = vmul.f32 %v2052_v47, %v2052_v47  ;;  %v906_v59 = vmul.f32 %v2069_v57, %v2069_v57 }
 0x626   :  { %v1104_v37 = vadd.f32 %v1103_v49, %v1096_v36  ;;  %712 = vrot.lane.b32.xlu1 %v710_v48, %s1804_s5  ;;  %v707_v58 = vsel %vm334_vm4, %v706_v56, 0.0 }
 0x627   :  { %912 = vrot.lane.b32.xlu0 %v910_v50, %s1804_s5  ;;  %v907_v60 = vsel %vm334_vm4, %v906_v59, 0.0 }
 0x628   :  { %v1105_v52 = vmul.f32 0.015625, %v1104_v37 }
 0x62a   :  { %v2060_v53 = vsub.f32 %v1093_v18, %v1105_v52  ;;  %v2076_v0 = vsub.f32 %v519_v39, %v1105_v52 }
 0x62c   :  { %v1112_v54 = vmul.f32 %v2060_v53, %v2060_v53  ;;  %v1108_v4 = vmul.f32 %v2076_v0, %v2076_v0 }
 0x62e   :  { %1114 = vrot.lane.b32.xlu2 %v1112_v54, %s1804_s5  ;;  %v1109_v5 = vsel %vm334_vm4, %v1108_v4, 0.0 }
 0x651   :  { %708 = vadd.xlane.f32.xlu0 %v707_v58 }
 0x657   :  { %908 = vadd.xlane.f32.xlu2 %v907_v60  ;;  %v1418_v60 = vld [vmem:[#allocation17 + $0x8] sm:$0xff] }
 0x658   :  { %767 = vmatpush.bf16.msrb.mxu3 %v1418_v60 }
 0x688   :  { %v1115_v61 = vpop.permute.xlu2 %1114 }
 0x689   :  { %v1117_v62 = vsel %vm334_vm4, %v1115_v61, 0.0  ;;  %v1417_v61 = vld [vmem:[#allocation17] sm:$0xff] }
 0x68a   :  { %1118 = vadd.xlane.f32.xlu2 %v1117_v62  ;;  %768 = vmatpush.bf16.msrb.mxu3 %v1417_v61  ;;  %v1424_v62 = vld [vmem:[#allocation17 + $0x18] sm:$0xff] }
 0x68e   :  { %969 = vmatpush.bf16.msra.mxu3 %v1424_v62 }
 0x698   :  { %v713_v63 = vpop.permute.xlu1 %712 }
 0x699   :  { %v913_v1 = vpop.permute.xlu0 %912  ;;  %v715_v2 = vsel %vm334_vm4, %v713_v63, 0.0  ;;  %v1423_v63 = vld [vmem:[#allocation17 + $0x10] sm:$0xff] }
 0x69a   :  { %716 = vadd.xlane.f32.xlu1 %v715_v2  ;;  %v915_v3 = vsel %vm334_vm4, %v913_v1, 0.0  ;;  %970 = vmatpush.bf16.msra.mxu3 %v1423_v63 }
 0x69b   :  { %916 = vadd.xlane.f32.xlu0 %v915_v3 }
 0x6a2   :  { %1110 = vadd.xlane.f32.xlu1 %v1109_v5 }
 0x6c4   :  { %v709_v7 = vpop.xlane.xlu0 %708 }
 0x6ca   :  { %v909_v11 = vpop.xlane.xlu2 %908 }
 0x6fd   :  { %v1119_v23 = vpop.xlane.xlu2 %1118 }
 0x70d   :  { %v717_v13 = vpop.xlane.xlu1 %716 }
 0x70e   :  { %v718_v14 = vadd.f32 %v717_v13, %v709_v7  ;;  %v917_v15 = vpop.xlane.xlu0 %916  ;;  %v1420_v13 = vld [vmem:[#allocation18 + $0x8] sm:$0xff] }
 0x70f   :  { %v918_v16 = vadd.f32 %v917_v15, %v909_v11  ;;  %840 = vmatpush.bf16.msra.mxu2 %v1420_v13 }
 0x710   :  { %v719_v17 = vmul.f32 0.015625, %v718_v14  ;;  %v1419_v14 = vld [vmem:[#allocation18] sm:$0xff] }
 0x711   :  { %v919_v18 = vmul.f32 0.015625, %v918_v16 }
 0x712   :  { %v720_v19 = vadd.f32 1e-05, %v719_v17  ;;  %v1426_v17 = vld [vmem:[#allocation18 + $0x18] sm:$0xff] }
 0x713   :  { %v920_v21 = vadd.f32 1e-05, %v919_v18  ;;  %841 = vmatpush.bf16.msra.mxu2 %v1419_v14  ;;  %v1425_v18 = vld [vmem:[#allocation18 + $0x10] sm:$0xff] }
 0x714   :  { %1500 = vrsqrt.f32 %v720_v19  ;;  %vm727_vm7 = vweird.f32 %v720_v19 }
 0x715   :  { %1502 = vrsqrt.f32 %v920_v21  ;;  %v1111_v24 = vpop.xlane.xlu1 %1110  ;;  %vm927_vm9 = vweird.f32 %v920_v21 }
 0x716   :  { %v1120_v25 = vadd.f32 %v1119_v23, %v1111_v24  ;;  %v1431_v24 = vld [vmem:[#allocation18 + $0x20] sm:$0xff] }
 0x717   :  { %1045 = vmatpush.bf16.msrb.mxu2 %v1426_v17 }
 0x718   :  { %v1121_v28 = vmul.f32 0.015625, %v1120_v25 }
 0x71a   :  { %v1501_v29 = vpop.eup %1500  ;;  %v1122_v10 = vadd.f32 1e-05, %v1121_v28 }
 0x71b   :  { %v1503_v30 = vpop.eup %1502  ;;  %v722_v31 = vmul.f32 %v1501_v29, %v720_v19  ;;  %vm728_vm5 = vweird.f32 %v1501_v29  ;;  %1046 = vmatpush.bf16.msrb.mxu2 %v1425_v18  ;;  %v1432_v19 = vld [vmem:[#allocation18 + $0x28] sm:$0xff] }
 0x71c   :  { %v922_v32 = vmul.f32 %v1503_v30, %v920_v21  ;;  %1504 = vrsqrt.f32 %v1122_v10  ;;  %vm928_vm6 = vweird.f32 %v1503_v30  ;;  %vm729_vm8 = vmor %vm727_vm7, %vm728_vm5  ;;  %vm1129_vm12 = vweird.f32 %v1122_v10 }
 0x71d   :  { %v723_v34 = vmul.f32 %v1501_v29, %v722_v31  ;;  %vm929_vm10 = vmor %vm927_vm9, %vm928_vm6 }
 0x71e   :  { %v923_v51 = vmul.f32 %v1503_v30, %v922_v32 }
 0x71f   :  { %v724_v35 = vmul.f32 0.5, %v723_v34 }
 0x720   :  { %v924_v38 = vmul.f32 0.5, %v923_v51 }
 0x721   :  { %v725_v39 = vsub.f32 1.5, %v724_v35  ;;  %v1468_v35 = vld [vmem:[%s2135_s10 + $0x2] ss:$0 sm:$0xff] }
 0x722   :  { %v1505_v20 = vpop.eup %1504  ;;  %v925_v40 = vsub.f32 1.5, %v924_v38 }
 0x723   :  { %v1124_v26 = vmul.f32 %v1505_v20, %v1122_v10  ;;  %v726_v27 = vmul.f32 %v1501_v29, %v725_v39  ;;  %vm1130_vm11 = vweird.f32 %v1505_v20  ;;  %v1467_v10 = vld [vmem:[%s2135_s10 + $0x1] ss:$0 sm:$0xff] }
 0x724   :  { %v926_v41 = vmul.f32 %v1503_v30, %v925_v40  ;;  %vm1131_vm13 = vmor %vm1129_vm12, %vm1130_vm11 }
 0x725   :  { %v1125_v42 = vmul.f32 %v1505_v20, %v1124_v26  ;;  %v730_v43 = vsel %vm729_vm8, %v1501_v29, %v726_v27 }
 0x726   :  { %v737_v44 = vmul.f32 %v730_v43, %v2050_v46  ;;  %v731_v45 = vmul.f32 %v730_v43, %v2065_v55  ;;  %v930_v48 = vsel %vm929_vm10, %v1503_v30, %v926_v41 }
 0x727   :  { %v1126_v49 = vmul.f32 0.5, %v1125_v42  ;;  %v938_v36 = vmul.f32 %v930_v48, %v2052_v47  ;;  %v931_v47 = vmul.f32 %v930_v48, %v2069_v57  ;;  %v1427_v57 = vld [vmem:[#allocation15 + $0x20] sm:$0xff] }
 0x728   :  { %v738_v50 = vpack.c.bf16 %v737_v44, %v737_v44  ;;  %v732_v37 = vpack.c.bf16 %v731_v45, %v731_v45  ;;  %v1469_v42 = vld [vmem:[%s2137_s12] ss:$0 sm:$0xff]  ;;  %v1470_v48 = vld [vmem:[%s2137_s12 + $0x1] ss:$0 sm:$0xff] }
 0x729   :  { %v1127_v52 = vsub.f32 1.5, %v1126_v49  ;;  %v939_v54 = vpack.c.bf16 %v938_v36, %v938_v36  ;;  %v932_v59 = vpack.c.bf16 %v931_v47, %v931_v47 }
 0x72a   :  { %744 = vrot.lane.b32.xlu0 %v738_v50, %s1804_s5  ;;  %1339 = vmatmul.msk.bf16.vlgmr.msra.gmra.mxu0 %vm334_vm4, %v732_v37  ;;  %v1471_v50 = vld [vmem:[%s2137_s12 + $0x2] ss:$0 sm:$0xff] }
 0x72b   :  { %946 = vrot.lane.b32.xlu1 %v939_v54, %s1804_s5  ;;  %v1128_v56 = vmul.f32 %v1505_v20, %v1127_v52  ;;  %1247 = vmatpush.bf16.msra.mxu0 %v1432_v19 }
 0x72d   :  { %v1132_v46 = vsel %vm1131_vm13, %v1505_v20, %v1128_v56 }
 0x72e   :  { %v1140_v55 = vmul.f32 %v1132_v46, %v2060_v53  ;;  %v1428_v53 = vld [vmem:[#allocation15 + $0x28] sm:$0xff]  ;;  %v1133_v6 = vmul.f32 %v1132_v46, %v2076_v0  ;;  %v1466_v0 = vld [vmem:[%s2135_s10] ss:$0 sm:$0xff] }
 0x72f   :  { %1248 = vmatpush.bf16.msra.mxu0 %v1431_v24 }
 0x730   :  { %v1141_v58 = vpack.c.bf16 %v1140_v55, %v1140_v55  ;;  %v1134_v9 = vpack.c.bf16 %v1133_v6, %v1133_v6 }
 0x732   :  { %1148 = vrot.lane.b32.xlu2 %v1141_v58, %s1804_s5 }
 0x73a   :  { %1366 = vmatmul.msk.bf16.vlgmr.msrb.gmra.mxu0 %vm334_vm4, %v932_v59 }
 0x78c   :  { %v1149_v1 = vpop.permute.xlu2 %1148 }
 0x78d   :  { %1386 = vmatmul.msk.bf16.vlgmr.msra.gmra.mxu1 %vm334_vm4, %v1149_v1 }
 0x79c   :  { %v745_v2 = vpop.permute.xlu0 %744 }
 0x79d   :  { %1330 = vmatmul.msk.bf16.vlgmr.msrb.gmra.mxu3 %vm334_vm4, %v745_v2  ;;  %v947_v4 = vpop.permute.xlu1 %946 }
 0x79e   :  { %1199 = vmatpush.bf16.msrb.mxu3 %v1428_v53 }
 0x7a2   :  { %1200 = vmatpush.bf16.msrb.mxu3 %v1427_v57 }
 0x7a7   :  { %v798_v3 = vpop.f32.mrf.mxu0 }
 0x7ad   :  { %1357 = vmatmul.msk.bf16.vlgmr.msra.gmra.mxu3 %vm334_vm4, %v947_v4 }
 0x7af   :  { %v800_v5 = vpop.f32.mrf.mxu0 }
 0x7b7   :  { %v1000_v7 = vpop.f32.mrf.mxu0 }
 0x7bd   :  { %1395 = vmatmul.msk.bf16.vlgmr.msrb.gmra.mxu3 %vm334_vm4, %v1134_v9 }
 0x7bf   :  { %v1002_v11 = vpop.f32.mrf.mxu0 }
 0x80a   :  { %v1174_v15 = vpop.f32.mrf.mxu1 }
 0x812   :  { %v1176_v16 = vpop.f32.mrf.mxu1 }
 0x820   :  { %v770_v12 = vpop.f32.mrf.mxu3 }
 0x821   :  { %v799_v21 = vadd.f32 %v798_v3, %v770_v12 }
 0x823   :  { %v806_v22 = vadd.f32 %v1466_v0, %v799_v21 }
 0x825   :  { %vm807_vm14 = vcmp.ge.f32.partialorder %v806_v22, 0.0  ;;  %v808_v23 = vmul.f32 0.01, %v806_v22 }
 0x827   :  { %v809_v25 = vsel %vm807_vm14, %v806_v22, %v808_v23 }
 0x828   :  { %v810_v28 = vpack.c.bf16 %v809_v25, %v809_v25  ;;  %v772_v29 = vpop.f32.mrf.mxu3 }
 0x82a   :  { %1348 = vmatmul.msk.bf16.vlgmr.msra.gmra.mxu2 %vm334_vm4, %v810_v28 }
 0x830   :  { %v972_v8 = vpop.f32.mrf.mxu3 }
 0x831   :  { %v1001_v30 = vadd.f32 %v1000_v7, %v972_v8 }
 0x833   :  { %v1009_v31 = vadd.f32 %v1467_v10, %v1001_v30 }
 0x835   :  { %vm1010_vm15 = vcmp.ge.f32.partialorder %v1009_v31, 0.0  ;;  %v1011_v32 = vmul.f32 0.01, %v1009_v31 }
 0x837   :  { %v1012_v33 = vsel %vm1010_vm15, %v1009_v31, %v1011_v32 }
 0x838   :  { %v1013_v34 = vpack.c.bf16 %v1012_v33, %v1012_v33  ;;  %v974_v51 = vpop.f32.mrf.mxu3 }
 0x83a   :  { %1377 = vmatmul.msk.bf16.vlgmr.msrb.gmra.mxu2 %vm334_vm4, %v1013_v34 }
 0x840   :  { %v1202_v38 = vpop.f32.mrf.mxu3 }
 0x841   :  { %v1203_v39 = vadd.f32 %v1202_v38, %v1174_v15 }
 0x843   :  { %v1211_v20 = vadd.f32 %v1468_v35, %v1203_v39 }
 0x845   :  { %vm1212_vm2 = vcmp.ge.f32.partialorder %v1211_v20, 0.0  ;;  %v1213_v40 = vmul.f32 0.01, %v1211_v20 }
 0x847   :  { %v1214_v26 = vsel %vm1212_vm2, %v1211_v20, %v1213_v40 }
 0x848   :  { %v1215_v27 = vpack.c.bf16 %v1214_v26, %v1214_v26  ;;  %v1204_v41 = vpop.f32.mrf.mxu3 }
 0x84a   :  { %1406 = vmatmul.msk.bf16.vlgmr.msra.gmra.mxu0 %vm334_vm4, %v1215_v27 }
 0x8ad   :  { %v843_v43 = vpop.f32.mrf.mxu2 }
 0x8ae   :  { %v844_v44 = vadd.f32 %v1469_v42, %v843_v43 }
 0x8b0   :  { %847 = vst [vmem:[#allocation20] sm:$0xff] %v844_v44 }
 0x8b5   :  { %v845_v45 = vpop.f32.mrf.mxu2 }
 0x8bd   :  { %v1048_v49 = vpop.f32.mrf.mxu2 }
 0x8be   :  { %v1049_v36 = vadd.f32 %v1470_v48, %v1048_v49 }
 0x8c0   :  { %1053 = vst [vmem:[#allocation20 + $0x8] sm:$0xff] %v1049_v36 }
 0x8c5   :  { %v1050_v37 = vpop.f32.mrf.mxu2 }
 0x8c7   :  { %v1250_v52 = vpop.f32.mrf.mxu0 }
 0x8c8   :  { %v1251_v54 = vadd.f32 %v1471_v50, %v1250_v52 }
 0x8ca   :  { %1255 = vst [vmem:[#allocation20 + $0x10] sm:$0xff] %v1251_v54 }
 0x8cb   :  { %1268 = dma.vmem_to_hbm [thread:$0]  %s1261_s8, 384, %s1263_s20, [#allocation5], %s1785_s16, %s1785_s16, %s1786_s17  }
 0x8cf   :  { %v1252_v56 = vpop.f32.mrf.mxu0 }
 0x8d0   :  { %1782 = dma.done.wait [#allocation5], 384  }
 0x8d1   :  { %1783 = vsyncadd [#allocation5], 4294966912 }
 0x8d2   :  { %1273 = vsyncpa [#allocation4], 1 }
 0x8d3   :  { %1274 = vsyncpa [#allocation7], 1 }
 0x8d4   :  { %1275 = vsyncpa [#allocation10], 1 }
 0x8d5   :  { %1276 = vsyncpa [#allocation13], 1 }
 0x8d6   :  { %1277 = vsyncpa [#allocation16], 1 }
 0x8d7   :  { %1278 = vsyncpa [#allocation19], 1 }
 0x8d8   :  { %1279 = vsyncpa [#allocation5], 1 }

</bundles_post_ra>
